<compile_context>
chip_gen: v7x
topology: tpu7x:2x2x1
jax: 0.10.0
libtpu: 0.0.40
codegen_flags: <defaults>
</compile_context>

<pallas_src>
import functools
import math

import jax
import jax.numpy as jnp
from jax import lax
from jax.experimental import pallas as pl
from jax.experimental.pallas import tpu as pltpu

# ---------------- configuration (small, strict_mode-consistent) ----------------
IMG = 16
CIN = 4
PATCH = 4
EMB = CIN * PATCH * PATCH            # 64  (strict_mode: C * P^2 == D)
HEADS = 4
HEAD_DIM = EMB // HEADS              # 16
MLP_SIZE = 128
NUM_CLASSES = 10
DEPTH = 2
BATCH = 2

NP_ = (IMG // PATCH) ** 2            # 16 patches
N = NP_ + 1                          # 17 tokens (zero "cls" token prepended)
PATCH_DIM = CIN * PATCH * PATCH      # 64
SCALE = HEAD_DIM ** (-0.5)
LN_EPS = 1e-5
CLS_PAD = 128                        # lane-dense padded classifier width
VEC_W = 128                          # lane width of packed bias/LN slabs
MAX_IMAGES_PER_BLOCK = 8             # images merged per grid step (tokens ~6 KiB/img)

# bf16 MXU operands, fp32 accumulation (review recommendation on all gens).
MXU_DTYPE = jnp.bfloat16

# layer_vecs row layout (per layer, packed bias/LN slab)
LV_LN1_W, LV_LN1_B, LV_PROJ_B, LV_LN2_W, LV_LN2_B, LV_MLP_B1, LV_MLP_B2 = range(7)
# epi_vecs row layout (epilogue slab)
EV_FB1, EV_FB2, EV_LN_W, EV_LN_B, EV_CLS_B = range(5)


# ---------------- in-kernel math helpers ----------------
def _mm(a, b):
    return jnp.dot(a.astype(MXU_DTYPE), b.astype(MXU_DTYPE),
                   preferred_element_type=jnp.float32)


def _qkt(q, k):
    # contract last dims of both operands ('nd,md->nm'): no materialized k.T
    return lax.dot_general(q.astype(MXU_DTYPE), k.astype(MXU_DTYPE),
                           (((1,), (1,)), ((), ())),
                           preferred_element_type=jnp.float32)


def _layernorm(x, w, b):
    # torch.nn.LayerNorm: biased variance, eps inside sqrt.  One-pass stats.
    mu = jnp.mean(x, axis=-1, keepdims=True)
    var = jnp.mean(x * x, axis=-1, keepdims=True) - mu * mu
    return (x - mu) * lax.rsqrt(var + LN_EPS) * w[None, :] + b[None, :]


def _gelu(x):
    # exact (erf-based) GELU, matching nn.GELU() default
    return 0.5 * x * (1.0 + lax.erf(x * (1.0 / math.sqrt(2.0))))


def _softmax(x):
    m = jnp.max(x, axis=-1, keepdims=True)
    e = jnp.exp(x - m)
    return e * pl.reciprocal(jnp.sum(e, axis=-1, keepdims=True), approx=True)


# ---------------- the Pallas kernel ----------------
def vit_kernel(tokens_ref, biaspos_ref, convw_ref, attnw_ref, mlpw1_ref, mlpw2_ref,
               lvec_ref, fw1_ref, fw2_ref, clsw_ref, evec_ref,
               out_ref, heads_ref, cls_ref, *, b_blk):
    # tokens_ref: (1, b_blk*N, PATCH_DIM).  Row b*N of each image is all-zero
    # (the prepended cls token), so its patch-embed matmul result is exactly 0;
    # biaspos_ref already folds conv-bias (zeroed on cls rows) + pos-embedding,
    # tiled over the b_blk images of the block.
    t = tokens_ref[0]                                        # (R, PATCH_DIM)
    x = _mm(t, convw_ref[...]) + biaspos_ref[...]             # (R, EMB), fp32

    for l in range(DEPTH):
        lv = lvec_ref[l]                                      # (8, VEC_W) fp32

        # ---- multi-head self-attention block (pre-norm, residual) ----
        h = _layernorm(x, lv[LV_LN1_W, :EMB], lv[LV_LN1_B, :EMB])
        hb = h.astype(MXU_DTYPE)
        q = _mm(hb, attnw_ref[l, 0])                          # (R, EMB)
        k = _mm(hb, attnw_ref[l, 1])
        v = _mm(hb, attnw_ref[l, 2])
        for b in range(b_blk):                                # per-image attention
            r0 = b * N
            qb = q[r0:r0 + N, :]
            kb = k[r0:r0 + N, :]
            vb = v[r0:r0 + N, :]
            for hd in range(HEADS):
                c0 = hd * HEAD_DIM
                qh = qb[:, c0:c0 + HEAD_DIM]
                kh = kb[:, c0:c0 + HEAD_DIM]
                vh = vb[:, c0:c0 + HEAD_DIM]
                attn = _softmax(_qkt(qh, kh) * SCALE)         # (N, N)
                # head output -> static lane/sublane offset of VMEM scratch
                heads_ref[r0:r0 + N, c0:c0 + HEAD_DIM] = _mm(attn, vh)
        # single fused output projection over all rows of the block
        x = x + _mm(heads_ref[...], attnw_ref[l, 3]) + lv[LV_PROJ_B, :EMB][None, :]

        # ---- MLP block (pre-norm, residual) ----
        h = _layernorm(x, lv[LV_LN2_W, :EMB], lv[LV_LN2_B, :EMB])
        h = _gelu(_mm(h, mlpw1_ref[l]) + lv[LV_MLP_B1, :MLP_SIZE][None, :])
        x = x + _mm(h, mlpw2_ref[l]) + lv[LV_MLP_B2, :EMB][None, :]

    # ---- epilogue on the cls tokens only (row-wise ops, bit-identical) ----
    for b in range(b_blk):
        cls_ref[b:b + 1, :] = x[b * N:b * N + 1, :]
    cls = cls_ref[...]                                        # (b_blk, EMB)
    ev = evec_ref[...]
    h = _gelu(_mm(cls, fw1_ref[...]) + ev[EV_FB1, :MLP_SIZE][None, :])
    cls = _mm(h, fw2_ref[...]) + ev[EV_FB2, :EMB][None, :]
    cls = _layernorm(cls, ev[EV_LN_W, :EMB], ev[EV_LN_B, :EMB])
    # lane-dense (128-wide, zero-padded) classifier output, b_blk rows at once
    out_ref[0] = _mm(cls, clsw_ref[...]) + ev[EV_CLS_B, :CLS_PAD][None, :]


# ---------------- glue: patch extraction, pos-embed, params ----------------
def extract_patches(x_nchw, p):
    # equivalent to Conv2d(kernel=stride=p) input gathering; per-patch flatten
    # order is (C, P, P), matching the conv-weight flatten order.
    b, c, h, w = x_nchw.shape
    hp, wp = h // p, w // p
    x = x_nchw.reshape(b, c, hp, p, wp, p)
    x = x.transpose(0, 2, 4, 1, 3, 5)                 # (B, Hp, Wp, C, P, P)
    return x.reshape(b, hp * wp, c * p * p)


def make_pos_embed(num_tokens, d):
    pos = jnp.arange(num_tokens, dtype=jnp.float32)[:, None]
    ia = jnp.exp(jnp.arange(0, d, 2, dtype=jnp.float32) * (-math.log(10000.0) / d))[None, :]
    ang = pos @ ia                                     # (num_tokens, d//2)
    pe = jnp.zeros((num_tokens, d), jnp.float32)
    pe = pe.at[:, 0::2].set(jnp.sin(ang)[:, :d // 2 + 1])
    pe = pe.at[:, 1::2].set(jnp.cos(ang)[:, :d // 2])
    return pe


def init_params(key):
    ks = jax.random.split(key, 20)

    def w(k, shape, scale=0.02):
        return (scale * jax.random.normal(k, shape)).astype(jnp.float32)

    conv_w = w(ks[0], (PATCH_DIM, EMB))                # conv weight reshaped (C*P*P, D)
    conv_b = w(ks[1], (EMB,))
    # conv bias (zero on the prepended-token row) folded with the sinusoidal
    # positional embedding into a single (N, EMB) additive term.
    conv_b_full = jnp.concatenate(
        [jnp.zeros((1, EMB), jnp.float32), jnp.tile(conv_b[None, :], (NP_, 1))], axis=0)
    bias_pos = conv_b_full + make_pos_embed(N, EMB)

    # fused, lane-major attention weights: (DEPTH, {q,k,v,proj}, EMB, EMB)
    wq = w(ks[2], (DEPTH, EMB, EMB))
    wk = w(ks[3], (DEPTH, EMB, EMB))
    wv = w(ks[4], (DEPTH, EMB, EMB))
    wproj = w(ks[5], (DEPTH, EMB, EMB))
    attn_w = jnp.stack([wq, wk, wv, wproj], axis=1)

    proj_b = w(ks[6], (DEPTH, EMB))
    mlp_w1 = w(ks[7], (DEPTH, EMB, MLP_SIZE))
    mlp_b1 = w(ks[8], (DEPTH, MLP_SIZE))
    mlp_w2 = w(ks[9], (DEPTH, MLP_SIZE, EMB))
    mlp_b2 = w(ks[10], (DEPTH, EMB))

    # per-layer bias/LN vectors packed into one (8, 128) fp32 slab per layer
    layer_vecs = jnp.zeros((DEPTH, 8, VEC_W), jnp.float32)
    layer_vecs = layer_vecs.at[:, LV_LN1_W, :EMB].set(jnp.ones((DEPTH, EMB)))
    layer_vecs = layer_vecs.at[:, LV_LN1_B, :EMB].set(jnp.zeros((DEPTH, EMB)))
    layer_vecs = layer_vecs.at[:, LV_PROJ_B, :EMB].set(proj_b)
    layer_vecs = layer_vecs.at[:, LV_LN2_W, :EMB].set(jnp.ones((DEPTH, EMB)))
    layer_vecs = layer_vecs.at[:, LV_LN2_B, :EMB].set(jnp.zeros((DEPTH, EMB)))
    layer_vecs = layer_vecs.at[:, LV_MLP_B1, :MLP_SIZE].set(mlp_b1)
    layer_vecs = layer_vecs.at[:, LV_MLP_B2, :EMB].set(mlp_b2)

    fmlp_w1 = w(ks[11], (EMB, MLP_SIZE))
    fmlp_b1 = w(ks[12], (MLP_SIZE,))
    fmlp_w2 = w(ks[13], (MLP_SIZE, EMB))
    fmlp_b2 = w(ks[14], (EMB,))
    cls_w = w(ks[15], (EMB, NUM_CLASSES))
    cls_b = w(ks[16], (NUM_CLASSES,))

    # classifier padded to a lane-dense 128-wide output block
    cls_w_pad = jnp.zeros((EMB, CLS_PAD), jnp.float32).at[:, :NUM_CLASSES].set(cls_w)

    # epilogue bias/LN vectors packed into one (8, 128) fp32 slab
    epi_vecs = jnp.zeros((8, VEC_W), jnp.float32)
    epi_vecs = epi_vecs.at[EV_FB1, :MLP_SIZE].set(fmlp_b1)
    epi_vecs = epi_vecs.at[EV_FB2, :EMB].set(fmlp_b2)
    epi_vecs = epi_vecs.at[EV_LN_W, :EMB].set(jnp.ones((EMB,)))
    epi_vecs = epi_vecs.at[EV_LN_B, :EMB].set(jnp.zeros((EMB,)))
    epi_vecs = epi_vecs.at[EV_CLS_B, :NUM_CLASSES].set(cls_b)

    return dict(
        bias_pos=bias_pos,                             # fp32 (added to fp32 residual)
        conv_w=conv_w.astype(MXU_DTYPE),
        attn_w=attn_w.astype(MXU_DTYPE),
        mlp_w1=mlp_w1.astype(MXU_DTYPE),
        mlp_w2=mlp_w2.astype(MXU_DTYPE),
        layer_vecs=layer_vecs,
        fmlp_w1=fmlp_w1.astype(MXU_DTYPE),
        fmlp_w2=fmlp_w2.astype(MXU_DTYPE),
        cls_w_pad=cls_w_pad.astype(MXU_DTYPE),
        epi_vecs=epi_vecs,
    )


def vit_forward(x_nchw, params, *, max_images_per_block=MAX_IMAGES_PER_BLOCK):
    b = x_nchw.shape[0]
    b_blk = max(1, min(b, max_images_per_block))       # images merged per grid step
    num_blocks = -(-b // b_blk)
    bp = num_blocks * b_blk
    r_blk = b_blk * N                                  # token rows per grid step

    patches = extract_patches(x_nchw.astype(jnp.float32), PATCH)        # (B, NP, PD)
    tokens = jnp.concatenate(
        [jnp.zeros((b, 1, PATCH_DIM), jnp.float32), patches], axis=1)    # (B, N, PD)
    if bp != b:
        tokens = jnp.concatenate(
            [tokens, jnp.zeros((bp - b, N, PATCH_DIM), jnp.float32)], axis=0)
    tokens = tokens.reshape(num_blocks, r_blk, PATCH_DIM)

    # conv-bias + pos-embed term, tiled for the b_blk images of a block
    biaspos = jnp.tile(params["bias_pos"], (b_blk, 1))                   # (r_blk, EMB)

    weights = [biaspos, params["conv_w"], params["attn_w"], params["mlp_w1"],
               params["mlp_w2"], params["layer_vecs"], params["fmlp_w1"],
               params["fmlp_w2"], params["cls_w_pad"], params["epi_vecs"]]

    def full_spec(shape):
        # constant index_map: block never changes, fetched once across the grid
        return pl.BlockSpec(shape, lambda i, _n=len(shape): (0,) * _n)

    in_specs = [pl.BlockSpec((1, r_blk, PATCH_DIM), lambda i: (i, 0, 0))]
    in_specs += [full_spec(w_.shape) for w_ in weights]
    out_spec = pl.BlockSpec((1, b_blk, CLS_PAD), lambda i: (i, 0, 0))

    kernel = functools.partial(vit_kernel, b_blk=b_blk)

    padded = pl.pallas_call(
        kernel,
        out_shape=jax.ShapeDtypeStruct((num_blocks, b_blk, CLS_PAD), jnp.float32),
        grid_spec=pltpu.PrefetchScalarGridSpec(
            num_scalar_prefetch=0,
            grid=(num_blocks,),
            in_specs=in_specs,
            out_specs=out_spec,
            scratch_shapes=[
                pltpu.VMEM((r_blk, EMB), jnp.float32),   # concatenated head outputs
                pltpu.VMEM((b_blk, EMB), jnp.float32),   # gathered cls tokens
            ],
        ),
        compiler_params=pltpu.CompilerParams(
            dimension_semantics=("parallel",)),          # v7x: batch blocks split across TCs
    )(tokens, *weights)

    return padded.reshape(bp, CLS_PAD)[:b, :NUM_CLASSES]


if __name__ == "__main__":
    key = jax.random.PRNGKey(0)
    k_x, k_p = jax.random.split(key)
    x = jax.random.normal(k_x, (BATCH, CIN, IMG, IMG), dtype=jnp.float32)  # NCHW like PyTorch
    params = init_params(k_p)

    logits = vit_forward(x, params)
    jax.block_until_ready(logits)
    assert logits.shape == (BATCH, NUM_CLASSES)
    print("KERNEL_OK")
</pallas_src>

<mosaic_0001>
module attributes {stable_mosaic.version = 11 : i64} {
  func.func @vit_kernel(%arg0: i32, %arg1: memref<1x34x64xf32, #tpu.memory_space<vmem>>, %arg2: memref<34x64xf32, #tpu.memory_space<vmem>>, %arg3: memref<64x64xbf16, #tpu.memory_space<vmem>>, %arg4: memref<2x4x64x64xbf16, #tpu.memory_space<vmem>>, %arg5: memref<2x64x128xbf16, #tpu.memory_space<vmem>>, %arg6: memref<2x128x64xbf16, #tpu.memory_space<vmem>>, %arg7: memref<2x8x128xf32, #tpu.memory_space<vmem>>, %arg8: memref<64x128xbf16, #tpu.memory_space<vmem>>, %arg9: memref<128x64xbf16, #tpu.memory_space<vmem>>, %arg10: memref<64x128xbf16, #tpu.memory_space<vmem>>, %arg11: memref<8x128xf32, #tpu.memory_space<vmem>>, %arg12: memref<1x2x128xf32, #tpu.memory_space<vmem>>, %arg13: memref<34x64xf32, #tpu.memory_space<vmem>>, %arg14: memref<2x64xf32, #tpu.memory_space<vmem>>) attributes {dimension_semantics = [#tpu.dimension_semantics<parallel>], iteration_bounds = array<i64: 1>, scalar_prefetch = 0 : i64, scratch_operands = 2 : i64, tpu.core_type = #tpu.core_type<tc>, window_params = [{transform_indices = @transform_0, window_bounds = array<i64: 1, 34, 64>}, {pipeline_mode = #tpu.pipeline_mode<synchronous>, transform_indices = @transform_1, window_bounds = array<i64: 34, 64>}, {pipeline_mode = #tpu.pipeline_mode<synchronous>, transform_indices = @transform_2, window_bounds = array<i64: 64, 64>}, {pipeline_mode = #tpu.pipeline_mode<synchronous>, transform_indices = @transform_3, window_bounds = array<i64: 2, 4, 64, 64>}, {pipeline_mode = #tpu.pipeline_mode<synchronous>, transform_indices = @transform_4, window_bounds = array<i64: 2, 64, 128>}, {pipeline_mode = #tpu.pipeline_mode<synchronous>, transform_indices = @transform_5, window_bounds = array<i64: 2, 128, 64>}, {pipeline_mode = #tpu.pipeline_mode<synchronous>, transform_indices = @transform_6, window_bounds = array<i64: 2, 8, 128>}, {pipeline_mode = #tpu.pipeline_mode<synchronous>, transform_indices = @transform_7, window_bounds = array<i64: 64, 128>}, {pipeline_mode = #tpu.pipeline_mode<synchronous>, transform_indices = @transform_8, window_bounds = array<i64: 128, 64>}, {pipeline_mode = #tpu.pipeline_mode<synchronous>, transform_indices = @transform_9, window_bounds = array<i64: 64, 128>}, {pipeline_mode = #tpu.pipeline_mode<synchronous>, transform_indices = @transform_10, window_bounds = array<i64: 8, 128>}, {transform_indices = @transform_11, window_bounds = array<i64: 1, 2, 128>}]} {
    %c0 = arith.constant 0 : index
    %c0_0 = arith.constant 0 : index
    %c0_1 = arith.constant 0 : index
    %0 = vector.load %arg1[%c0, %c0_0, %c0_1] : memref<1x34x64xf32, #tpu.memory_space<vmem>>, vector<1x34x64xf32>
    %1 = vector.shape_cast %0 : vector<1x34x64xf32> to vector<34x64xf32>
    %c0_2 = arith.constant 0 : index
    %c0_3 = arith.constant 0 : index
    %2 = vector.load %arg3[%c0_2, %c0_3] : memref<64x64xbf16, #tpu.memory_space<vmem>>, vector<64x64xbf16>
    %3 = arith.truncf %1 : vector<34x64xf32> to vector<34x64xbf16>
    %cst = arith.constant dense<0.000000e+00> : vector<34x64xf32>
    %4 = tpu.matmul %3, %2, %cst {dimension_numbers = #tpu.dot_dimension_numbers<[1], [0], [0], [1], [0, 0, 1, 1], [], []>} : vector<34x64xbf16>, vector<64x64xbf16>, vector<34x64xf32> -> vector<34x64xf32>
    %c0_4 = arith.constant 0 : index
    %c0_5 = arith.constant 0 : index
    %5 = vector.load %arg2[%c0_4, %c0_5] : memref<34x64xf32, #tpu.memory_space<vmem>>, vector<34x64xf32>
    %6 = arith.addf %4, %5 : vector<34x64xf32>
    %c0_6 = arith.constant 0 : index
    %c0_7 = arith.constant 0 : index
    %c0_8 = arith.constant 0 : index
    %7 = vector.load %arg7[%c0_6, %c0_7, %c0_8] : memref<2x8x128xf32, #tpu.memory_space<vmem>>, vector<1x8x128xf32>
    %8 = vector.shape_cast %7 : vector<1x8x128xf32> to vector<8x128xf32>
    %9 = vector.extract_strided_slice %8 {offsets = [0, 0], sizes = [1, 64], strides = [1, 1]} : vector<8x128xf32> to vector<1x64xf32>
    %10 = vector.shape_cast %9 : vector<1x64xf32> to vector<64xf32>
    %11 = vector.extract_strided_slice %8 {offsets = [1, 0], sizes = [1, 64], strides = [1, 1]} : vector<8x128xf32> to vector<1x64xf32>
    %12 = vector.shape_cast %11 : vector<1x64xf32> to vector<64xf32>
    %cst_9 = arith.constant dense<0.000000e+00> : vector<34xf32>
    %13 = vector.multi_reduction <add>, %6, %cst_9 [1] : vector<34x64xf32> to vector<34xf32>
    %14 = vector.shape_cast %13 : vector<34xf32> to vector<34x1xf32>
    %cst_10 = arith.constant 6.400000e+01 : f32
    %15 = vector.broadcast %cst_10 : f32 to vector<34x1xf32>
    %16 = arith.divf %14, %15 : vector<34x1xf32>
    %17 = arith.mulf %6, %6 : vector<34x64xf32>
    %cst_11 = arith.constant dense<0.000000e+00> : vector<34xf32>
    %18 = vector.multi_reduction <add>, %17, %cst_11 [1] : vector<34x64xf32> to vector<34xf32>
    %19 = vector.shape_cast %18 : vector<34xf32> to vector<34x1xf32>
    %cst_12 = arith.constant 6.400000e+01 : f32
    %20 = vector.broadcast %cst_12 : f32 to vector<34x1xf32>
    %21 = arith.divf %19, %20 : vector<34x1xf32>
    %22 = arith.mulf %16, %16 : vector<34x1xf32>
    %23 = arith.subf %21, %22 : vector<34x1xf32>
    %24 = vector.broadcast %16 : vector<34x1xf32> to vector<34x64xf32>
    %25 = arith.subf %6, %24 : vector<34x64xf32>
    %cst_13 = arith.constant 9.99999974E-6 : f32
    %26 = vector.broadcast %cst_13 : f32 to vector<34x1xf32>
    %27 = arith.addf %23, %26 : vector<34x1xf32>
    %28 = math.rsqrt %27 : vector<34x1xf32>
    %29 = vector.broadcast %28 : vector<34x1xf32> to vector<34x64xf32>
    %30 = arith.mulf %25, %29 : vector<34x64xf32>
    %31 = vector.shape_cast %10 : vector<64xf32> to vector<1x64xf32>
    %32 = vector.broadcast %31 : vector<1x64xf32> to vector<34x64xf32>
    %33 = arith.mulf %30, %32 : vector<34x64xf32>
    %34 = vector.shape_cast %12 : vector<64xf32> to vector<1x64xf32>
    %35 = vector.broadcast %34 : vector<1x64xf32> to vector<34x64xf32>
    %36 = arith.addf %33, %35 : vector<34x64xf32>
    %37 = arith.truncf %36 : vector<34x64xf32> to vector<34x64xbf16>
    %c0_14 = arith.constant 0 : index
    %c0_15 = arith.constant 0 : index
    %c0_16 = arith.constant 0 : index
    %c0_17 = arith.constant 0 : index
    %38 = vector.load %arg4[%c0_14, %c0_15, %c0_16, %c0_17] : memref<2x4x64x64xbf16, #tpu.memory_space<vmem>>, vector<1x1x64x64xbf16>
    %39 = vector.shape_cast %38 : vector<1x1x64x64xbf16> to vector<64x64xbf16>
    %cst_18 = arith.constant dense<0.000000e+00> : vector<34x64xf32>
    %40 = tpu.matmul %37, %39, %cst_18 {dimension_numbers = #tpu.dot_dimension_numbers<[1], [0], [0], [1], [0, 0, 1, 1], [], []>} : vector<34x64xbf16>, vector<64x64xbf16>, vector<34x64xf32> -> vector<34x64xf32>
    %c0_19 = arith.constant 0 : index
    %c1 = arith.constant 1 : index
    %c0_20 = arith.constant 0 : index
    %c0_21 = arith.constant 0 : index
    %41 = vector.load %arg4[%c0_19, %c1, %c0_20, %c0_21] : memref<2x4x64x64xbf16, #tpu.memory_space<vmem>>, vector<1x1x64x64xbf16>
    %42 = vector.shape_cast %41 : vector<1x1x64x64xbf16> to vector<64x64xbf16>
    %cst_22 = arith.constant dense<0.000000e+00> : vector<34x64xf32>
    %43 = tpu.matmul %37, %42, %cst_22 {dimension_numbers = #tpu.dot_dimension_numbers<[1], [0], [0], [1], [0, 0, 1, 1], [], []>} : vector<34x64xbf16>, vector<64x64xbf16>, vector<34x64xf32> -> vector<34x64xf32>
    %c0_23 = arith.constant 0 : index
    %c2 = arith.constant 2 : index
    %c0_24 = arith.constant 0 : index
    %c0_25 = arith.constant 0 : index
    %44 = vector.load %arg4[%c0_23, %c2, %c0_24, %c0_25] : memref<2x4x64x64xbf16, #tpu.memory_space<vmem>>, vector<1x1x64x64xbf16>
    %45 = vector.shape_cast %44 : vector<1x1x64x64xbf16> to vector<64x64xbf16>
    %cst_26 = arith.constant dense<0.000000e+00> : vector<34x64xf32>
    %46 = tpu.matmul %37, %45, %cst_26 {dimension_numbers = #tpu.dot_dimension_numbers<[1], [0], [0], [1], [0, 0, 1, 1], [], []>} : vector<34x64xbf16>, vector<64x64xbf16>, vector<34x64xf32> -> vector<34x64xf32>
    %47 = vector.extract_strided_slice %40 {offsets = [0, 0], sizes = [17, 64], strides = [1, 1]} : vector<34x64xf32> to vector<17x64xf32>
    %48 = vector.extract_strided_slice %43 {offsets = [0, 0], sizes = [17, 64], strides = [1, 1]} : vector<34x64xf32> to vector<17x64xf32>
    %49 = vector.extract_strided_slice %46 {offsets = [0, 0], sizes = [17, 64], strides = [1, 1]} : vector<34x64xf32> to vector<17x64xf32>
    %50 = vector.extract_strided_slice %47 {offsets = [0, 0], sizes = [17, 16], strides = [1, 1]} : vector<17x64xf32> to vector<17x16xf32>
    %51 = vector.extract_strided_slice %48 {offsets = [0, 0], sizes = [17, 16], strides = [1, 1]} : vector<17x64xf32> to vector<17x16xf32>
    %52 = vector.extract_strided_slice %49 {offsets = [0, 0], sizes = [17, 16], strides = [1, 1]} : vector<17x64xf32> to vector<17x16xf32>
    %53 = arith.truncf %50 : vector<17x16xf32> to vector<17x16xbf16>
    %54 = arith.truncf %51 : vector<17x16xf32> to vector<17x16xbf16>
    %cst_27 = arith.constant dense<0.000000e+00> : vector<17x17xf32>
    %55 = tpu.matmul %53, %54, %cst_27 {dimension_numbers = #tpu.dot_dimension_numbers<[1], [1], [0], [0], [0, 0, 1, 0], [], []>} : vector<17x16xbf16>, vector<17x16xbf16>, vector<17x17xf32> -> vector<17x17xf32>
    %cst_28 = arith.constant 2.500000e-01 : f32
    %56 = vector.broadcast %cst_28 : f32 to vector<17x17xf32>
    %57 = arith.mulf %55, %56 : vector<17x17xf32>
    %cst_29 = arith.constant dense<0xFF800000> : vector<17xf32>
    %58 = vector.multi_reduction <maximumf>, %57, %cst_29 [1] : vector<17x17xf32> to vector<17xf32>
    %59 = vector.shape_cast %58 : vector<17xf32> to vector<17x1xf32>
    %60 = vector.broadcast %59 : vector<17x1xf32> to vector<17x17xf32>
    %61 = arith.subf %57, %60 : vector<17x17xf32>
    %62 = math.exp %61 : vector<17x17xf32>
    %cst_30 = arith.constant dense<0.000000e+00> : vector<17xf32>
    %63 = vector.multi_reduction <add>, %62, %cst_30 [1] : vector<17x17xf32> to vector<17xf32>
    %64 = vector.shape_cast %63 : vector<17xf32> to vector<17x1xf32>
    %65 = tpu.reciprocal %64 {approx = true} : vector<17x1xf32> -> vector<17x1xf32>
    %66 = vector.broadcast %65 : vector<17x1xf32> to vector<17x17xf32>
    %67 = arith.mulf %62, %66 : vector<17x17xf32>
    %68 = arith.truncf %67 : vector<17x17xf32> to vector<17x17xbf16>
    %69 = arith.truncf %52 : vector<17x16xf32> to vector<17x16xbf16>
    %cst_31 = arith.constant dense<0.000000e+00> : vector<17x16xf32>
    %70 = tpu.matmul %68, %69, %cst_31 {dimension_numbers = #tpu.dot_dimension_numbers<[1], [0], [0], [1], [0, 0, 1, 1], [], []>} : vector<17x17xbf16>, vector<17x16xbf16>, vector<17x16xf32> -> vector<17x16xf32>
    %c0_32 = arith.constant 0 : index
    %c0_33 = arith.constant 0 : index
    %71 = vector.load %arg13[%c0_32, %c0_33] : memref<34x64xf32, #tpu.memory_space<vmem>>, vector<17x16xf32>
    tpu.vector_store %arg13[%c0_32, %c0_33], %70 {strides = array<i32>} : memref<34x64xf32, #tpu.memory_space<vmem>>, vector<17x16xf32>,
    %72 = vector.extract_strided_slice %47 {offsets = [0, 16], sizes = [17, 16], strides = [1, 1]} : vector<17x64xf32> to vector<17x16xf32>
    %73 = vector.extract_strided_slice %48 {offsets = [0, 16], sizes = [17, 16], strides = [1, 1]} : vector<17x64xf32> to vector<17x16xf32>
    %74 = vector.extract_strided_slice %49 {offsets = [0, 16], sizes = [17, 16], strides = [1, 1]} : vector<17x64xf32> to vector<17x16xf32>
    %75 = arith.truncf %72 : vector<17x16xf32> to vector<17x16xbf16>
    %76 = arith.truncf %73 : vector<17x16xf32> to vector<17x16xbf16>
    %cst_34 = arith.constant dense<0.000000e+00> : vector<17x17xf32>
    %77 = tpu.matmul %75, %76, %cst_34 {dimension_numbers = #tpu.dot_dimension_numbers<[1], [1], [0], [0], [0, 0, 1, 0], [], []>} : vector<17x16xbf16>, vector<17x16xbf16>, vector<17x17xf32> -> vector<17x17xf32>
    %cst_35 = arith.constant 2.500000e-01 : f32
    %78 = vector.broadcast %cst_35 : f32 to vector<17x17xf32>
    %79 = arith.mulf %77, %78 : vector<17x17xf32>
    %cst_36 = arith.constant dense<0xFF800000> : vector<17xf32>
    %80 = vector.multi_reduction <maximumf>, %79, %cst_36 [1] : vector<17x17xf32> to vector<17xf32>
    %81 = vector.shape_cast %80 : vector<17xf32> to vector<17x1xf32>
    %82 = vector.broadcast %81 : vector<17x1xf32> to vector<17x17xf32>
    %83 = arith.subf %79, %82 : vector<17x17xf32>
    %84 = math.exp %83 : vector<17x17xf32>
    %cst_37 = arith.constant dense<0.000000e+00> : vector<17xf32>
    %85 = vector.multi_reduction <add>, %84, %cst_37 [1] : vector<17x17xf32> to vector<17xf32>
    %86 = vector.shape_cast %85 : vector<17xf32> to vector<17x1xf32>
    %87 = tpu.reciprocal %86 {approx = true} : vector<17x1xf32> -> vector<17x1xf32>
    %88 = vector.broadcast %87 : vector<17x1xf32> to vector<17x17xf32>
    %89 = arith.mulf %84, %88 : vector<17x17xf32>
    %90 = arith.truncf %89 : vector<17x17xf32> to vector<17x17xbf16>
    %91 = arith.truncf %74 : vector<17x16xf32> to vector<17x16xbf16>
    %cst_38 = arith.constant dense<0.000000e+00> : vector<17x16xf32>
    %92 = tpu.matmul %90, %91, %cst_38 {dimension_numbers = #tpu.dot_dimension_numbers<[1], [0], [0], [1], [0, 0, 1, 1], [], []>} : vector<17x17xbf16>, vector<17x16xbf16>, vector<17x16xf32> -> vector<17x16xf32>
    %c0_39 = arith.constant 0 : index
    %c16 = arith.constant 16 : index
    %93 = vector.load %arg13[%c0_39, %c16] : memref<34x64xf32, #tpu.memory_space<vmem>>, vector<17x16xf32>
    tpu.vector_store %arg13[%c0_39, %c16], %92 {strides = array<i32>} : memref<34x64xf32, #tpu.memory_space<vmem>>, vector<17x16xf32>,
    %94 = vector.extract_strided_slice %47 {offsets = [0, 32], sizes = [17, 16], strides = [1, 1]} : vector<17x64xf32> to vector<17x16xf32>
    %95 = vector.extract_strided_slice %48 {offsets = [0, 32], sizes = [17, 16], strides = [1, 1]} : vector<17x64xf32> to vector<17x16xf32>
    %96 = vector.extract_strided_slice %49 {offsets = [0, 32], sizes = [17, 16], strides = [1, 1]} : vector<17x64xf32> to vector<17x16xf32>
    %97 = arith.truncf %94 : vector<17x16xf32> to vector<17x16xbf16>
    %98 = arith.truncf %95 : vector<17x16xf32> to vector<17x16xbf16>
    %cst_40 = arith.constant dense<0.000000e+00> : vector<17x17xf32>
    %99 = tpu.matmul %97, %98, %cst_40 {dimension_numbers = #tpu.dot_dimension_numbers<[1], [1], [0], [0], [0, 0, 1, 0], [], []>} : vector<17x16xbf16>, vector<17x16xbf16>, vector<17x17xf32> -> vector<17x17xf32>
    %cst_41 = arith.constant 2.500000e-01 : f32
    %100 = vector.broadcast %cst_41 : f32 to vector<17x17xf32>
    %101 = arith.mulf %99, %100 : vector<17x17xf32>
    %cst_42 = arith.constant dense<0xFF800000> : vector<17xf32>
    %102 = vector.multi_reduction <maximumf>, %101, %cst_42 [1] : vector<17x17xf32> to vector<17xf32>
    %103 = vector.shape_cast %102 : vector<17xf32> to vector<17x1xf32>
    %104 = vector.broadcast %103 : vector<17x1xf32> to vector<17x17xf32>
    %105 = arith.subf %101, %104 : vector<17x17xf32>
    %106 = math.exp %105 : vector<17x17xf32>
    %cst_43 = arith.constant dense<0.000000e+00> : vector<17xf32>
    %107 = vector.multi_reduction <add>, %106, %cst_43 [1] : vector<17x17xf32> to vector<17xf32>
    %108 = vector.shape_cast %107 : vector<17xf32> to vector<17x1xf32>
    %109 = tpu.reciprocal %108 {approx = true} : vector<17x1xf32> -> vector<17x1xf32>
    %110 = vector.broadcast %109 : vector<17x1xf32> to vector<17x17xf32>
    %111 = arith.mulf %106, %110 : vector<17x17xf32>
    %112 = arith.truncf %111 : vector<17x17xf32> to vector<17x17xbf16>
    %113 = arith.truncf %96 : vector<17x16xf32> to vector<17x16xbf16>
    %cst_44 = arith.constant dense<0.000000e+00> : vector<17x16xf32>
    %114 = tpu.matmul %112, %113, %cst_44 {dimension_numbers = #tpu.dot_dimension_numbers<[1], [0], [0], [1], [0, 0, 1, 1], [], []>} : vector<17x17xbf16>, vector<17x16xbf16>, vector<17x16xf32> -> vector<17x16xf32>
    %c0_45 = arith.constant 0 : index
    %c32 = arith.constant 32 : index
    %115 = vector.load %arg13[%c0_45, %c32] : memref<34x64xf32, #tpu.memory_space<vmem>>, vector<17x16xf32>
    tpu.vector_store %arg13[%c0_45, %c32], %114 {strides = array<i32>} : memref<34x64xf32, #tpu.memory_space<vmem>>, vector<17x16xf32>,
    %116 = vector.extract_strided_slice %47 {offsets = [0, 48], sizes = [17, 16], strides = [1, 1]} : vector<17x64xf32> to vector<17x16xf32>
    %117 = vector.extract_strided_slice %48 {offsets = [0, 48], sizes = [17, 16], strides = [1, 1]} : vector<17x64xf32> to vector<17x16xf32>
    %118 = vector.extract_strided_slice %49 {offsets = [0, 48], sizes = [17, 16], strides = [1, 1]} : vector<17x64xf32> to vector<17x16xf32>
    %119 = arith.truncf %116 : vector<17x16xf32> to vector<17x16xbf16>
    %120 = arith.truncf %117 : vector<17x16xf32> to vector<17x16xbf16>
    %cst_46 = arith.constant dense<0.000000e+00> : vector<17x17xf32>
    %121 = tpu.matmul %119, %120, %cst_46 {dimension_numbers = #tpu.dot_dimension_numbers<[1], [1], [0], [0], [0, 0, 1, 0], [], []>} : vector<17x16xbf16>, vector<17x16xbf16>, vector<17x17xf32> -> vector<17x17xf32>
    %cst_47 = arith.constant 2.500000e-01 : f32
    %122 = vector.broadcast %cst_47 : f32 to vector<17x17xf32>
    %123 = arith.mulf %121, %122 : vector<17x17xf32>
    %cst_48 = arith.constant dense<0xFF800000> : vector<17xf32>
    %124 = vector.multi_reduction <maximumf>, %123, %cst_48 [1] : vector<17x17xf32> to vector<17xf32>
    %125 = vector.shape_cast %124 : vector<17xf32> to vector<17x1xf32>
    %126 = vector.broadcast %125 : vector<17x1xf32> to vector<17x17xf32>
    %127 = arith.subf %123, %126 : vector<17x17xf32>
    %128 = math.exp %127 : vector<17x17xf32>
    %cst_49 = arith.constant dense<0.000000e+00> : vector<17xf32>
    %129 = vector.multi_reduction <add>, %128, %cst_49 [1] : vector<17x17xf32> to vector<17xf32>
    %130 = vector.shape_cast %129 : vector<17xf32> to vector<17x1xf32>
    %131 = tpu.reciprocal %130 {approx = true} : vector<17x1xf32> -> vector<17x1xf32>
    %132 = vector.broadcast %131 : vector<17x1xf32> to vector<17x17xf32>
    %133 = arith.mulf %128, %132 : vector<17x17xf32>
    %134 = arith.truncf %133 : vector<17x17xf32> to vector<17x17xbf16>
    %135 = arith.truncf %118 : vector<17x16xf32> to vector<17x16xbf16>
    %cst_50 = arith.constant dense<0.000000e+00> : vector<17x16xf32>
    %136 = tpu.matmul %134, %135, %cst_50 {dimension_numbers = #tpu.dot_dimension_numbers<[1], [0], [0], [1], [0, 0, 1, 1], [], []>} : vector<17x17xbf16>, vector<17x16xbf16>, vector<17x16xf32> -> vector<17x16xf32>
    %c0_51 = arith.constant 0 : index
    %c48 = arith.constant 48 : index
    %137 = vector.load %arg13[%c0_51, %c48] : memref<34x64xf32, #tpu.memory_space<vmem>>, vector<17x16xf32>
    tpu.vector_store %arg13[%c0_51, %c48], %136 {strides = array<i32>} : memref<34x64xf32, #tpu.memory_space<vmem>>, vector<17x16xf32>,
    %138 = vector.extract_strided_slice %40 {offsets = [17, 0], sizes = [17, 64], strides = [1, 1]} : vector<34x64xf32> to vector<17x64xf32>
    %139 = vector.extract_strided_slice %43 {offsets = [17, 0], sizes = [17, 64], strides = [1, 1]} : vector<34x64xf32> to vector<17x64xf32>
    %140 = vector.extract_strided_slice %46 {offsets = [17, 0], sizes = [17, 64], strides = [1, 1]} : vector<34x64xf32> to vector<17x64xf32>
    %141 = vector.extract_strided_slice %138 {offsets = [0, 0], sizes = [17, 16], strides = [1, 1]} : vector<17x64xf32> to vector<17x16xf32>
    %142 = vector.extract_strided_slice %139 {offsets = [0, 0], sizes = [17, 16], strides = [1, 1]} : vector<17x64xf32> to vector<17x16xf32>
    %143 = vector.extract_strided_slice %140 {offsets = [0, 0], sizes = [17, 16], strides = [1, 1]} : vector<17x64xf32> to vector<17x16xf32>
    %144 = arith.truncf %141 : vector<17x16xf32> to vector<17x16xbf16>
    %145 = arith.truncf %142 : vector<17x16xf32> to vector<17x16xbf16>
    %cst_52 = arith.constant dense<0.000000e+00> : vector<17x17xf32>
    %146 = tpu.matmul %144, %145, %cst_52 {dimension_numbers = #tpu.dot_dimension_numbers<[1], [1], [0], [0], [0, 0, 1, 0], [], []>} : vector<17x16xbf16>, vector<17x16xbf16>, vector<17x17xf32> -> vector<17x17xf32>
    %cst_53 = arith.constant 2.500000e-01 : f32
    %147 = vector.broadcast %cst_53 : f32 to vector<17x17xf32>
    %148 = arith.mulf %146, %147 : vector<17x17xf32>
    %cst_54 = arith.constant dense<0xFF800000> : vector<17xf32>
    %149 = vector.multi_reduction <maximumf>, %148, %cst_54 [1] : vector<17x17xf32> to vector<17xf32>
    %150 = vector.shape_cast %149 : vector<17xf32> to vector<17x1xf32>
    %151 = vector.broadcast %150 : vector<17x1xf32> to vector<17x17xf32>
    %152 = arith.subf %148, %151 : vector<17x17xf32>
    %153 = math.exp %152 : vector<17x17xf32>
    %cst_55 = arith.constant dense<0.000000e+00> : vector<17xf32>
    %154 = vector.multi_reduction <add>, %153, %cst_55 [1] : vector<17x17xf32> to vector<17xf32>
    %155 = vector.shape_cast %154 : vector<17xf32> to vector<17x1xf32>
    %156 = tpu.reciprocal %155 {approx = true} : vector<17x1xf32> -> vector<17x1xf32>
    %157 = vector.broadcast %156 : vector<17x1xf32> to vector<17x17xf32>
    %158 = arith.mulf %153, %157 : vector<17x17xf32>
    %159 = arith.truncf %158 : vector<17x17xf32> to vector<17x17xbf16>
    %160 = arith.truncf %143 : vector<17x16xf32> to vector<17x16xbf16>
    %cst_56 = arith.constant dense<0.000000e+00> : vector<17x16xf32>
    %161 = tpu.matmul %159, %160, %cst_56 {dimension_numbers = #tpu.dot_dimension_numbers<[1], [0], [0], [1], [0, 0, 1, 1], [], []>} : vector<17x17xbf16>, vector<17x16xbf16>, vector<17x16xf32> -> vector<17x16xf32>
    %c17 = arith.constant 17 : index
    %c0_57 = arith.constant 0 : index
    %162 = vector.load %arg13[%c17, %c0_57] : memref<34x64xf32, #tpu.memory_space<vmem>>, vector<17x16xf32>
    tpu.vector_store %arg13[%c17, %c0_57], %161 {strides = array<i32>} : memref<34x64xf32, #tpu.memory_space<vmem>>, vector<17x16xf32>,
    %163 = vector.extract_strided_slice %138 {offsets = [0, 16], sizes = [17, 16], strides = [1, 1]} : vector<17x64xf32> to vector<17x16xf32>
    %164 = vector.extract_strided_slice %139 {offsets = [0, 16], sizes = [17, 16], strides = [1, 1]} : vector<17x64xf32> to vector<17x16xf32>
    %165 = vector.extract_strided_slice %140 {offsets = [0, 16], sizes = [17, 16], strides = [1, 1]} : vector<17x64xf32> to vector<17x16xf32>
    %166 = arith.truncf %163 : vector<17x16xf32> to vector<17x16xbf16>
    %167 = arith.truncf %164 : vector<17x16xf32> to vector<17x16xbf16>
    %cst_58 = arith.constant dense<0.000000e+00> : vector<17x17xf32>
    %168 = tpu.matmul %166, %167, %cst_58 {dimension_numbers = #tpu.dot_dimension_numbers<[1], [1], [0], [0], [0, 0, 1, 0], [], []>} : vector<17x16xbf16>, vector<17x16xbf16>, vector<17x17xf32> -> vector<17x17xf32>
    %cst_59 = arith.constant 2.500000e-01 : f32
    %169 = vector.broadcast %cst_59 : f32 to vector<17x17xf32>
    %170 = arith.mulf %168, %169 : vector<17x17xf32>
    %cst_60 = arith.constant dense<0xFF800000> : vector<17xf32>
    %171 = vector.multi_reduction <maximumf>, %170, %cst_60 [1] : vector<17x17xf32> to vector<17xf32>
    %172 = vector.shape_cast %171 : vector<17xf32> to vector<17x1xf32>
    %173 = vector.broadcast %172 : vector<17x1xf32> to vector<17x17xf32>
    %174 = arith.subf %170, %173 : vector<17x17xf32>
    %175 = math.exp %174 : vector<17x17xf32>
    %cst_61 = arith.constant dense<0.000000e+00> : vector<17xf32>
    %176 = vector.multi_reduction <add>, %175, %cst_61 [1] : vector<17x17xf32> to vector<17xf32>
    %177 = vector.shape_cast %176 : vector<17xf32> to vector<17x1xf32>
    %178 = tpu.reciprocal %177 {approx = true} : vector<17x1xf32> -> vector<17x1xf32>
    %179 = vector.broadcast %178 : vector<17x1xf32> to vector<17x17xf32>
    %180 = arith.mulf %175, %179 : vector<17x17xf32>
    %181 = arith.truncf %180 : vector<17x17xf32> to vector<17x17xbf16>
    %182 = arith.truncf %165 : vector<17x16xf32> to vector<17x16xbf16>
    %cst_62 = arith.constant dense<0.000000e+00> : vector<17x16xf32>
    %183 = tpu.matmul %181, %182, %cst_62 {dimension_numbers = #tpu.dot_dimension_numbers<[1], [0], [0], [1], [0, 0, 1, 1], [], []>} : vector<17x17xbf16>, vector<17x16xbf16>, vector<17x16xf32> -> vector<17x16xf32>
    %c17_63 = arith.constant 17 : index
    %c16_64 = arith.constant 16 : index
    %184 = vector.load %arg13[%c17_63, %c16_64] : memref<34x64xf32, #tpu.memory_space<vmem>>, vector<17x16xf32>
    tpu.vector_store %arg13[%c17_63, %c16_64], %183 {strides = array<i32>} : memref<34x64xf32, #tpu.memory_space<vmem>>, vector<17x16xf32>,
    %185 = vector.extract_strided_slice %138 {offsets = [0, 32], sizes = [17, 16], strides = [1, 1]} : vector<17x64xf32> to vector<17x16xf32>
    %186 = vector.extract_strided_slice %139 {offsets = [0, 32], sizes = [17, 16], strides = [1, 1]} : vector<17x64xf32> to vector<17x16xf32>
    %187 = vector.extract_strided_slice %140 {offsets = [0, 32], sizes = [17, 16], strides = [1, 1]} : vector<17x64xf32> to vector<17x16xf32>
    %188 = arith.truncf %185 : vector<17x16xf32> to vector<17x16xbf16>
    %189 = arith.truncf %186 : vector<17x16xf32> to vector<17x16xbf16>
    %cst_65 = arith.constant dense<0.000000e+00> : vector<17x17xf32>
    %190 = tpu.matmul %188, %189, %cst_65 {dimension_numbers = #tpu.dot_dimension_numbers<[1], [1], [0], [0], [0, 0, 1, 0], [], []>} : vector<17x16xbf16>, vector<17x16xbf16>, vector<17x17xf32> -> vector<17x17xf32>
    %cst_66 = arith.constant 2.500000e-01 : f32
    %191 = vector.broadcast %cst_66 : f32 to vector<17x17xf32>
    %192 = arith.mulf %190, %191 : vector<17x17xf32>
    %cst_67 = arith.constant dense<0xFF800000> : vector<17xf32>
    %193 = vector.multi_reduction <maximumf>, %192, %cst_67 [1] : vector<17x17xf32> to vector<17xf32>
    %194 = vector.shape_cast %193 : vector<17xf32> to vector<17x1xf32>
    %195 = vector.broadcast %194 : vector<17x1xf32> to vector<17x17xf32>
    %196 = arith.subf %192, %195 : vector<17x17xf32>
    %197 = math.exp %196 : vector<17x17xf32>
    %cst_68 = arith.constant dense<0.000000e+00> : vector<17xf32>
    %198 = vector.multi_reduction <add>, %197, %cst_68 [1] : vector<17x17xf32> to vector<17xf32>
    %199 = vector.shape_cast %198 : vector<17xf32> to vector<17x1xf32>
    %200 = tpu.reciprocal %199 {approx = true} : vector<17x1xf32> -> vector<17x1xf32>
    %201 = vector.broadcast %200 : vector<17x1xf32> to vector<17x17xf32>
    %202 = arith.mulf %197, %201 : vector<17x17xf32>
    %203 = arith.truncf %202 : vector<17x17xf32> to vector<17x17xbf16>
    %204 = arith.truncf %187 : vector<17x16xf32> to vector<17x16xbf16>
    %cst_69 = arith.constant dense<0.000000e+00> : vector<17x16xf32>
    %205 = tpu.matmul %203, %204, %cst_69 {dimension_numbers = #tpu.dot_dimension_numbers<[1], [0], [0], [1], [0, 0, 1, 1], [], []>} : vector<17x17xbf16>, vector<17x16xbf16>, vector<17x16xf32> -> vector<17x16xf32>
    %c17_70 = arith.constant 17 : index
    %c32_71 = arith.constant 32 : index
    %206 = vector.load %arg13[%c17_70, %c32_71] : memref<34x64xf32, #tpu.memory_space<vmem>>, vector<17x16xf32>
    tpu.vector_store %arg13[%c17_70, %c32_71], %205 {strides = array<i32>} : memref<34x64xf32, #tpu.memory_space<vmem>>, vector<17x16xf32>,
    %207 = vector.extract_strided_slice %138 {offsets = [0, 48], sizes = [17, 16], strides = [1, 1]} : vector<17x64xf32> to vector<17x16xf32>
    %208 = vector.extract_strided_slice %139 {offsets = [0, 48], sizes = [17, 16], strides = [1, 1]} : vector<17x64xf32> to vector<17x16xf32>
    %209 = vector.extract_strided_slice %140 {offsets = [0, 48], sizes = [17, 16], strides = [1, 1]} : vector<17x64xf32> to vector<17x16xf32>
    %210 = arith.truncf %207 : vector<17x16xf32> to vector<17x16xbf16>
    %211 = arith.truncf %208 : vector<17x16xf32> to vector<17x16xbf16>
    %cst_72 = arith.constant dense<0.000000e+00> : vector<17x17xf32>
    %212 = tpu.matmul %210, %211, %cst_72 {dimension_numbers = #tpu.dot_dimension_numbers<[1], [1], [0], [0], [0, 0, 1, 0], [], []>} : vector<17x16xbf16>, vector<17x16xbf16>, vector<17x17xf32> -> vector<17x17xf32>
    %cst_73 = arith.constant 2.500000e-01 : f32
    %213 = vector.broadcast %cst_73 : f32 to vector<17x17xf32>
    %214 = arith.mulf %212, %213 : vector<17x17xf32>
    %cst_74 = arith.constant dense<0xFF800000> : vector<17xf32>
    %215 = vector.multi_reduction <maximumf>, %214, %cst_74 [1] : vector<17x17xf32> to vector<17xf32>
    %216 = vector.shape_cast %215 : vector<17xf32> to vector<17x1xf32>
    %217 = vector.broadcast %216 : vector<17x1xf32> to vector<17x17xf32>
    %218 = arith.subf %214, %217 : vector<17x17xf32>
    %219 = math.exp %218 : vector<17x17xf32>
    %cst_75 = arith.constant dense<0.000000e+00> : vector<17xf32>
    %220 = vector.multi_reduction <add>, %219, %cst_75 [1] : vector<17x17xf32> to vector<17xf32>
    %221 = vector.shape_cast %220 : vector<17xf32> to vector<17x1xf32>
    %222 = tpu.reciprocal %221 {approx = true} : vector<17x1xf32> -> vector<17x1xf32>
    %223 = vector.broadcast %222 : vector<17x1xf32> to vector<17x17xf32>
    %224 = arith.mulf %219, %223 : vector<17x17xf32>
    %225 = arith.truncf %224 : vector<17x17xf32> to vector<17x17xbf16>
    %226 = arith.truncf %209 : vector<17x16xf32> to vector<17x16xbf16>
    %cst_76 = arith.constant dense<0.000000e+00> : vector<17x16xf32>
    %227 = tpu.matmul %225, %226, %cst_76 {dimension_numbers = #tpu.dot_dimension_numbers<[1], [0], [0], [1], [0, 0, 1, 1], [], []>} : vector<17x17xbf16>, vector<17x16xbf16>, vector<17x16xf32> -> vector<17x16xf32>
    %c17_77 = arith.constant 17 : index
    %c48_78 = arith.constant 48 : index
    %228 = vector.load %arg13[%c17_77, %c48_78] : memref<34x64xf32, #tpu.memory_space<vmem>>, vector<17x16xf32>
    tpu.vector_store %arg13[%c17_77, %c48_78], %227 {strides = array<i32>} : memref<34x64xf32, #tpu.memory_space<vmem>>, vector<17x16xf32>,
    %c0_79 = arith.constant 0 : index
    %c0_80 = arith.constant 0 : index
    %229 = vector.load %arg13[%c0_79, %c0_80] : memref<34x64xf32, #tpu.memory_space<vmem>>, vector<34x64xf32>
    %c0_81 = arith.constant 0 : index
    %c3 = arith.constant 3 : index
    %c0_82 = arith.constant 0 : index
    %c0_83 = arith.constant 0 : index
    %230 = vector.load %arg4[%c0_81, %c3, %c0_82, %c0_83] : memref<2x4x64x64xbf16, #tpu.memory_space<vmem>>, vector<1x1x64x64xbf16>
    %231 = vector.shape_cast %230 : vector<1x1x64x64xbf16> to vector<64x64xbf16>
    %232 = arith.truncf %229 : vector<34x64xf32> to vector<34x64xbf16>
    %cst_84 = arith.constant dense<0.000000e+00> : vector<34x64xf32>
    %233 = tpu.matmul %232, %231, %cst_84 {dimension_numbers = #tpu.dot_dimension_numbers<[1], [0], [0], [1], [0, 0, 1, 1], [], []>} : vector<34x64xbf16>, vector<64x64xbf16>, vector<34x64xf32> -> vector<34x64xf32>
    %234 = arith.addf %6, %233 : vector<34x64xf32>
    %235 = vector.extract_strided_slice %8 {offsets = [2, 0], sizes = [1, 64], strides = [1, 1]} : vector<8x128xf32> to vector<1x64xf32>
    %236 = vector.shape_cast %235 : vector<1x64xf32> to vector<64xf32>
    %237 = vector.shape_cast %236 : vector<64xf32> to vector<1x64xf32>
    %238 = vector.broadcast %237 : vector<1x64xf32> to vector<34x64xf32>
    %239 = arith.addf %234, %238 : vector<34x64xf32>
    %240 = vector.extract_strided_slice %8 {offsets = [3, 0], sizes = [1, 64], strides = [1, 1]} : vector<8x128xf32> to vector<1x64xf32>
    %241 = vector.shape_cast %240 : vector<1x64xf32> to vector<64xf32>
    %242 = vector.extract_strided_slice %8 {offsets = [4, 0], sizes = [1, 64], strides = [1, 1]} : vector<8x128xf32> to vector<1x64xf32>
    %243 = vector.shape_cast %242 : vector<1x64xf32> to vector<64xf32>
    %cst_85 = arith.constant dense<0.000000e+00> : vector<34xf32>
    %244 = vector.multi_reduction <add>, %239, %cst_85 [1] : vector<34x64xf32> to vector<34xf32>
    %245 = vector.shape_cast %244 : vector<34xf32> to vector<34x1xf32>
    %cst_86 = arith.constant 6.400000e+01 : f32
    %246 = vector.broadcast %cst_86 : f32 to vector<34x1xf32>
    %247 = arith.divf %245, %246 : vector<34x1xf32>
    %248 = arith.mulf %239, %239 : vector<34x64xf32>
    %cst_87 = arith.constant dense<0.000000e+00> : vector<34xf32>
    %249 = vector.multi_reduction <add>, %248, %cst_87 [1] : vector<34x64xf32> to vector<34xf32>
    %250 = vector.shape_cast %249 : vector<34xf32> to vector<34x1xf32>
    %cst_88 = arith.constant 6.400000e+01 : f32
    %251 = vector.broadcast %cst_88 : f32 to vector<34x1xf32>
    %252 = arith.divf %250, %251 : vector<34x1xf32>
    %253 = arith.mulf %247, %247 : vector<34x1xf32>
    %254 = arith.subf %252, %253 : vector<34x1xf32>
    %255 = vector.broadcast %247 : vector<34x1xf32> to vector<34x64xf32>
    %256 = arith.subf %239, %255 : vector<34x64xf32>
    %cst_89 = arith.constant 9.99999974E-6 : f32
    %257 = vector.broadcast %cst_89 : f32 to vector<34x1xf32>
    %258 = arith.addf %254, %257 : vector<34x1xf32>
    %259 = math.rsqrt %258 : vector<34x1xf32>
    %260 = vector.broadcast %259 : vector<34x1xf32> to vector<34x64xf32>
    %261 = arith.mulf %256, %260 : vector<34x64xf32>
    %262 = vector.shape_cast %241 : vector<64xf32> to vector<1x64xf32>
    %263 = vector.broadcast %262 : vector<1x64xf32> to vector<34x64xf32>
    %264 = arith.mulf %261, %263 : vector<34x64xf32>
    %265 = vector.shape_cast %243 : vector<64xf32> to vector<1x64xf32>
    %266 = vector.broadcast %265 : vector<1x64xf32> to vector<34x64xf32>
    %267 = arith.addf %264, %266 : vector<34x64xf32>
    %c0_90 = arith.constant 0 : index
    %c0_91 = arith.constant 0 : index
    %c0_92 = arith.constant 0 : index
    %268 = vector.load %arg5[%c0_90, %c0_91, %c0_92] : memref<2x64x128xbf16, #tpu.memory_space<vmem>>, vector<1x64x128xbf16>
    %269 = vector.shape_cast %268 : vector<1x64x128xbf16> to vector<64x128xbf16>
    %270 = arith.truncf %267 : vector<34x64xf32> to vector<34x64xbf16>
    %cst_93 = arith.constant dense<0.000000e+00> : vector<34x128xf32>
    %271 = tpu.matmul %270, %269, %cst_93 {dimension_numbers = #tpu.dot_dimension_numbers<[1], [0], [0], [1], [0, 0, 1, 1], [], []>} : vector<34x64xbf16>, vector<64x128xbf16>, vector<34x128xf32> -> vector<34x128xf32>
    %272 = vector.extract_strided_slice %8 {offsets = [5, 0], sizes = [1, 128], strides = [1, 1]} : vector<8x128xf32> to vector<1x128xf32>
    %273 = vector.shape_cast %272 : vector<1x128xf32> to vector<128xf32>
    %274 = vector.shape_cast %273 : vector<128xf32> to vector<1x128xf32>
    %275 = vector.broadcast %274 : vector<1x128xf32> to vector<34x128xf32>
    %276 = arith.addf %271, %275 : vector<34x128xf32>
    %cst_94 = arith.constant 5.000000e-01 : f32
    %277 = vector.broadcast %cst_94 : f32 to vector<34x128xf32>
    %278 = arith.mulf %277, %276 : vector<34x128xf32>
    %cst_95 = arith.constant 0.707106769 : f32
    %279 = vector.broadcast %cst_95 : f32 to vector<34x128xf32>
    %280 = arith.mulf %276, %279 : vector<34x128xf32>
    %281 = math.erf %280 : vector<34x128xf32>
    %cst_96 = arith.constant 1.000000e+00 : f32
    %282 = vector.broadcast %cst_96 : f32 to vector<34x128xf32>
    %283 = arith.addf %282, %281 : vector<34x128xf32>
    %284 = arith.mulf %278, %283 : vector<34x128xf32>
    %c0_97 = arith.constant 0 : index
    %c0_98 = arith.constant 0 : index
    %c0_99 = arith.constant 0 : index
    %285 = vector.load %arg6[%c0_97, %c0_98, %c0_99] : memref<2x128x64xbf16, #tpu.memory_space<vmem>>, vector<1x128x64xbf16>
    %286 = vector.shape_cast %285 : vector<1x128x64xbf16> to vector<128x64xbf16>
    %287 = arith.truncf %284 : vector<34x128xf32> to vector<34x128xbf16>
    %cst_100 = arith.constant dense<0.000000e+00> : vector<34x64xf32>
    %288 = tpu.matmul %287, %286, %cst_100 {dimension_numbers = #tpu.dot_dimension_numbers<[1], [0], [0], [1], [0, 0, 1, 1], [], []>} : vector<34x128xbf16>, vector<128x64xbf16>, vector<34x64xf32> -> vector<34x64xf32>
    %289 = arith.addf %239, %288 : vector<34x64xf32>
    %290 = vector.extract_strided_slice %8 {offsets = [6, 0], sizes = [1, 64], strides = [1, 1]} : vector<8x128xf32> to vector<1x64xf32>
    %291 = vector.shape_cast %290 : vector<1x64xf32> to vector<64xf32>
    %292 = vector.shape_cast %291 : vector<64xf32> to vector<1x64xf32>
    %293 = vector.broadcast %292 : vector<1x64xf32> to vector<34x64xf32>
    %294 = arith.addf %289, %293 : vector<34x64xf32>
    %c1_101 = arith.constant 1 : index
    %c0_102 = arith.constant 0 : index
    %c0_103 = arith.constant 0 : index
    %295 = vector.load %arg7[%c1_101, %c0_102, %c0_103] : memref<2x8x128xf32, #tpu.memory_space<vmem>>, vector<1x8x128xf32>
    %296 = vector.shape_cast %295 : vector<1x8x128xf32> to vector<8x128xf32>
    %297 = vector.extract_strided_slice %296 {offsets = [0, 0], sizes = [1, 64], strides = [1, 1]} : vector<8x128xf32> to vector<1x64xf32>
    %298 = vector.shape_cast %297 : vector<1x64xf32> to vector<64xf32>
    %299 = vector.extract_strided_slice %296 {offsets = [1, 0], sizes = [1, 64], strides = [1, 1]} : vector<8x128xf32> to vector<1x64xf32>
    %300 = vector.shape_cast %299 : vector<1x64xf32> to vector<64xf32>
    %cst_104 = arith.constant dense<0.000000e+00> : vector<34xf32>
    %301 = vector.multi_reduction <add>, %294, %cst_104 [1] : vector<34x64xf32> to vector<34xf32>
    %302 = vector.shape_cast %301 : vector<34xf32> to vector<34x1xf32>
    %cst_105 = arith.constant 6.400000e+01 : f32
    %303 = vector.broadcast %cst_105 : f32 to vector<34x1xf32>
    %304 = arith.divf %302, %303 : vector<34x1xf32>
    %305 = arith.mulf %294, %294 : vector<34x64xf32>
    %cst_106 = arith.constant dense<0.000000e+00> : vector<34xf32>
    %306 = vector.multi_reduction <add>, %305, %cst_106 [1] : vector<34x64xf32> to vector<34xf32>
    %307 = vector.shape_cast %306 : vector<34xf32> to vector<34x1xf32>
    %cst_107 = arith.constant 6.400000e+01 : f32
    %308 = vector.broadcast %cst_107 : f32 to vector<34x1xf32>
    %309 = arith.divf %307, %308 : vector<34x1xf32>
    %310 = arith.mulf %304, %304 : vector<34x1xf32>
    %311 = arith.subf %309, %310 : vector<34x1xf32>
    %312 = vector.broadcast %304 : vector<34x1xf32> to vector<34x64xf32>
    %313 = arith.subf %294, %312 : vector<34x64xf32>
    %cst_108 = arith.constant 9.99999974E-6 : f32
    %314 = vector.broadcast %cst_108 : f32 to vector<34x1xf32>
    %315 = arith.addf %311, %314 : vector<34x1xf32>
    %316 = math.rsqrt %315 : vector<34x1xf32>
    %317 = vector.broadcast %316 : vector<34x1xf32> to vector<34x64xf32>
    %318 = arith.mulf %313, %317 : vector<34x64xf32>
    %319 = vector.shape_cast %298 : vector<64xf32> to vector<1x64xf32>
    %320 = vector.broadcast %319 : vector<1x64xf32> to vector<34x64xf32>
    %321 = arith.mulf %318, %320 : vector<34x64xf32>
    %322 = vector.shape_cast %300 : vector<64xf32> to vector<1x64xf32>
    %323 = vector.broadcast %322 : vector<1x64xf32> to vector<34x64xf32>
    %324 = arith.addf %321, %323 : vector<34x64xf32>
    %325 = arith.truncf %324 : vector<34x64xf32> to vector<34x64xbf16>
    %c1_109 = arith.constant 1 : index
    %c0_110 = arith.constant 0 : index
    %c0_111 = arith.constant 0 : index
    %c0_112 = arith.constant 0 : index
    %326 = vector.load %arg4[%c1_109, %c0_110, %c0_111, %c0_112] : memref<2x4x64x64xbf16, #tpu.memory_space<vmem>>, vector<1x1x64x64xbf16>
    %327 = vector.shape_cast %326 : vector<1x1x64x64xbf16> to vector<64x64xbf16>
    %cst_113 = arith.constant dense<0.000000e+00> : vector<34x64xf32>
    %328 = tpu.matmul %325, %327, %cst_113 {dimension_numbers = #tpu.dot_dimension_numbers<[1], [0], [0], [1], [0, 0, 1, 1], [], []>} : vector<34x64xbf16>, vector<64x64xbf16>, vector<34x64xf32> -> vector<34x64xf32>
    %c1_114 = arith.constant 1 : index
    %c1_115 = arith.constant 1 : index
    %c0_116 = arith.constant 0 : index
    %c0_117 = arith.constant 0 : index
    %329 = vector.load %arg4[%c1_114, %c1_115, %c0_116, %c0_117] : memref<2x4x64x64xbf16, #tpu.memory_space<vmem>>, vector<1x1x64x64xbf16>
    %330 = vector.shape_cast %329 : vector<1x1x64x64xbf16> to vector<64x64xbf16>
    %cst_118 = arith.constant dense<0.000000e+00> : vector<34x64xf32>
    %331 = tpu.matmul %325, %330, %cst_118 {dimension_numbers = #tpu.dot_dimension_numbers<[1], [0], [0], [1], [0, 0, 1, 1], [], []>} : vector<34x64xbf16>, vector<64x64xbf16>, vector<34x64xf32> -> vector<34x64xf32>
    %c1_119 = arith.constant 1 : index
    %c2_120 = arith.constant 2 : index
    %c0_121 = arith.constant 0 : index
    %c0_122 = arith.constant 0 : index
    %332 = vector.load %arg4[%c1_119, %c2_120, %c0_121, %c0_122] : memref<2x4x64x64xbf16, #tpu.memory_space<vmem>>, vector<1x1x64x64xbf16>
    %333 = vector.shape_cast %332 : vector<1x1x64x64xbf16> to vector<64x64xbf16>
    %cst_123 = arith.constant dense<0.000000e+00> : vector<34x64xf32>
    %334 = tpu.matmul %325, %333, %cst_123 {dimension_numbers = #tpu.dot_dimension_numbers<[1], [0], [0], [1], [0, 0, 1, 1], [], []>} : vector<34x64xbf16>, vector<64x64xbf16>, vector<34x64xf32> -> vector<34x64xf32>
    %335 = vector.extract_strided_slice %328 {offsets = [0, 0], sizes = [17, 64], strides = [1, 1]} : vector<34x64xf32> to vector<17x64xf32>
    %336 = vector.extract_strided_slice %331 {offsets = [0, 0], sizes = [17, 64], strides = [1, 1]} : vector<34x64xf32> to vector<17x64xf32>
    %337 = vector.extract_strided_slice %334 {offsets = [0, 0], sizes = [17, 64], strides = [1, 1]} : vector<34x64xf32> to vector<17x64xf32>
    %338 = vector.extract_strided_slice %335 {offsets = [0, 0], sizes = [17, 16], strides = [1, 1]} : vector<17x64xf32> to vector<17x16xf32>
    %339 = vector.extract_strided_slice %336 {offsets = [0, 0], sizes = [17, 16], strides = [1, 1]} : vector<17x64xf32> to vector<17x16xf32>
    %340 = vector.extract_strided_slice %337 {offsets = [0, 0], sizes = [17, 16], strides = [1, 1]} : vector<17x64xf32> to vector<17x16xf32>
    %341 = arith.truncf %338 : vector<17x16xf32> to vector<17x16xbf16>
    %342 = arith.truncf %339 : vector<17x16xf32> to vector<17x16xbf16>
    %cst_124 = arith.constant dense<0.000000e+00> : vector<17x17xf32>
    %343 = tpu.matmul %341, %342, %cst_124 {dimension_numbers = #tpu.dot_dimension_numbers<[1], [1], [0], [0], [0, 0, 1, 0], [], []>} : vector<17x16xbf16>, vector<17x16xbf16>, vector<17x17xf32> -> vector<17x17xf32>
    %cst_125 = arith.constant 2.500000e-01 : f32
    %344 = vector.broadcast %cst_125 : f32 to vector<17x17xf32>
    %345 = arith.mulf %343, %344 : vector<17x17xf32>
    %cst_126 = arith.constant dense<0xFF800000> : vector<17xf32>
    %346 = vector.multi_reduction <maximumf>, %345, %cst_126 [1] : vector<17x17xf32> to vector<17xf32>
    %347 = vector.shape_cast %346 : vector<17xf32> to vector<17x1xf32>
    %348 = vector.broadcast %347 : vector<17x1xf32> to vector<17x17xf32>
    %349 = arith.subf %345, %348 : vector<17x17xf32>
    %350 = math.exp %349 : vector<17x17xf32>
    %cst_127 = arith.constant dense<0.000000e+00> : vector<17xf32>
    %351 = vector.multi_reduction <add>, %350, %cst_127 [1] : vector<17x17xf32> to vector<17xf32>
    %352 = vector.shape_cast %351 : vector<17xf32> to vector<17x1xf32>
    %353 = tpu.reciprocal %352 {approx = true} : vector<17x1xf32> -> vector<17x1xf32>
    %354 = vector.broadcast %353 : vector<17x1xf32> to vector<17x17xf32>
    %355 = arith.mulf %350, %354 : vector<17x17xf32>
    %356 = arith.truncf %355 : vector<17x17xf32> to vector<17x17xbf16>
    %357 = arith.truncf %340 : vector<17x16xf32> to vector<17x16xbf16>
    %cst_128 = arith.constant dense<0.000000e+00> : vector<17x16xf32>
    %358 = tpu.matmul %356, %357, %cst_128 {dimension_numbers = #tpu.dot_dimension_numbers<[1], [0], [0], [1], [0, 0, 1, 1], [], []>} : vector<17x17xbf16>, vector<17x16xbf16>, vector<17x16xf32> -> vector<17x16xf32>
    %c0_129 = arith.constant 0 : index
    %c0_130 = arith.constant 0 : index
    %359 = vector.load %arg13[%c0_129, %c0_130] : memref<34x64xf32, #tpu.memory_space<vmem>>, vector<17x16xf32>
    tpu.vector_store %arg13[%c0_129, %c0_130], %358 {strides = array<i32>} : memref<34x64xf32, #tpu.memory_space<vmem>>, vector<17x16xf32>,
    %360 = vector.extract_strided_slice %335 {offsets = [0, 16], sizes = [17, 16], strides = [1, 1]} : vector<17x64xf32> to vector<17x16xf32>
    %361 = vector.extract_strided_slice %336 {offsets = [0, 16], sizes = [17, 16], strides = [1, 1]} : vector<17x64xf32> to vector<17x16xf32>
    %362 = vector.extract_strided_slice %337 {offsets = [0, 16], sizes = [17, 16], strides = [1, 1]} : vector<17x64xf32> to vector<17x16xf32>
    %363 = arith.truncf %360 : vector<17x16xf32> to vector<17x16xbf16>
    %364 = arith.truncf %361 : vector<17x16xf32> to vector<17x16xbf16>
    %cst_131 = arith.constant dense<0.000000e+00> : vector<17x17xf32>
    %365 = tpu.matmul %363, %364, %cst_131 {dimension_numbers = #tpu.dot_dimension_numbers<[1], [1], [0], [0], [0, 0, 1, 0], [], []>} : vector<17x16xbf16>, vector<17x16xbf16>, vector<17x17xf32> -> vector<17x17xf32>
    %cst_132 = arith.constant 2.500000e-01 : f32
    %366 = vector.broadcast %cst_132 : f32 to vector<17x17xf32>
    %367 = arith.mulf %365, %366 : vector<17x17xf32>
    %cst_133 = arith.constant dense<0xFF800000> : vector<17xf32>
    %368 = vector.multi_reduction <maximumf>, %367, %cst_133 [1] : vector<17x17xf32> to vector<17xf32>
    %369 = vector.shape_cast %368 : vector<17xf32> to vector<17x1xf32>
    %370 = vector.broadcast %369 : vector<17x1xf32> to vector<17x17xf32>
    %371 = arith.subf %367, %370 : vector<17x17xf32>
    %372 = math.exp %371 : vector<17x17xf32>
    %cst_134 = arith.constant dense<0.000000e+00> : vector<17xf32>
    %373 = vector.multi_reduction <add>, %372, %cst_134 [1] : vector<17x17xf32> to vector<17xf32>
    %374 = vector.shape_cast %373 : vector<17xf32> to vector<17x1xf32>
    %375 = tpu.reciprocal %374 {approx = true} : vector<17x1xf32> -> vector<17x1xf32>
    %376 = vector.broadcast %375 : vector<17x1xf32> to vector<17x17xf32>
    %377 = arith.mulf %372, %376 : vector<17x17xf32>
    %378 = arith.truncf %377 : vector<17x17xf32> to vector<17x17xbf16>
    %379 = arith.truncf %362 : vector<17x16xf32> to vector<17x16xbf16>
    %cst_135 = arith.constant dense<0.000000e+00> : vector<17x16xf32>
    %380 = tpu.matmul %378, %379, %cst_135 {dimension_numbers = #tpu.dot_dimension_numbers<[1], [0], [0], [1], [0, 0, 1, 1], [], []>} : vector<17x17xbf16>, vector<17x16xbf16>, vector<17x16xf32> -> vector<17x16xf32>
    %c0_136 = arith.constant 0 : index
    %c16_137 = arith.constant 16 : index
    %381 = vector.load %arg13[%c0_136, %c16_137] : memref<34x64xf32, #tpu.memory_space<vmem>>, vector<17x16xf32>
    tpu.vector_store %arg13[%c0_136, %c16_137], %380 {strides = array<i32>} : memref<34x64xf32, #tpu.memory_space<vmem>>, vector<17x16xf32>,
    %382 = vector.extract_strided_slice %335 {offsets = [0, 32], sizes = [17, 16], strides = [1, 1]} : vector<17x64xf32> to vector<17x16xf32>
    %383 = vector.extract_strided_slice %336 {offsets = [0, 32], sizes = [17, 16], strides = [1, 1]} : vector<17x64xf32> to vector<17x16xf32>
    %384 = vector.extract_strided_slice %337 {offsets = [0, 32], sizes = [17, 16], strides = [1, 1]} : vector<17x64xf32> to vector<17x16xf32>
    %385 = arith.truncf %382 : vector<17x16xf32> to vector<17x16xbf16>
    %386 = arith.truncf %383 : vector<17x16xf32> to vector<17x16xbf16>
    %cst_138 = arith.constant dense<0.000000e+00> : vector<17x17xf32>
    %387 = tpu.matmul %385, %386, %cst_138 {dimension_numbers = #tpu.dot_dimension_numbers<[1], [1], [0], [0], [0, 0, 1, 0], [], []>} : vector<17x16xbf16>, vector<17x16xbf16>, vector<17x17xf32> -> vector<17x17xf32>
    %cst_139 = arith.constant 2.500000e-01 : f32
    %388 = vector.broadcast %cst_139 : f32 to vector<17x17xf32>
    %389 = arith.mulf %387, %388 : vector<17x17xf32>
    %cst_140 = arith.constant dense<0xFF800000> : vector<17xf32>
    %390 = vector.multi_reduction <maximumf>, %389, %cst_140 [1] : vector<17x17xf32> to vector<17xf32>
    %391 = vector.shape_cast %390 : vector<17xf32> to vector<17x1xf32>
    %392 = vector.broadcast %391 : vector<17x1xf32> to vector<17x17xf32>
    %393 = arith.subf %389, %392 : vector<17x17xf32>
    %394 = math.exp %393 : vector<17x17xf32>
    %cst_141 = arith.constant dense<0.000000e+00> : vector<17xf32>
    %395 = vector.multi_reduction <add>, %394, %cst_141 [1] : vector<17x17xf32> to vector<17xf32>
    %396 = vector.shape_cast %395 : vector<17xf32> to vector<17x1xf32>
    %397 = tpu.reciprocal %396 {approx = true} : vector<17x1xf32> -> vector<17x1xf32>
    %398 = vector.broadcast %397 : vector<17x1xf32> to vector<17x17xf32>
    %399 = arith.mulf %394, %398 : vector<17x17xf32>
    %400 = arith.truncf %399 : vector<17x17xf32> to vector<17x17xbf16>
    %401 = arith.truncf %384 : vector<17x16xf32> to vector<17x16xbf16>
    %cst_142 = arith.constant dense<0.000000e+00> : vector<17x16xf32>
    %402 = tpu.matmul %400, %401, %cst_142 {dimension_numbers = #tpu.dot_dimension_numbers<[1], [0], [0], [1], [0, 0, 1, 1], [], []>} : vector<17x17xbf16>, vector<17x16xbf16>, vector<17x16xf32> -> vector<17x16xf32>
    %c0_143 = arith.constant 0 : index
    %c32_144 = arith.constant 32 : index
    %403 = vector.load %arg13[%c0_143, %c32_144] : memref<34x64xf32, #tpu.memory_space<vmem>>, vector<17x16xf32>
    tpu.vector_store %arg13[%c0_143, %c32_144], %402 {strides = array<i32>} : memref<34x64xf32, #tpu.memory_space<vmem>>, vector<17x16xf32>,
    %404 = vector.extract_strided_slice %335 {offsets = [0, 48], sizes = [17, 16], strides = [1, 1]} : vector<17x64xf32> to vector<17x16xf32>
    %405 = vector.extract_strided_slice %336 {offsets = [0, 48], sizes = [17, 16], strides = [1, 1]} : vector<17x64xf32> to vector<17x16xf32>
    %406 = vector.extract_strided_slice %337 {offsets = [0, 48], sizes = [17, 16], strides = [1, 1]} : vector<17x64xf32> to vector<17x16xf32>
    %407 = arith.truncf %404 : vector<17x16xf32> to vector<17x16xbf16>
    %408 = arith.truncf %405 : vector<17x16xf32> to vector<17x16xbf16>
    %cst_145 = arith.constant dense<0.000000e+00> : vector<17x17xf32>
    %409 = tpu.matmul %407, %408, %cst_145 {dimension_numbers = #tpu.dot_dimension_numbers<[1], [1], [0], [0], [0, 0, 1, 0], [], []>} : vector<17x16xbf16>, vector<17x16xbf16>, vector<17x17xf32> -> vector<17x17xf32>
    %cst_146 = arith.constant 2.500000e-01 : f32
    %410 = vector.broadcast %cst_146 : f32 to vector<17x17xf32>
    %411 = arith.mulf %409, %410 : vector<17x17xf32>
    %cst_147 = arith.constant dense<0xFF800000> : vector<17xf32>
    %412 = vector.multi_reduction <maximumf>, %411, %cst_147 [1] : vector<17x17xf32> to vector<17xf32>
    %413 = vector.shape_cast %412 : vector<17xf32> to vector<17x1xf32>
    %414 = vector.broadcast %413 : vector<17x1xf32> to vector<17x17xf32>
    %415 = arith.subf %411, %414 : vector<17x17xf32>
    %416 = math.exp %415 : vector<17x17xf32>
    %cst_148 = arith.constant dense<0.000000e+00> : vector<17xf32>
    %417 = vector.multi_reduction <add>, %416, %cst_148 [1] : vector<17x17xf32> to vector<17xf32>
    %418 = vector.shape_cast %417 : vector<17xf32> to vector<17x1xf32>
    %419 = tpu.reciprocal %418 {approx = true} : vector<17x1xf32> -> vector<17x1xf32>
    %420 = vector.broadcast %419 : vector<17x1xf32> to vector<17x17xf32>
    %421 = arith.mulf %416, %420 : vector<17x17xf32>
    %422 = arith.truncf %421 : vector<17x17xf32> to vector<17x17xbf16>
    %423 = arith.truncf %406 : vector<17x16xf32> to vector<17x16xbf16>
    %cst_149 = arith.constant dense<0.000000e+00> : vector<17x16xf32>
    %424 = tpu.matmul %422, %423, %cst_149 {dimension_numbers = #tpu.dot_dimension_numbers<[1], [0], [0], [1], [0, 0, 1, 1], [], []>} : vector<17x17xbf16>, vector<17x16xbf16>, vector<17x16xf32> -> vector<17x16xf32>
    %c0_150 = arith.constant 0 : index
    %c48_151 = arith.constant 48 : index
    %425 = vector.load %arg13[%c0_150, %c48_151] : memref<34x64xf32, #tpu.memory_space<vmem>>, vector<17x16xf32>
    tpu.vector_store %arg13[%c0_150, %c48_151], %424 {strides = array<i32>} : memref<34x64xf32, #tpu.memory_space<vmem>>, vector<17x16xf32>,
    %426 = vector.extract_strided_slice %328 {offsets = [17, 0], sizes = [17, 64], strides = [1, 1]} : vector<34x64xf32> to vector<17x64xf32>
    %427 = vector.extract_strided_slice %331 {offsets = [17, 0], sizes = [17, 64], strides = [1, 1]} : vector<34x64xf32> to vector<17x64xf32>
    %428 = vector.extract_strided_slice %334 {offsets = [17, 0], sizes = [17, 64], strides = [1, 1]} : vector<34x64xf32> to vector<17x64xf32>
    %429 = vector.extract_strided_slice %426 {offsets = [0, 0], sizes = [17, 16], strides = [1, 1]} : vector<17x64xf32> to vector<17x16xf32>
    %430 = vector.extract_strided_slice %427 {offsets = [0, 0], sizes = [17, 16], strides = [1, 1]} : vector<17x64xf32> to vector<17x16xf32>
    %431 = vector.extract_strided_slice %428 {offsets = [0, 0], sizes = [17, 16], strides = [1, 1]} : vector<17x64xf32> to vector<17x16xf32>
    %432 = arith.truncf %429 : vector<17x16xf32> to vector<17x16xbf16>
    %433 = arith.truncf %430 : vector<17x16xf32> to vector<17x16xbf16>
    %cst_152 = arith.constant dense<0.000000e+00> : vector<17x17xf32>
    %434 = tpu.matmul %432, %433, %cst_152 {dimension_numbers = #tpu.dot_dimension_numbers<[1], [1], [0], [0], [0, 0, 1, 0], [], []>} : vector<17x16xbf16>, vector<17x16xbf16>, vector<17x17xf32> -> vector<17x17xf32>
    %cst_153 = arith.constant 2.500000e-01 : f32
    %435 = vector.broadcast %cst_153 : f32 to vector<17x17xf32>
    %436 = arith.mulf %434, %435 : vector<17x17xf32>
    %cst_154 = arith.constant dense<0xFF800000> : vector<17xf32>
    %437 = vector.multi_reduction <maximumf>, %436, %cst_154 [1] : vector<17x17xf32> to vector<17xf32>
    %438 = vector.shape_cast %437 : vector<17xf32> to vector<17x1xf32>
    %439 = vector.broadcast %438 : vector<17x1xf32> to vector<17x17xf32>
    %440 = arith.subf %436, %439 : vector<17x17xf32>
    %441 = math.exp %440 : vector<17x17xf32>
    %cst_155 = arith.constant dense<0.000000e+00> : vector<17xf32>
    %442 = vector.multi_reduction <add>, %441, %cst_155 [1] : vector<17x17xf32> to vector<17xf32>
    %443 = vector.shape_cast %442 : vector<17xf32> to vector<17x1xf32>
    %444 = tpu.reciprocal %443 {approx = true} : vector<17x1xf32> -> vector<17x1xf32>
    %445 = vector.broadcast %444 : vector<17x1xf32> to vector<17x17xf32>
    %446 = arith.mulf %441, %445 : vector<17x17xf32>
    %447 = arith.truncf %446 : vector<17x17xf32> to vector<17x17xbf16>
    %448 = arith.truncf %431 : vector<17x16xf32> to vector<17x16xbf16>
    %cst_156 = arith.constant dense<0.000000e+00> : vector<17x16xf32>
    %449 = tpu.matmul %447, %448, %cst_156 {dimension_numbers = #tpu.dot_dimension_numbers<[1], [0], [0], [1], [0, 0, 1, 1], [], []>} : vector<17x17xbf16>, vector<17x16xbf16>, vector<17x16xf32> -> vector<17x16xf32>
    %c17_157 = arith.constant 17 : index
    %c0_158 = arith.constant 0 : index
    %450 = vector.load %arg13[%c17_157, %c0_158] : memref<34x64xf32, #tpu.memory_space<vmem>>, vector<17x16xf32>
    tpu.vector_store %arg13[%c17_157, %c0_158], %449 {strides = array<i32>} : memref<34x64xf32, #tpu.memory_space<vmem>>, vector<17x16xf32>,
    %451 = vector.extract_strided_slice %426 {offsets = [0, 16], sizes = [17, 16], strides = [1, 1]} : vector<17x64xf32> to vector<17x16xf32>
    %452 = vector.extract_strided_slice %427 {offsets = [0, 16], sizes = [17, 16], strides = [1, 1]} : vector<17x64xf32> to vector<17x16xf32>
    %453 = vector.extract_strided_slice %428 {offsets = [0, 16], sizes = [17, 16], strides = [1, 1]} : vector<17x64xf32> to vector<17x16xf32>
    %454 = arith.truncf %451 : vector<17x16xf32> to vector<17x16xbf16>
    %455 = arith.truncf %452 : vector<17x16xf32> to vector<17x16xbf16>
    %cst_159 = arith.constant dense<0.000000e+00> : vector<17x17xf32>
    %456 = tpu.matmul %454, %455, %cst_159 {dimension_numbers = #tpu.dot_dimension_numbers<[1], [1], [0], [0], [0, 0, 1, 0], [], []>} : vector<17x16xbf16>, vector<17x16xbf16>, vector<17x17xf32> -> vector<17x17xf32>
    %cst_160 = arith.constant 2.500000e-01 : f32
    %457 = vector.broadcast %cst_160 : f32 to vector<17x17xf32>
    %458 = arith.mulf %456, %457 : vector<17x17xf32>
    %cst_161 = arith.constant dense<0xFF800000> : vector<17xf32>
    %459 = vector.multi_reduction <maximumf>, %458, %cst_161 [1] : vector<17x17xf32> to vector<17xf32>
    %460 = vector.shape_cast %459 : vector<17xf32> to vector<17x1xf32>
    %461 = vector.broadcast %460 : vector<17x1xf32> to vector<17x17xf32>
    %462 = arith.subf %458, %461 : vector<17x17xf32>
    %463 = math.exp %462 : vector<17x17xf32>
    %cst_162 = arith.constant dense<0.000000e+00> : vector<17xf32>
    %464 = vector.multi_reduction <add>, %463, %cst_162 [1] : vector<17x17xf32> to vector<17xf32>
    %465 = vector.shape_cast %464 : vector<17xf32> to vector<17x1xf32>
    %466 = tpu.reciprocal %465 {approx = true} : vector<17x1xf32> -> vector<17x1xf32>
    %467 = vector.broadcast %466 : vector<17x1xf32> to vector<17x17xf32>
    %468 = arith.mulf %463, %467 : vector<17x17xf32>
    %469 = arith.truncf %468 : vector<17x17xf32> to vector<17x17xbf16>
    %470 = arith.truncf %453 : vector<17x16xf32> to vector<17x16xbf16>
    %cst_163 = arith.constant dense<0.000000e+00> : vector<17x16xf32>
    %471 = tpu.matmul %469, %470, %cst_163 {dimension_numbers = #tpu.dot_dimension_numbers<[1], [0], [0], [1], [0, 0, 1, 1], [], []>} : vector<17x17xbf16>, vector<17x16xbf16>, vector<17x16xf32> -> vector<17x16xf32>
    %c17_164 = arith.constant 17 : index
    %c16_165 = arith.constant 16 : index
    %472 = vector.load %arg13[%c17_164, %c16_165] : memref<34x64xf32, #tpu.memory_space<vmem>>, vector<17x16xf32>
    tpu.vector_store %arg13[%c17_164, %c16_165], %471 {strides = array<i32>} : memref<34x64xf32, #tpu.memory_space<vmem>>, vector<17x16xf32>,
    %473 = vector.extract_strided_slice %426 {offsets = [0, 32], sizes = [17, 16], strides = [1, 1]} : vector<17x64xf32> to vector<17x16xf32>
    %474 = vector.extract_strided_slice %427 {offsets = [0, 32], sizes = [17, 16], strides = [1, 1]} : vector<17x64xf32> to vector<17x16xf32>
    %475 = vector.extract_strided_slice %428 {offsets = [0, 32], sizes = [17, 16], strides = [1, 1]} : vector<17x64xf32> to vector<17x16xf32>
    %476 = arith.truncf %473 : vector<17x16xf32> to vector<17x16xbf16>
    %477 = arith.truncf %474 : vector<17x16xf32> to vector<17x16xbf16>
    %cst_166 = arith.constant dense<0.000000e+00> : vector<17x17xf32>
    %478 = tpu.matmul %476, %477, %cst_166 {dimension_numbers = #tpu.dot_dimension_numbers<[1], [1], [0], [0], [0, 0, 1, 0], [], []>} : vector<17x16xbf16>, vector<17x16xbf16>, vector<17x17xf32> -> vector<17x17xf32>
    %cst_167 = arith.constant 2.500000e-01 : f32
    %479 = vector.broadcast %cst_167 : f32 to vector<17x17xf32>
    %480 = arith.mulf %478, %479 : vector<17x17xf32>
    %cst_168 = arith.constant dense<0xFF800000> : vector<17xf32>
    %481 = vector.multi_reduction <maximumf>, %480, %cst_168 [1] : vector<17x17xf32> to vector<17xf32>
    %482 = vector.shape_cast %481 : vector<17xf32> to vector<17x1xf32>
    %483 = vector.broadcast %482 : vector<17x1xf32> to vector<17x17xf32>
    %484 = arith.subf %480, %483 : vector<17x17xf32>
    %485 = math.exp %484 : vector<17x17xf32>
    %cst_169 = arith.constant dense<0.000000e+00> : vector<17xf32>
    %486 = vector.multi_reduction <add>, %485, %cst_169 [1] : vector<17x17xf32> to vector<17xf32>
    %487 = vector.shape_cast %486 : vector<17xf32> to vector<17x1xf32>
    %488 = tpu.reciprocal %487 {approx = true} : vector<17x1xf32> -> vector<17x1xf32>
    %489 = vector.broadcast %488 : vector<17x1xf32> to vector<17x17xf32>
    %490 = arith.mulf %485, %489 : vector<17x17xf32>
    %491 = arith.truncf %490 : vector<17x17xf32> to vector<17x17xbf16>
    %492 = arith.truncf %475 : vector<17x16xf32> to vector<17x16xbf16>
    %cst_170 = arith.constant dense<0.000000e+00> : vector<17x16xf32>
    %493 = tpu.matmul %491, %492, %cst_170 {dimension_numbers = #tpu.dot_dimension_numbers<[1], [0], [0], [1], [0, 0, 1, 1], [], []>} : vector<17x17xbf16>, vector<17x16xbf16>, vector<17x16xf32> -> vector<17x16xf32>
    %c17_171 = arith.constant 17 : index
    %c32_172 = arith.constant 32 : index
    %494 = vector.load %arg13[%c17_171, %c32_172] : memref<34x64xf32, #tpu.memory_space<vmem>>, vector<17x16xf32>
    tpu.vector_store %arg13[%c17_171, %c32_172], %493 {strides = array<i32>} : memref<34x64xf32, #tpu.memory_space<vmem>>, vector<17x16xf32>,
    %495 = vector.extract_strided_slice %426 {offsets = [0, 48], sizes = [17, 16], strides = [1, 1]} : vector<17x64xf32> to vector<17x16xf32>
    %496 = vector.extract_strided_slice %427 {offsets = [0, 48], sizes = [17, 16], strides = [1, 1]} : vector<17x64xf32> to vector<17x16xf32>
    %497 = vector.extract_strided_slice %428 {offsets = [0, 48], sizes = [17, 16], strides = [1, 1]} : vector<17x64xf32> to vector<17x16xf32>
    %498 = arith.truncf %495 : vector<17x16xf32> to vector<17x16xbf16>
    %499 = arith.truncf %496 : vector<17x16xf32> to vector<17x16xbf16>
    %cst_173 = arith.constant dense<0.000000e+00> : vector<17x17xf32>
    %500 = tpu.matmul %498, %499, %cst_173 {dimension_numbers = #tpu.dot_dimension_numbers<[1], [1], [0], [0], [0, 0, 1, 0], [], []>} : vector<17x16xbf16>, vector<17x16xbf16>, vector<17x17xf32> -> vector<17x17xf32>
    %cst_174 = arith.constant 2.500000e-01 : f32
    %501 = vector.broadcast %cst_174 : f32 to vector<17x17xf32>
    %502 = arith.mulf %500, %501 : vector<17x17xf32>
    %cst_175 = arith.constant dense<0xFF800000> : vector<17xf32>
    %503 = vector.multi_reduction <maximumf>, %502, %cst_175 [1] : vector<17x17xf32> to vector<17xf32>
    %504 = vector.shape_cast %503 : vector<17xf32> to vector<17x1xf32>
    %505 = vector.broadcast %504 : vector<17x1xf32> to vector<17x17xf32>
    %506 = arith.subf %502, %505 : vector<17x17xf32>
    %507 = math.exp %506 : vector<17x17xf32>
    %cst_176 = arith.constant dense<0.000000e+00> : vector<17xf32>
    %508 = vector.multi_reduction <add>, %507, %cst_176 [1] : vector<17x17xf32> to vector<17xf32>
    %509 = vector.shape_cast %508 : vector<17xf32> to vector<17x1xf32>
    %510 = tpu.reciprocal %509 {approx = true} : vector<17x1xf32> -> vector<17x1xf32>
    %511 = vector.broadcast %510 : vector<17x1xf32> to vector<17x17xf32>
    %512 = arith.mulf %507, %511 : vector<17x17xf32>
    %513 = arith.truncf %512 : vector<17x17xf32> to vector<17x17xbf16>
    %514 = arith.truncf %497 : vector<17x16xf32> to vector<17x16xbf16>
    %cst_177 = arith.constant dense<0.000000e+00> : vector<17x16xf32>
    %515 = tpu.matmul %513, %514, %cst_177 {dimension_numbers = #tpu.dot_dimension_numbers<[1], [0], [0], [1], [0, 0, 1, 1], [], []>} : vector<17x17xbf16>, vector<17x16xbf16>, vector<17x16xf32> -> vector<17x16xf32>
    %c17_178 = arith.constant 17 : index
    %c48_179 = arith.constant 48 : index
    %516 = vector.load %arg13[%c17_178, %c48_179] : memref<34x64xf32, #tpu.memory_space<vmem>>, vector<17x16xf32>
    tpu.vector_store %arg13[%c17_178, %c48_179], %515 {strides = array<i32>} : memref<34x64xf32, #tpu.memory_space<vmem>>, vector<17x16xf32>,
    %c0_180 = arith.constant 0 : index
    %c0_181 = arith.constant 0 : index
    %517 = vector.load %arg13[%c0_180, %c0_181] : memref<34x64xf32, #tpu.memory_space<vmem>>, vector<34x64xf32>
    %c1_182 = arith.constant 1 : index
    %c3_183 = arith.constant 3 : index
    %c0_184 = arith.constant 0 : index
    %c0_185 = arith.constant 0 : index
    %518 = vector.load %arg4[%c1_182, %c3_183, %c0_184, %c0_185] : memref<2x4x64x64xbf16, #tpu.memory_space<vmem>>, vector<1x1x64x64xbf16>
    %519 = vector.shape_cast %518 : vector<1x1x64x64xbf16> to vector<64x64xbf16>
    %520 = arith.truncf %517 : vector<34x64xf32> to vector<34x64xbf16>
    %cst_186 = arith.constant dense<0.000000e+00> : vector<34x64xf32>
    %521 = tpu.matmul %520, %519, %cst_186 {dimension_numbers = #tpu.dot_dimension_numbers<[1], [0], [0], [1], [0, 0, 1, 1], [], []>} : vector<34x64xbf16>, vector<64x64xbf16>, vector<34x64xf32> -> vector<34x64xf32>
    %522 = arith.addf %294, %521 : vector<34x64xf32>
    %523 = vector.extract_strided_slice %296 {offsets = [2, 0], sizes = [1, 64], strides = [1, 1]} : vector<8x128xf32> to vector<1x64xf32>
    %524 = vector.shape_cast %523 : vector<1x64xf32> to vector<64xf32>
    %525 = vector.shape_cast %524 : vector<64xf32> to vector<1x64xf32>
    %526 = vector.broadcast %525 : vector<1x64xf32> to vector<34x64xf32>
    %527 = arith.addf %522, %526 : vector<34x64xf32>
    %528 = vector.extract_strided_slice %296 {offsets = [3, 0], sizes = [1, 64], strides = [1, 1]} : vector<8x128xf32> to vector<1x64xf32>
    %529 = vector.shape_cast %528 : vector<1x64xf32> to vector<64xf32>
    %530 = vector.extract_strided_slice %296 {offsets = [4, 0], sizes = [1, 64], strides = [1, 1]} : vector<8x128xf32> to vector<1x64xf32>
    %531 = vector.shape_cast %530 : vector<1x64xf32> to vector<64xf32>
    %cst_187 = arith.constant dense<0.000000e+00> : vector<34xf32>
    %532 = vector.multi_reduction <add>, %527, %cst_187 [1] : vector<34x64xf32> to vector<34xf32>
    %533 = vector.shape_cast %532 : vector<34xf32> to vector<34x1xf32>
    %cst_188 = arith.constant 6.400000e+01 : f32
    %534 = vector.broadcast %cst_188 : f32 to vector<34x1xf32>
    %535 = arith.divf %533, %534 : vector<34x1xf32>
    %536 = arith.mulf %527, %527 : vector<34x64xf32>
    %cst_189 = arith.constant dense<0.000000e+00> : vector<34xf32>
    %537 = vector.multi_reduction <add>, %536, %cst_189 [1] : vector<34x64xf32> to vector<34xf32>
    %538 = vector.shape_cast %537 : vector<34xf32> to vector<34x1xf32>
    %cst_190 = arith.constant 6.400000e+01 : f32
    %539 = vector.broadcast %cst_190 : f32 to vector<34x1xf32>
    %540 = arith.divf %538, %539 : vector<34x1xf32>
    %541 = arith.mulf %535, %535 : vector<34x1xf32>
    %542 = arith.subf %540, %541 : vector<34x1xf32>
    %543 = vector.broadcast %535 : vector<34x1xf32> to vector<34x64xf32>
    %544 = arith.subf %527, %543 : vector<34x64xf32>
    %cst_191 = arith.constant 9.99999974E-6 : f32
    %545 = vector.broadcast %cst_191 : f32 to vector<34x1xf32>
    %546 = arith.addf %542, %545 : vector<34x1xf32>
    %547 = math.rsqrt %546 : vector<34x1xf32>
    %548 = vector.broadcast %547 : vector<34x1xf32> to vector<34x64xf32>
    %549 = arith.mulf %544, %548 : vector<34x64xf32>
    %550 = vector.shape_cast %529 : vector<64xf32> to vector<1x64xf32>
    %551 = vector.broadcast %550 : vector<1x64xf32> to vector<34x64xf32>
    %552 = arith.mulf %549, %551 : vector<34x64xf32>
    %553 = vector.shape_cast %531 : vector<64xf32> to vector<1x64xf32>
    %554 = vector.broadcast %553 : vector<1x64xf32> to vector<34x64xf32>
    %555 = arith.addf %552, %554 : vector<34x64xf32>
    %c1_192 = arith.constant 1 : index
    %c0_193 = arith.constant 0 : index
    %c0_194 = arith.constant 0 : index
    %556 = vector.load %arg5[%c1_192, %c0_193, %c0_194] : memref<2x64x128xbf16, #tpu.memory_space<vmem>>, vector<1x64x128xbf16>
    %557 = vector.shape_cast %556 : vector<1x64x128xbf16> to vector<64x128xbf16>
    %558 = arith.truncf %555 : vector<34x64xf32> to vector<34x64xbf16>
    %cst_195 = arith.constant dense<0.000000e+00> : vector<34x128xf32>
    %559 = tpu.matmul %558, %557, %cst_195 {dimension_numbers = #tpu.dot_dimension_numbers<[1], [0], [0], [1], [0, 0, 1, 1], [], []>} : vector<34x64xbf16>, vector<64x128xbf16>, vector<34x128xf32> -> vector<34x128xf32>
    %560 = vector.extract_strided_slice %296 {offsets = [5, 0], sizes = [1, 128], strides = [1, 1]} : vector<8x128xf32> to vector<1x128xf32>
    %561 = vector.shape_cast %560 : vector<1x128xf32> to vector<128xf32>
    %562 = vector.shape_cast %561 : vector<128xf32> to vector<1x128xf32>
    %563 = vector.broadcast %562 : vector<1x128xf32> to vector<34x128xf32>
    %564 = arith.addf %559, %563 : vector<34x128xf32>
    %cst_196 = arith.constant 5.000000e-01 : f32
    %565 = vector.broadcast %cst_196 : f32 to vector<34x128xf32>
    %566 = arith.mulf %565, %564 : vector<34x128xf32>
    %cst_197 = arith.constant 0.707106769 : f32
    %567 = vector.broadcast %cst_197 : f32 to vector<34x128xf32>
    %568 = arith.mulf %564, %567 : vector<34x128xf32>
    %569 = math.erf %568 : vector<34x128xf32>
    %cst_198 = arith.constant 1.000000e+00 : f32
    %570 = vector.broadcast %cst_198 : f32 to vector<34x128xf32>
    %571 = arith.addf %570, %569 : vector<34x128xf32>
    %572 = arith.mulf %566, %571 : vector<34x128xf32>
    %c1_199 = arith.constant 1 : index
    %c0_200 = arith.constant 0 : index
    %c0_201 = arith.constant 0 : index
    %573 = vector.load %arg6[%c1_199, %c0_200, %c0_201] : memref<2x128x64xbf16, #tpu.memory_space<vmem>>, vector<1x128x64xbf16>
    %574 = vector.shape_cast %573 : vector<1x128x64xbf16> to vector<128x64xbf16>
    %575 = arith.truncf %572 : vector<34x128xf32> to vector<34x128xbf16>
    %cst_202 = arith.constant dense<0.000000e+00> : vector<34x64xf32>
    %576 = tpu.matmul %575, %574, %cst_202 {dimension_numbers = #tpu.dot_dimension_numbers<[1], [0], [0], [1], [0, 0, 1, 1], [], []>} : vector<34x128xbf16>, vector<128x64xbf16>, vector<34x64xf32> -> vector<34x64xf32>
    %577 = arith.addf %527, %576 : vector<34x64xf32>
    %578 = vector.extract_strided_slice %296 {offsets = [6, 0], sizes = [1, 64], strides = [1, 1]} : vector<8x128xf32> to vector<1x64xf32>
    %579 = vector.shape_cast %578 : vector<1x64xf32> to vector<64xf32>
    %580 = vector.shape_cast %579 : vector<64xf32> to vector<1x64xf32>
    %581 = vector.broadcast %580 : vector<1x64xf32> to vector<34x64xf32>
    %582 = arith.addf %577, %581 : vector<34x64xf32>
    %583 = vector.extract_strided_slice %582 {offsets = [0, 0], sizes = [1, 64], strides = [1, 1]} : vector<34x64xf32> to vector<1x64xf32>
    %c0_203 = arith.constant 0 : index
    %c0_204 = arith.constant 0 : index
    %584 = vector.load %arg14[%c0_203, %c0_204] : memref<2x64xf32, #tpu.memory_space<vmem>>, vector<1x64xf32>
    tpu.vector_store %arg14[%c0_203, %c0_204], %583 {strides = array<i32>} : memref<2x64xf32, #tpu.memory_space<vmem>>, vector<1x64xf32>,
    %585 = vector.extract_strided_slice %582 {offsets = [17, 0], sizes = [1, 64], strides = [1, 1]} : vector<34x64xf32> to vector<1x64xf32>
    %c1_205 = arith.constant 1 : index
    %c0_206 = arith.constant 0 : index
    %586 = vector.load %arg14[%c1_205, %c0_206] : memref<2x64xf32, #tpu.memory_space<vmem>>, vector<1x64xf32>
    tpu.vector_store %arg14[%c1_205, %c0_206], %585 {strides = array<i32>} : memref<2x64xf32, #tpu.memory_space<vmem>>, vector<1x64xf32>,
    %c0_207 = arith.constant 0 : index
    %c0_208 = arith.constant 0 : index
    %587 = vector.load %arg14[%c0_207, %c0_208] : memref<2x64xf32, #tpu.memory_space<vmem>>, vector<2x64xf32>
    %c0_209 = arith.constant 0 : index
    %c0_210 = arith.constant 0 : index
    %588 = vector.load %arg11[%c0_209, %c0_210] : memref<8x128xf32, #tpu.memory_space<vmem>>, vector<8x128xf32>
    %c0_211 = arith.constant 0 : index
    %c0_212 = arith.constant 0 : index
    %589 = vector.load %arg8[%c0_211, %c0_212] : memref<64x128xbf16, #tpu.memory_space<vmem>>, vector<64x128xbf16>
    %590 = arith.truncf %587 : vector<2x64xf32> to vector<2x64xbf16>
    %cst_213 = arith.constant dense<0.000000e+00> : vector<2x128xf32>
    %591 = tpu.matmul %590, %589, %cst_213 {dimension_numbers = #tpu.dot_dimension_numbers<[1], [0], [0], [1], [0, 0, 1, 1], [], []>} : vector<2x64xbf16>, vector<64x128xbf16>, vector<2x128xf32> -> vector<2x128xf32>
    %592 = vector.extract_strided_slice %588 {offsets = [0, 0], sizes = [1, 128], strides = [1, 1]} : vector<8x128xf32> to vector<1x128xf32>
    %593 = vector.shape_cast %592 : vector<1x128xf32> to vector<128xf32>
    %594 = vector.shape_cast %593 : vector<128xf32> to vector<1x128xf32>
    %595 = vector.broadcast %594 : vector<1x128xf32> to vector<2x128xf32>
    %596 = arith.addf %591, %595 : vector<2x128xf32>
    %cst_214 = arith.constant 5.000000e-01 : f32
    %597 = vector.broadcast %cst_214 : f32 to vector<2x128xf32>
    %598 = arith.mulf %597, %596 : vector<2x128xf32>
    %cst_215 = arith.constant 0.707106769 : f32
    %599 = vector.broadcast %cst_215 : f32 to vector<2x128xf32>
    %600 = arith.mulf %596, %599 : vector<2x128xf32>
    %601 = math.erf %600 : vector<2x128xf32>
    %cst_216 = arith.constant 1.000000e+00 : f32
    %602 = vector.broadcast %cst_216 : f32 to vector<2x128xf32>
    %603 = arith.addf %602, %601 : vector<2x128xf32>
    %604 = arith.mulf %598, %603 : vector<2x128xf32>
    %c0_217 = arith.constant 0 : index
    %c0_218 = arith.constant 0 : index
    %605 = vector.load %arg9[%c0_217, %c0_218] : memref<128x64xbf16, #tpu.memory_space<vmem>>, vector<128x64xbf16>
    %606 = arith.truncf %604 : vector<2x128xf32> to vector<2x128xbf16>
    %cst_219 = arith.constant dense<0.000000e+00> : vector<2x64xf32>
    %607 = tpu.matmul %606, %605, %cst_219 {dimension_numbers = #tpu.dot_dimension_numbers<[1], [0], [0], [1], [0, 0, 1, 1], [], []>} : vector<2x128xbf16>, vector<128x64xbf16>, vector<2x64xf32> -> vector<2x64xf32>
    %608 = vector.extract_strided_slice %588 {offsets = [1, 0], sizes = [1, 64], strides = [1, 1]} : vector<8x128xf32> to vector<1x64xf32>
    %609 = vector.shape_cast %608 : vector<1x64xf32> to vector<64xf32>
    %610 = vector.shape_cast %609 : vector<64xf32> to vector<1x64xf32>
    %611 = vector.broadcast %610 : vector<1x64xf32> to vector<2x64xf32>
    %612 = arith.addf %607, %611 : vector<2x64xf32>
    %613 = vector.extract_strided_slice %588 {offsets = [2, 0], sizes = [1, 64], strides = [1, 1]} : vector<8x128xf32> to vector<1x64xf32>
    %614 = vector.shape_cast %613 : vector<1x64xf32> to vector<64xf32>
    %615 = vector.extract_strided_slice %588 {offsets = [3, 0], sizes = [1, 64], strides = [1, 1]} : vector<8x128xf32> to vector<1x64xf32>
    %616 = vector.shape_cast %615 : vector<1x64xf32> to vector<64xf32>
    %cst_220 = arith.constant dense<0.000000e+00> : vector<2xf32>
    %617 = vector.multi_reduction <add>, %612, %cst_220 [1] : vector<2x64xf32> to vector<2xf32>
    %618 = vector.shape_cast %617 : vector<2xf32> to vector<2x1xf32>
    %cst_221 = arith.constant 6.400000e+01 : f32
    %619 = vector.broadcast %cst_221 : f32 to vector<2x1xf32>
    %620 = arith.divf %618, %619 : vector<2x1xf32>
    %621 = arith.mulf %612, %612 : vector<2x64xf32>
    %cst_222 = arith.constant dense<0.000000e+00> : vector<2xf32>
    %622 = vector.multi_reduction <add>, %621, %cst_222 [1] : vector<2x64xf32> to vector<2xf32>
    %623 = vector.shape_cast %622 : vector<2xf32> to vector<2x1xf32>
    %cst_223 = arith.constant 6.400000e+01 : f32
    %624 = vector.broadcast %cst_223 : f32 to vector<2x1xf32>
    %625 = arith.divf %623, %624 : vector<2x1xf32>
    %626 = arith.mulf %620, %620 : vector<2x1xf32>
    %627 = arith.subf %625, %626 : vector<2x1xf32>
    %628 = vector.broadcast %620 : vector<2x1xf32> to vector<2x64xf32>
    %629 = arith.subf %612, %628 : vector<2x64xf32>
    %cst_224 = arith.constant 9.99999974E-6 : f32
    %630 = vector.broadcast %cst_224 : f32 to vector<2x1xf32>
    %631 = arith.addf %627, %630 : vector<2x1xf32>
    %632 = math.rsqrt %631 : vector<2x1xf32>
    %633 = vector.broadcast %632 : vector<2x1xf32> to vector<2x64xf32>
    %634 = arith.mulf %629, %633 : vector<2x64xf32>
    %635 = vector.shape_cast %614 : vector<64xf32> to vector<1x64xf32>
    %636 = vector.broadcast %635 : vector<1x64xf32> to vector<2x64xf32>
    %637 = arith.mulf %634, %636 : vector<2x64xf32>
    %638 = vector.shape_cast %616 : vector<64xf32> to vector<1x64xf32>
    %639 = vector.broadcast %638 : vector<1x64xf32> to vector<2x64xf32>
    %640 = arith.addf %637, %639 : vector<2x64xf32>
    %c0_225 = arith.constant 0 : index
    %c0_226 = arith.constant 0 : index
    %641 = vector.load %arg10[%c0_225, %c0_226] : memref<64x128xbf16, #tpu.memory_space<vmem>>, vector<64x128xbf16>
    %642 = arith.truncf %640 : vector<2x64xf32> to vector<2x64xbf16>
    %cst_227 = arith.constant dense<0.000000e+00> : vector<2x128xf32>
    %643 = tpu.matmul %642, %641, %cst_227 {dimension_numbers = #tpu.dot_dimension_numbers<[1], [0], [0], [1], [0, 0, 1, 1], [], []>} : vector<2x64xbf16>, vector<64x128xbf16>, vector<2x128xf32> -> vector<2x128xf32>
    %644 = vector.extract_strided_slice %588 {offsets = [4, 0], sizes = [1, 128], strides = [1, 1]} : vector<8x128xf32> to vector<1x128xf32>
    %645 = vector.shape_cast %644 : vector<1x128xf32> to vector<128xf32>
    %646 = vector.shape_cast %645 : vector<128xf32> to vector<1x128xf32>
    %647 = vector.broadcast %646 : vector<1x128xf32> to vector<2x128xf32>
    %648 = arith.addf %643, %647 : vector<2x128xf32>
    %c0_228 = arith.constant 0 : index
    %c0_229 = arith.constant 0 : index
    %c0_230 = arith.constant 0 : index
    %649 = vector.load %arg12[%c0_228, %c0_229, %c0_230] : memref<1x2x128xf32, #tpu.memory_space<vmem>>, vector<1x2x128xf32>
    %650 = vector.shape_cast %649 : vector<1x2x128xf32> to vector<2x128xf32>
    %651 = vector.shape_cast %648 : vector<2x128xf32> to vector<1x2x128xf32>
    tpu.vector_store %arg12[%c0_228, %c0_229, %c0_230], %651 {strides = array<i32>} : memref<1x2x128xf32, #tpu.memory_space<vmem>>, vector<1x2x128xf32>,
    return
  }
  func.func @transform_0(%arg0: i32) -> (i32, i32, i32) {
    %c0_i32 = arith.constant 0 : i32
    %c0_i32_0 = arith.constant 0 : i32
    %c0_i32_1 = arith.constant 0 : i32
    return %arg0, %c0_i32, %c0_i32_0 : i32, i32, i32
  }
  func.func @transform_1(%arg0: i32) -> (i32, i32) {
    %c0_i32 = arith.constant 0 : i32
    %c0_i32_0 = arith.constant 0 : i32
    %c0_i32_1 = arith.constant 0 : i32
    return %c0_i32, %c0_i32_0 : i32, i32
  }
  func.func @transform_2(%arg0: i32) -> (i32, i32) {
    %c0_i32 = arith.constant 0 : i32
    %c0_i32_0 = arith.constant 0 : i32
    %c0_i32_1 = arith.constant 0 : i32
    return %c0_i32, %c0_i32_0 : i32, i32
  }
  func.func @transform_3(%arg0: i32) -> (i32, i32, i32, i32) {
    %c0_i32 = arith.constant 0 : i32
    %c0_i32_0 = arith.constant 0 : i32
    %c0_i32_1 = arith.constant 0 : i32
    %c0_i32_2 = arith.constant 0 : i32
    %c0_i32_3 = arith.constant 0 : i32
    return %c0_i32, %c0_i32_0, %c0_i32_1, %c0_i32_2 : i32, i32, i32, i32
  }
  func.func @transform_4(%arg0: i32) -> (i32, i32, i32) {
    %c0_i32 = arith.constant 0 : i32
    %c0_i32_0 = arith.constant 0 : i32
    %c0_i32_1 = arith.constant 0 : i32
    %c0_i32_2 = arith.constant 0 : i32
    return %c0_i32, %c0_i32_0, %c0_i32_1 : i32, i32, i32
  }
  func.func @transform_5(%arg0: i32) -> (i32, i32, i32) {
    %c0_i32 = arith.constant 0 : i32
    %c0_i32_0 = arith.constant 0 : i32
    %c0_i32_1 = arith.constant 0 : i32
    %c0_i32_2 = arith.constant 0 : i32
    return %c0_i32, %c0_i32_0, %c0_i32_1 : i32, i32, i32
  }
  func.func @transform_6(%arg0: i32) -> (i32, i32, i32) {
    %c0_i32 = arith.constant 0 : i32
    %c0_i32_0 = arith.constant 0 : i32
    %c0_i32_1 = arith.constant 0 : i32
    %c0_i32_2 = arith.constant 0 : i32
    return %c0_i32, %c0_i32_0, %c0_i32_1 : i32, i32, i32
  }
  func.func @transform_7(%arg0: i32) -> (i32, i32) {
    %c0_i32 = arith.constant 0 : i32
    %c0_i32_0 = arith.constant 0 : i32
    %c0_i32_1 = arith.constant 0 : i32
    return %c0_i32, %c0_i32_0 : i32, i32
  }
  func.func @transform_8(%arg0: i32) -> (i32, i32) {
    %c0_i32 = arith.constant 0 : i32
    %c0_i32_0 = arith.constant 0 : i32
    %c0_i32_1 = arith.constant 0 : i32
    return %c0_i32, %c0_i32_0 : i32, i32
  }
  func.func @transform_9(%arg0: i32) -> (i32, i32) {
    %c0_i32 = arith.constant 0 : i32
    %c0_i32_0 = arith.constant 0 : i32
    %c0_i32_1 = arith.constant 0 : i32
    return %c0_i32, %c0_i32_0 : i32, i32
  }
  func.func @transform_10(%arg0: i32) -> (i32, i32) {
    %c0_i32 = arith.constant 0 : i32
    %c0_i32_0 = arith.constant 0 : i32
    %c0_i32_1 = arith.constant 0 : i32
    return %c0_i32, %c0_i32_0 : i32, i32
  }
  func.func @transform_11(%arg0: i32) -> (i32, i32, i32) {
    %c0_i32 = arith.constant 0 : i32
    %c0_i32_0 = arith.constant 0 : i32
    %c0_i32_1 = arith.constant 0 : i32
    return %arg0, %c0_i32, %c0_i32_0 : i32, i32, i32
  }
}

</mosaic_0001>

<bundles_post_ra>
// kernel: tpu_custom_call.1
= control target key start
LH: loop header
LB: loop body
LE: loop exit
PB: predicated region body
PF: predicated region fallthrough
CT: control target
= control target key end

     0   :  { %16 = vsyncpa [#allocation5], 0  ;;  %s8401_s0 = inlined_call_operand.vmem [shape: f32[1,34,64], index: 0, kind: input, shape index: {}]   ;;  %s8402_s1 = inlined_call_operand.vmem [shape: f32[34,64], index: 1, kind: input, shape index: {}]   ;;  %s8403_s2 = inlined_call_operand.hbm [shape: bf16[64,64], index: 2, kind: input, shape index: {}]   ;;  %s8404_s3 = inlined_call_operand.vmem [shape: bf16[2,4,64,64], index: 3, kind: input, shape index: {}]   ;;  %s8405_s4 = inlined_call_operand.hbm [shape: bf16[2,64,128], index: 4, kind: input, shape index: {}]   ;;  %s8406_s5 = inlined_call_operand.vmem [shape: bf16[2,128,64], index: 5, kind: input, shape index: {}]   ;;  %s8407_s6 = inlined_call_operand.hbm [shape: f32[2,8,128], index: 6, kind: input, shape index: {}]   ;;  %s8408_s7 = inlined_call_operand.hbm [shape: bf16[64,128], index: 7, kind: input, shape index: {}]   ;;  %s8409_s8 = inlined_call_operand.vmem [shape: bf16[128,64], index: 8, kind: input, shape index: {}]   ;;  %s8410_s9 = inlined_call_operand.hbm [shape: bf16[64,128], index: 9, kind: input, shape index: {}]   ;;  %s8411_s10 = inlined_call_operand.hbm [shape: f32[8,128], index: 10, kind: input, shape index: {}]   ;;  %s8412_s11 = inlined_call_operand.hbm [shape: f32[1,2,128], index: 11, kind: output, shape index: {}]  }
   0x1   :  { %17 = vsyncpa [#allocation8], 0 }
   0x2   :  { %18 = vsyncpa [#allocation11], 0 }
   0x3   :  { %19 = vsyncpa [#allocation14], 0 }
   0x4   :  { %20 = vsyncpa [#allocation6], 0  ;;  %s6837_s17 = smov [#allocation7]   ;;  %s6838_s19 = smov [#allocation10]  }
   0x5   :  { %s44_s18 = sshll.u32 %s6837_s17, 4  ;;  %s70_s20 = sshll.u32 %s6838_s19, 4  ;;  %s45_s18 = int_to_ptr.vmem [resolvable:$true] %s44_s18  ;;  %s6917_s20 = int_to_ptr.vmem [resolvable:$true] %s70_s20 }
   0x6   :  { %s6673_s23 = scalar_lea.hbm %s8405_s4, 1024 }
   0x7   :  { %p6674_p0 = scmp.ne.s32.totalorder %s8405_s4, %s6673_s23  ;;  %p6677_p1 = scmp.lt.u32.totalorder %s6673_s23, %s8405_s4 }
   0x9   :  { %p6679_p2 = pnand %p6677_p1, %p6674_p0 }
   0xb   :  { %6682 = shalt.err (!%p6679_p2)
}
   0xc   :  { %s6683_s28 = scalar_lea.vmem %s45_s18, 1024  ;;  %p6688_p4 = scmp.lt.s32.totalorder %s45_s18, %s45_s18 }
   0xd   :  { %p6684_p3 = scmp.ne.s32.totalorder %s45_s18, %s6683_s28  ;;  %p6689_p5 = scmp.lt.s32.totalorder %s6683_s28, %s6683_s28 }
   0xf   :  { %p6690_p6 = por %p6689_p5, %p6688_p4 }
  0x11   :  { %p6691_p7 = pnand %p6690_p6, %p6684_p3 }
  0x13   :  { %6694 = shalt.err (!%p6691_p7)
}
  0x14   :  { %s6839_s29 = smov 64   ;;  %s6840_s30 = smov 4  }
  0x15   :  { %50 = dma.hbm_to_vmem [thread:$0]  %s8405_s4, 1024, %s45_s18, [#allocation8], %s6839_s29, %s6839_s29, %s6840_s30  }
  0x16   :  { %s6695_s16 = scalar_lea.hbm %s8408_s7, 512 }
  0x17   :  { %p6696_p8 = scmp.ne.s32.totalorder %s8408_s7, %s6695_s16  ;;  %p6699_p9 = scmp.lt.u32.totalorder %s6695_s16, %s8408_s7 }
  0x19   :  { %p6701_p10 = pnand %p6699_p9, %p6696_p8 }
  0x1b   :  { %6704 = shalt.err (!%p6701_p10)
}
  0x1c   :  { %s6705_s23 = scalar_lea.vmem %s6917_s20, 512  ;;  %p6710_p12 = scmp.lt.s32.totalorder %s6917_s20, %s6917_s20 }
  0x1d   :  { %p6706_p11 = scmp.ne.s32.totalorder %s6917_s20, %s6705_s23  ;;  %p6711_p13 = scmp.lt.s32.totalorder %s6705_s23, %s6705_s23 }
  0x1f   :  { %p6712_p0 = por %p6711_p13, %p6710_p12 }
  0x21   :  { %p6713_p1 = pnand %p6712_p0, %p6706_p11 }
  0x23   :  { %6716 = shalt.err (!%p6713_p1)
}
  0x24   :  { %76 = dma.hbm_to_vmem [thread:$0]  %s8408_s7, 512, %s6917_s20, [#allocation11], %s6839_s29, %s6839_s29, %s6840_s30  }
  0x25   :  { %s6841_s24 = smov [#allocation4]   ;;  %s6842_s26 = smov [#allocation9]  }
  0x26   :  { %s30_s25 = sshll.u32 %s6841_s24, 4  ;;  %s58_s27 = sshll.u32 %s6842_s26, 4  ;;  %s31_s25 = int_to_ptr.vmem [resolvable:$true] %s30_s25  ;;  %s6954_s27 = int_to_ptr.vmem [resolvable:$true] %s58_s27 }
  0x27   :  { %s6717_s13 = scalar_lea.hbm %s8403_s2, 512 }
  0x28   :  { %p6718_p2 = scmp.ne.s32.totalorder %s8403_s2, %s6717_s13  ;;  %p6721_p3 = scmp.lt.u32.totalorder %s6717_s13, %s8403_s2 }
  0x2a   :  { %p6723_p4 = pnand %p6721_p3, %p6718_p2 }
  0x2c   :  { %6726 = shalt.err (!%p6723_p4)
}
  0x2d   :  { %s6727_s7 = scalar_lea.vmem %s31_s25, 512  ;;  %p6732_p6 = scmp.lt.s32.totalorder %s31_s25, %s31_s25 }
  0x2e   :  { %p6728_p5 = scmp.ne.s32.totalorder %s31_s25, %s6727_s7  ;;  %p6733_p7 = scmp.lt.s32.totalorder %s6727_s7, %s6727_s7 }
  0x30   :  { %p6734_p8 = por %p6733_p7, %p6732_p6 }
  0x32   :  { %p6735_p9 = pnand %p6734_p8, %p6728_p5 }
  0x34   :  { %6738 = shalt.err (!%p6735_p9)
}
  0x35   :  { %36 = dma.hbm_to_vmem [thread:$0]  %s8403_s2, 512, %s31_s25, [#allocation5], %s6839_s29, %s6839_s29, %s6840_s30  }
  0x36   :  { %s6739_s23 = scalar_lea.hbm %s8407_s6, 256 }
  0x37   :  { %p6740_p10 = scmp.ne.s32.totalorder %s8407_s6, %s6739_s23  ;;  %p6743_p11 = scmp.lt.u32.totalorder %s6739_s23, %s8407_s6 }
  0x39   :  { %p6745_p12 = pnand %p6743_p11, %p6740_p10 }
  0x3b   :  { %6748 = shalt.err (!%p6745_p12)
}
  0x3c   :  { %s6749_s28 = scalar_lea.vmem %s6954_s27, 256  ;;  %p6754_p0 = scmp.lt.s32.totalorder %s6954_s27, %s6954_s27 }
  0x3d   :  { %p6750_p13 = scmp.ne.s32.totalorder %s6954_s27, %s6749_s28  ;;  %p6755_p1 = scmp.lt.s32.totalorder %s6749_s28, %s6749_s28 }
  0x3f   :  { %p6756_p2 = por %p6755_p1, %p6754_p0 }
  0x41   :  { %p6757_p3 = pnand %p6756_p2, %p6750_p13 }
  0x43   :  { %6760 = shalt.err (!%p6757_p3)
}
  0x44   :  { %s6843_s2 = smov 128   ;;  %s6844_s25 = smov 8  }
  0x45   :  { %64 = dma.hbm_to_vmem [thread:$0]  %s8407_s6, 256, %s6954_s27, [#allocation8], %s6843_s2, %s6843_s2, %s6844_s25  }
  0x46   :  { %s6845_s14 = smov [#allocation12]   ;;  %s6846_s16 = smov [#allocation13]  }
  0x47   :  { %s84_s15 = sshll.u32 %s6845_s14, 4  ;;  %s97_s17 = sshll.u32 %s6846_s16, 4  ;;  %s85_s15 = int_to_ptr.vmem [resolvable:$true] %s84_s15  ;;  %s98_s17 = int_to_ptr.vmem [resolvable:$true] %s97_s17 }
  0x48   :  { %s6761_s19 = scalar_lea.hbm %s8410_s9, 512 }
  0x49   :  { %p6762_p4 = scmp.ne.s32.totalorder %s8410_s9, %s6761_s19  ;;  %p6765_p5 = scmp.lt.u32.totalorder %s6761_s19, %s8410_s9 }
  0x4b   :  { %p6767_p6 = pnand %p6765_p5, %p6762_p4 }
  0x4d   :  { %6770 = shalt.err (!%p6767_p6)
}
  0x4e   :  { %s6771_s6 = scalar_lea.vmem %s85_s15, 512  ;;  %p6776_p8 = scmp.lt.s32.totalorder %s85_s15, %s85_s15 }
  0x4f   :  { %p6772_p7 = scmp.ne.s32.totalorder %s85_s15, %s6771_s6  ;;  %p6777_p9 = scmp.lt.s32.totalorder %s6771_s6, %s6771_s6 }
  0x51   :  { %p6778_p10 = por %p6777_p9, %p6776_p8 }
  0x53   :  { %p6779_p11 = pnand %p6778_p10, %p6772_p7 }
  0x55   :  { %6782 = shalt.err (!%p6779_p11)
}
  0x56   :  { %90 = dma.hbm_to_vmem [thread:$0]  %s8410_s9, 512, %s85_s15, [#allocation11], %s6839_s29, %s6839_s29, %s6840_s30  }
  0x57   :  { %s6783_s28 = scalar_lea.hbm %s8411_s10, 128 }
  0x58   :  { %p6784_p12 = scmp.ne.s32.totalorder %s8411_s10, %s6783_s28  ;;  %p6787_p13 = scmp.lt.u32.totalorder %s6783_s28, %s8411_s10 }
  0x5a   :  { %p6789_p0 = pnand %p6787_p13, %p6784_p12 }
  0x5c   :  { %6792 = shalt.err (!%p6789_p0)
}
  0x5d   :  { %s6793_s14 = scalar_lea.vmem %s98_s17, 128  ;;  %p6798_p2 = scmp.lt.s32.totalorder %s98_s17, %s98_s17 }
  0x5e   :  { %p6794_p1 = scmp.ne.s32.totalorder %s98_s17, %s6793_s14  ;;  %p6799_p3 = scmp.lt.s32.totalorder %s6793_s14, %s6793_s14 }
  0x60   :  { %p6800_p4 = por %p6799_p3, %p6798_p2 }
  0x62   :  { %p6801_p5 = pnand %p6800_p4, %p6794_p1 }
  0x64   :  { %6804 = shalt.err (!%p6801_p5)
}
  0x65   :  { %100 = dma.hbm_to_vmem [thread:$0]  %s8411_s10, 128, %s98_s17, [#allocation14]  }
  0x66   :  { %6827 = dma.done.wait [#allocation5], 512  }
  0x67   :  { %6828 = vsyncadd [#allocation5], 4294966784 }
  0x68   :  { %6829 = dma.done.wait [#allocation8], 1280  }
  0x69   :  { %6830 = vsyncadd [#allocation8], 4294966016 }
  0x6a   :  { %6831 = dma.done.wait [#allocation11], 1024  }
  0x6b   :  { %6832 = vsyncadd [#allocation11], 4294966272 }
  0x6c   :  { %6833 = dma.done.wait [#allocation14], 128  }
  0x6d   :  { %6834 = vsyncadd [#allocation14], 4294967168  ;;  %v6847_v0 = vmov 0.0   ;;  %vm6848_vm0 = vmmov 0   ;;  %v6339_v1 = vld [vmem:[#allocation4] sm:$0xff]   ;;  %v6340_v2 = vld [vmem:[#allocation4 + $0x8] sm:$0xff]  }
  0x6e   :  { %5711 = vmatprep.subr.bf16.mxu0 %v6847_v0  ;;  %5719 = vmatprep.mubr.msk.bf16.mxu0 %vm6848_vm0, %v6847_v0  ;;  %v6341_v3 = vld [vmem:[#allocation4 + $0x10] sm:$0xff]   ;;  %vm165_vm1 = vcmask 523264   ;;  %v6342_v4 = vld [vmem:[#allocation4 + $0x18] sm:$0xff]   ;;  %v122_v8 = vld [vmem:[%s8401_s0 + $0x10] sm:$0xff]  ;;  %vm244_vm2 = vcmask 517120   ;;  %vm609_vm3 = vcmask 130048  }
  0x6f   :  { %5731 = vmatprep.subr.bf16.mxu1 %v6847_v0  ;;  %5739 = vmatprep.mubr.msk.bf16.mxu1 %vm6848_vm0, %v6847_v0  ;;  %v120_v5 = vld [vmem:[%s8401_s0] sm:$0xff]  ;;  %v121_v6 = vld [vmem:[%s8401_s0 + $0x8] sm:$0xff]  ;;  %v123_v9 = vld [vmem:[%s8401_s0 + $0x18] sm:$0xff]  ;;  %s6849_s26 = smov 112   ;;  %vm1341_vm4 = vsmask.f32 7424 }
  0x70   :  { %5712 = vmatpush3.bf16.msra.mxu0 %v6339_v1  ;;  %v133_v7 = vpack.c.bf16 %v121_v6, %v120_v5  ;;  %v134_v10 = vpack.c.bf16 %v123_v9, %v122_v8  ;;  %v124_v11 = vld [vmem:[%s8401_s0 + $0x20] sm:$0x3]  ;;  %v137_v15 = vld [vmem:[%s8402_s1 + $0x8] sm:$0xff]  ;;  %v138_v25 = vld [vmem:[%s8402_s1 + $0x10] sm:$0xff]  ;;  %v309_v8 = vlaneseq  ;;  %vm718_vm5 = vcmask 1040384   ;;  %s6851_s28 = smov 96  }
  0x71   :  { %5713 = vmatprep.subr.bf16.mxu0 %v6847_v0  ;;  %v135_v12 = vpack.c.bf16 %v124_v11, %v124_v11  ;;  %v136_v13 = vld [vmem:[%s8402_s1] sm:$0xff]  ;;  %v139_v28 = vld [vmem:[%s8402_s1 + $0x18] sm:$0xff]  ;;  %v6344_v52 = vld [vmem:[%s8404_s3 + $0x28] sm:$0xff]   ;;  %vm673_vm6 = vcmask 138240   ;;  %vm680_vm7 = vcmask 131072   ;;  %vm774_vm8 = vcmask 122880  }
  0x72   :  { %v140_v40 = vld [vmem:[%s8402_s1 + $0x20] sm:$0x3]  ;;  %v6347_v53 = vld [vmem:[%s8404_s3 + $0x8] sm:$0xff]   ;;  %v6346_v54 = vld [vmem:[%s8404_s3 + $0x30] sm:$0xff]   ;;  %s6852_s2 = smov 80   ;;  %s6853_s1 = smov 16  }
  0x73   :  { %v6343_v50 = vld [vmem:[%s8404_s3 + $0x20] sm:$0xff]   ;;  %v6348_v55 = vld [vmem:[%s8404_s3 + $0x10] sm:$0xff]   ;;  %v6349_v56 = vld [vmem:[%s8404_s3 + $0x38] sm:$0xff]   ;;  %s6854_s25 = smov 32   ;;  %s6855_s12 = smov 48   ;;  %vm962_vm9 = vcmask 261248  }
  0x74   :  { %5714 = vmatpush3.bf16.msra.mxu0 %v6340_v2  ;;  %v6345_v51 = vld [vmem:[%s8404_s3] sm:$0xff]   ;;  %v6350_v57 = vld [vmem:[%s8404_s3 + $0x18] sm:$0xff]   ;;  %vm1147_vm10 = vcmask 392448   ;;  %vm1332_vm11 = vcmask 523648   ;;  %vm965_vm12 = vcmask 254080   ;;  %vm1150_vm13 = vcmask 385280  }
  0x75   :  { %5715 = vmatprep.subr.bf16.mxu0 %v6847_v0  ;;  %5732 = vmatpush3.bf16.msra.mxu1 %v6345_v51  ;;  %vm1335_vm14 = vcmask 516480   ;;  %vm4894_vm15 = vcmask 516096  }
  0x76   :  { %5733 = vmatprep.subr.bf16.mxu1 %v6847_v0 }
  0x78   :  { %5716 = vmatpush3.bf16.msra.mxu0 %v6341_v3 }
  0x79   :  { %5717 = vmatprep.subr.bf16.mxu0 %v6847_v0  ;;  %5734 = vmatpush3.bf16.msra.mxu1 %v6347_v53 }
  0x7a   :  { %5735 = vmatprep.subr.bf16.mxu1 %v6847_v0 }
  0x7c   :  { %5718 = vmatpush3.bf16.msra.mxu0 %v6342_v4 }
  0x7d   :  { %5751 = vmatprep.subr.bf16.mxu0 %v6847_v0  ;;  %5736 = vmatpush3.bf16.msra.mxu1 %v6348_v55 }
  0x7e   :  { %5737 = vmatprep.subr.bf16.mxu1 %v6847_v0 }
  0x7f   :  { %5720 = vmatmul.mubr.msk.bf16.vlgmr.msra.gmra.mrb[0].mxu0 %vm165_vm1, %v133_v7 }
  0x80   :  { %5723 = vmatprep.mubr.msk.bf16.mxu0 %vm6848_vm0, %v6847_v0  ;;  %5752 = vmatpush3.bf16.msra.mxu0 %v6343_v50 }
  0x81   :  { %5753 = vmatprep.subr.bf16.mxu0 %v6847_v0  ;;  %5738 = vmatpush3.bf16.msra.mxu1 %v6350_v57  ;;  %v6351_v57 = vld [vmem:[%s8404_s3 + $0x40] sm:$0xff]  }
  0x82   :  { %5771 = vmatprep.subr.bf16.mxu1 %v6847_v0 }
  0x84   :  { %5754 = vmatpush3.bf16.msra.mxu0 %v6344_v52 }
  0x85   :  { %5755 = vmatprep.subr.bf16.mxu0 %v6847_v0 }
  0x87   :  { %5724 = vmatmul.mubr.msk.bf16.gmra.mrb[4].mxu0 %vm165_vm1, %v134_v10 }
  0x88   :  { %5727 = vmatprep.mubr.msk.bf16.mxu0 %vm6848_vm0, %v6847_v0  ;;  %5756 = vmatpush3.bf16.msra.mxu0 %v6346_v54 }
  0x89   :  { %5757 = vmatprep.subr.bf16.mxu0 %v6847_v0 }
  0x8c   :  { %5758 = vmatpush3.bf16.msra.mxu0 %v6349_v56 }
  0x8f   :  { %5728 = vmatmul.mubr.msk.bf16.gmra.mrb[8].mxu0 %vm165_vm1, %v135_v12 }
  0x90   :  { %5759 = vmatprep.mubr.msk.bf16.mxu0 %vm6848_vm0, %v6847_v0 }
 0x152   :  { %v209_v14 = vpop.f32.mrb[0].mxu0 }
 0x153   :  { %v7055_v16 = vadd.f32 %v209_v14, %v136_v13  ;;  %v5721_v17 = vpop.f32.mrb[1].mxu0 }
 0x154   :  { %v212_v18 = vpop.f32.mrb[2].mxu0  ;;  %v7130_v17 = vshrl.u32 %v309_v8, 7 }
 0x155   :  { %v7057_v19 = vadd.f32 %v212_v18, %v137_v15  ;;  %v5722_v20 = vpop.f32.mrb[3].mxu0  ;;  %v232_v21 = vsel %vm165_vm1, %v7055_v16, 0.0  ;;  %v254_v22 = vmul.f32 %v7055_v16, %v7055_v16 }
 0x156   :  { %233 = vadd.xlane.f32.xlu0 %v232_v21 }
 0x157   :  { %v259_v23 = vsel %vm165_vm1, %v254_v22, 0.0  ;;  %v255_v24 = vmul.f32 %v7057_v19, %v7057_v19  ;;  %v235_v26 = vsel %vm165_vm1, %v7057_v19, 0.0 }
 0x158   :  { %260 = vadd.xlane.f32.xlu1 %v259_v23 }
 0x159   :  { %v262_v31 = vsel %vm165_vm1, %v255_v24, 0.0 }
 0x15a   :  { %236 = vadd.xlane.f32.xlu0 %v235_v26  ;;  %v217_v27 = vpop.f32.mrb[4].mxu0 }
 0x15b   :  { %v7074_v29 = vadd.f32 %v217_v27, %v138_v25  ;;  %v5725_v30 = vpop.f32.mrb[5].mxu0  ;;  %v7133_v25 = vsub.s32 0, %v7130_v17 }
 0x15c   :  { %263 = vadd.xlane.f32.xlu1 %v262_v31  ;;  %v220_v32 = vpop.f32.mrb[6].mxu0  ;;  %v231_v30 = vld [vmem:[#allocation9] sm:$0xff] }
 0x15d   :  { %v7077_v33 = vadd.f32 %v220_v32, %v139_v28  ;;  %v5726_v34 = vpop.f32.mrb[7].mxu0  ;;  %v238_v35 = vsel %vm165_vm1, %v7074_v29, 0.0  ;;  %v256_v36 = vmul.f32 %v7074_v29, %v7074_v29 }
 0x15e   :  { %239 = vadd.xlane.f32.xlu0 %v238_v35 }
 0x15f   :  { %v241_v37 = vsel %vm165_vm1, %v7077_v33, 0.0  ;;  %v265_v38 = vsel %vm165_vm1, %v256_v36, 0.0  ;;  %v257_v39 = vmul.f32 %v7077_v33, %v7077_v33 }
 0x160   :  { %242 = vadd.xlane.f32.xlu1 %v241_v37 }
 0x161   :  { %v268_v42 = vsel %vm165_vm1, %v257_v39, 0.0  ;;  %v312_v39 = vrot.slane %v231_v30, %v7133_v25 }
 0x162   :  { %266 = vadd.xlane.f32.xlu0 %v265_v38  ;;  %v225_v41 = vpop.f32.mrb[8].mxu0 }
 0x163   :  { %v7092_v43 = vadd.f32 %v225_v41, %v140_v40  ;;  %v5729_v44 = vpop.f32.mrb[9].mxu0  ;;  %v7138_v40 = vsub.s32 1, %v7130_v17 }
 0x164   :  { %269 = vadd.xlane.f32.xlu1 %v268_v42  ;;  %v228_v45 = vpop.f32.mrb[10].mxu0 }
 0x165   :  { %v245_v46 = vsel %vm244_vm2, %v7092_v43, 0.0  ;;  %v258_v47 = vmul.f32 %v7092_v43, %v7092_v43  ;;  %v5730_v48 = vpop.f32.mrb[11].mxu0 }
 0x166   :  { %246 = vadd.xlane.f32.xlu0 %v245_v46  ;;  %v321_v48 = vrot.slane %v231_v30, %v7138_v40 }
 0x167   :  { %v271_v49 = vsel %vm244_vm2, %v258_v47, 0.0 }
 0x168   :  { %272 = vadd.xlane.f32.xlu1 %v271_v49 }
 0x1e3   :  { %v234_v58 = vpop.xlane.xlu0 %233 }
 0x1e4   :  { %v249_v59 = vmul.f32 0.015625, %v234_v58 }
 0x1e5   :  { %v261_v60 = vpop.xlane.xlu1 %260 }
 0x1e6   :  { %v279_v61 = vmul.f32 %v249_v59, %v249_v59  ;;  %v274_v62 = vmul.f32 0.015625, %v261_v60  ;;  %v289_v31 = vsub.f32 %v7055_v16, %v249_v59 }
 0x1e7   :  { %v237_v63 = vpop.xlane.xlu0 %236 }
 0x1e8   :  { %v284_v1 = vsub.f32 %v274_v62, %v279_v61  ;;  %v250_v2 = vmul.f32 0.015625, %v237_v63  ;;  %v6352_v63 = vld [vmem:[%s8404_s3 + $0x48] sm:$0xff]  }
 0x1e9   :  { %v264_v3 = vpop.xlane.xlu1 %263 }
 0x1ea   :  { %v294_v4 = vadd.f32 1e-05, %v284_v1  ;;  %v280_v5 = vmul.f32 %v250_v2, %v250_v2  ;;  %v275_v6 = vmul.f32 0.015625, %v264_v3  ;;  %v290_v41 = vsub.f32 %v7057_v19, %v250_v2 }
 0x1eb   :  { %v240_v7 = vpop.xlane.xlu0 %239 }
 0x1ec   :  { %6415 = vrsqrt.f32 %v294_v4  ;;  %v285_v9 = vsub.f32 %v275_v6, %v280_v5  ;;  %v251_v10 = vmul.f32 0.015625, %v240_v7  ;;  %v6353_v6 = vld [vmem:[%s8404_s3 + $0x50] sm:$0xff]  }
 0x1ed   :  { %v243_v11 = vpop.xlane.xlu1 %242 }
 0x1ee   :  { %v295_v12 = vadd.f32 1e-05, %v285_v9  ;;  %v281_v13 = vmul.f32 %v251_v10, %v251_v10  ;;  %v252_v14 = vmul.f32 0.015625, %v243_v11  ;;  %v291_v50 = vsub.f32 %v7074_v29, %v251_v10  ;;  %v6354_v9 = vld [vmem:[%s8404_s3 + $0x58] sm:$0xff]  }
 0x1ef   :  { %v267_v15 = vpop.xlane.xlu0 %266 }
 0x1f0   :  { %6417 = vrsqrt.f32 %v295_v12  ;;  %v276_v18 = vmul.f32 0.015625, %v267_v15  ;;  %v282_v21 = vmul.f32 %v252_v14, %v252_v14  ;;  %v292_v54 = vsub.f32 %v7077_v33, %v252_v14 }
 0x1f1   :  { %v270_v20 = vpop.xlane.xlu1 %269 }
 0x1f2   :  { %v286_v22 = vsub.f32 %v276_v18, %v281_v13  ;;  %v277_v23 = vmul.f32 0.015625, %v270_v20 }
 0x1f3   :  { %v247_v24 = vpop.xlane.xlu0 %246 }
 0x1f4   :  { %v296_v26 = vadd.f32 1e-05, %v286_v22  ;;  %v287_v27 = vsub.f32 %v277_v23, %v282_v21  ;;  %v253_v28 = vmul.f32 0.015625, %v247_v24 }
 0x1f5   :  { %v273_v32 = vpop.xlane.xlu1 %272 }
 0x1f6   :  { %v6416_v34 = vpop.eup %6415  ;;  %6419 = vrsqrt.f32 %v296_v26  ;;  %v297_v35 = vadd.f32 1e-05, %v287_v27  ;;  %v283_v36 = vmul.f32 %v253_v28, %v253_v28  ;;  %v278_v37 = vmul.f32 0.015625, %v273_v32 }
 0x1f7   :  { %v304_v38 = vmul.f32 %v6416_v34, %v289_v31  ;;  %v293_v61 = vsub.f32 %v7092_v43, %v253_v28 }
 0x1f8   :  { %6421 = vrsqrt.f32 %v297_v35  ;;  %v288_v42 = vsub.f32 %v278_v37, %v283_v36 }
 0x1f9   :  { %v313_v47 = vmul.f32 %v312_v39, %v304_v38 }
 0x1fa   :  { %v6418_v44 = vpop.eup %6417  ;;  %v298_v45 = vadd.f32 1e-05, %v288_v42 }
 0x1fb   :  { %v305_v46 = vmul.f32 %v6418_v44, %v290_v41  ;;  %v322_v51 = vadd.f32 %v321_v48, %v313_v47 }
 0x1fc   :  { %6423 = vrsqrt.f32 %v298_v45 }
 0x1fd   :  { %v314_v49 = vmul.f32 %v312_v39, %v305_v46 }
 0x1ff   :  { %v323_v52 = vadd.f32 %v321_v48, %v314_v49 }
 0x200   :  { %v6420_v53 = vpop.eup %6419 }
 0x201   :  { %v327_v55 = vpack.c.bf16 %v323_v52, %v322_v51  ;;  %v306_v56 = vmul.f32 %v6420_v53, %v291_v50 }
 0x202   :  { %v6422_v58 = vpop.eup %6421 }
 0x203   :  { %5740 = vmatmul.mubr.msk.bf16.vlgmr.msra.gmra.mrb[0].mxu1 %vm165_vm1, %v327_v55  ;;  %5760 = vmatmul.mubr.msk.bf16.vlgmr.msra.gmra.mrb[12].mxu0 %vm165_vm1, %v327_v55  ;;  %v307_v59 = vmul.f32 %v6422_v58, %v292_v54  ;;  %v315_v60 = vmul.f32 %v312_v39, %v306_v56 }
 0x204   :  { %5743 = vmatprep.mubr.msk.bf16.mxu1 %vm6848_vm0, %v6847_v0  ;;  %5763 = vmatprep.mubr.msk.bf16.mxu0 %vm6848_vm0, %v6847_v0 }
 0x205   :  { %v316_v62 = vmul.f32 %v312_v39, %v307_v59  ;;  %5772 = vmatpush3.bf16.msra.mxu1 %v6351_v57  ;;  %v324_v2 = vadd.f32 %v321_v48, %v315_v60 }
 0x206   :  { %5773 = vmatprep.subr.bf16.mxu1 %v6847_v0  ;;  %v6424_v1 = vpop.eup %6423 }
 0x207   :  { %v325_v3 = vadd.f32 %v321_v48, %v316_v62  ;;  %v308_v4 = vmul.f32 %v6424_v1, %v293_v61 }
 0x209   :  { %v328_v5 = vpack.c.bf16 %v325_v3, %v324_v2  ;;  %5774 = vmatpush3.bf16.msra.mxu1 %v6352_v63  ;;  %v317_v7 = vmul.f32 %v312_v39, %v308_v4 }
 0x20a   :  { %5775 = vmatprep.subr.bf16.mxu1 %v6847_v0 }
 0x20b   :  { %5744 = vmatmul.mubr.msk.bf16.gmra.mrb[4].mxu1 %vm165_vm1, %v328_v5  ;;  %5764 = vmatmul.mubr.msk.bf16.gmra.mrb[16].mxu0 %vm165_vm1, %v328_v5  ;;  %v326_v8 = vadd.f32 %v321_v48, %v317_v7 }
 0x20c   :  { %5747 = vmatprep.mubr.msk.bf16.mxu1 %vm6848_vm0, %v6847_v0  ;;  %5767 = vmatprep.mubr.msk.bf16.mxu0 %vm6848_vm0, %v6847_v0 }
 0x20d   :  { %5776 = vmatpush3.bf16.msra.mxu1 %v6353_v6  ;;  %v329_v10 = vpack.c.bf16 %v326_v8, %v326_v8 }
 0x20e   :  { %5777 = vmatprep.subr.bf16.mxu1 %v6847_v0 }
 0x211   :  { %5778 = vmatpush3.bf16.msra.mxu1 %v6354_v9 }
 0x213   :  { %5748 = vmatmul.mubr.msk.bf16.gmra.mrb[8].mxu1 %vm165_vm1, %v329_v10  ;;  %5768 = vmatmul.mubr.msk.bf16.gmra.mrb[20].mxu0 %vm165_vm1, %v329_v10 }
 0x214   :  { %5779 = vmatprep.mubr.msk.bf16.mxu1 %vm6848_vm0, %v6847_v0 }
 0x21b   :  { %5780 = vmatmul.mubr.msk.bf16.vlgmr.msra.gmra.mrb[12].mxu1 %vm165_vm1, %v327_v55 }
 0x21c   :  { %5783 = vmatprep.mubr.msk.bf16.mxu1 %vm6848_vm0, %v6847_v0 }
 0x223   :  { %5784 = vmatmul.mubr.msk.bf16.gmra.mrb[16].mxu1 %vm165_vm1, %v328_v5 }
 0x224   :  { %5787 = vmatprep.mubr.msk.bf16.mxu1 %vm6848_vm0, %v6847_v0 }
 0x22b   :  { %5788 = vmatmul.mubr.msk.bf16.gmra.mrb[20].mxu1 %vm165_vm1, %v329_v10  ;;  %v6850_v10 = vmov 0  }
 0x2d6   :  { %v405_v11 = vpop.f32.mrb[0].mxu1  ;;  %v494_v12 = vpop.f32.mrb[12].mxu0 }
 0x2d7   :  { %v5741_v13 = vpop.f32.mrb[1].mxu1  ;;  %v5761_v14 = vpop.f32.mrb[13].mxu0 }
 0x2d8   :  { %v408_v15 = vpop.f32.mrb[2].mxu1  ;;  %v497_v18 = vpop.f32.mrb[14].mxu0 }
 0x2d9   :  { %v7183_v20 = vpack.c.bf16 %v408_v15, %v405_v11  ;;  %v7185_v21 = vpack.c.bf16 %v497_v18, %v494_v12  ;;  %v5742_v22 = vpop.f32.mrb[3].mxu1  ;;  %v5762_v23 = vpop.f32.mrb[15].mxu0  ;;  %v7227_v11 = vsel %vm718_vm5, 65535, %v6850_v10 }
 0x2db   :  { %5795 = vmatprep.mubr.msk.bf16.mxu0 %vm609_vm3, %v7183_v20  ;;  %784 = vrot.lane.b32.xlu0 %v7185_v21, %s6849_s26  ;;  %v617_v24 = vsel %vm609_vm3, %v7185_v21, 0 }
 0x2dc   :  { %6287 = vmatprep.subr.msk.bf16.mxu0 %vm609_vm3, %v7185_v21 }
 0x2dd   :  { %5792 = vmatpush3.bf16.xpose.msra.mxu0 %v617_v24 }
 0x2de   :  { %v413_v26 = vpop.f32.mrb[4].mxu1  ;;  %v502_v27 = vpop.f32.mrb[16].mxu0 }
 0x2df   :  { %v7195_v28 = vpack.c.bf16 %v502_v27, %v502_v27  ;;  %v5745_v30 = vpop.f32.mrb[5].mxu1  ;;  %v5765_v31 = vpop.f32.mrb[17].mxu0  ;;  %v7205_v44 = vpack.c.bf16 %v413_v26, %v413_v26 }
 0x2e0   :  { %v416_v32 = vpop.f32.mrb[6].mxu1  ;;  %v505_v34 = vpop.f32.mrb[18].mxu0 }
 0x2e1   :  { %v1337_v35 = vpack.c.bf16 %v416_v32, %v413_v26  ;;  %v1339_v36 = vpack.c.bf16 %v505_v34, %v502_v27  ;;  %v5746_v37 = vpop.f32.mrb[7].mxu1  ;;  %786 = vrot.lane.b32.xlu1 %v7195_v28, %s6849_s26  ;;  %v5766_v38 = vpop.f32.mrb[19].mxu0  ;;  %6288 = vmatprep.subr.msk.bf16.mxu0 %vm609_vm3, %v7195_v28  ;;  %v620_v42 = vsel %vm609_vm3, %v7195_v28, 0 }
 0x2e3   :  { %v1345_v39 = vshll.u32 %v1337_v35, 16  ;;  %v1359_v41 = vshll.u32 %v1339_v36, 16  ;;  %v1343_v55 = vshrl.u32 %v1337_v35, 16  ;;  %v1357_v56 = vshrl.u32 %v1339_v36, 16 }
 0x2e5   :  { %5794 = vmatpush3.bf16.xpose.msra.mxu0 %v620_v42  ;;  %778 = vrot.lane.b32.xlu1 %v7183_v20, %s6849_s26  ;;  %v1347_v47 = vrot.slane %v1345_v39, 1  ;;  %v1361_v48 = vrot.slane %v1359_v41, 1 }
 0x2e6   :  { %v421_v45 = vpop.f32.mrb[8].mxu1  ;;  %v510_v46 = vpop.f32.mrb[20].mxu0 }
 0x2e7   :  { %v7207_v49 = vpack.c.bf16 %v421_v45, %v421_v45  ;;  %v7209_v50 = vpack.c.bf16 %v510_v46, %v510_v46  ;;  %v5749_v51 = vpop.f32.mrb[9].mxu1  ;;  %v5769_v52 = vpop.f32.mrb[21].mxu0  ;;  %v1348_v61 = vor.u32 %v1347_v47, %v1343_v55  ;;  %v1362_v62 = vor.u32 %v1361_v48, %v1357_v56 }
 0x2e8   :  { %v424_v53 = vpop.f32.mrb[10].mxu1  ;;  %v513_v54 = vpop.f32.mrb[22].mxu0 }
 0x2e9   :  { %v1350_v57 = vshll.u32 %v7207_v49, 16  ;;  %v1364_v58 = vshll.u32 %v7209_v50, 16  ;;  %780 = vrot.lane.b32.xlu1 %v7205_v44, %s6849_s26  ;;  %v5750_v59 = vpop.f32.mrb[11].mxu1  ;;  %v5770_v60 = vpop.f32.mrb[23].mxu0 }
 0x2eb   :  { %v1352_v63 = vrot.slane %v1350_v57, 1  ;;  %v1366_v1 = vrot.slane %v1364_v58, 1 }
 0x2ec   :  { %5796 = vmatmul.mubr.msk.bf16.vlgmr.msra.gmra.mrb[24].mxu0 %vm609_vm3, %v7205_v44 }
 0x2ed   :  { %v7218_v2 = vsel %vm1341_vm4, %v1362_v62, %v1366_v1  ;;  %v7221_v3 = vsel %vm1341_vm4, %v1348_v61, %v1352_v63 }
 0x2ee   :  { %v583_v4 = vpop.f32.mrb[12].mxu1 }
 0x2ef   :  { %v5781_v5 = vpop.f32.mrb[13].mxu1 }
 0x2f0   :  { %v586_v6 = vpop.f32.mrb[14].mxu1 }
 0x2f1   :  { %v7223_v7 = vpack.c.bf16 %v586_v6, %v583_v4  ;;  %v5782_v8 = vpop.f32.mrb[15].mxu1 }
 0x2f3   :  { %5799 = vmatprep.subr.bf16.mxu1 %v7223_v7 }
 0x2f4   :  { %5800 = vmatpush3.bf16.msra.mxu1 %v7223_v7 }
 0x2f6   :  { %v591_v9 = vpop.f32.mrb[16].mxu1 }
 0x2f7   :  { %v7229_v12 = vpack.c.bf16 %v591_v9, %v591_v9  ;;  %v5785_v13 = vpop.f32.mrb[17].mxu1 }
 0x2f8   :  { %v594_v14 = vpop.f32.mrb[18].mxu1 }
 0x2f9   :  { %v1468_v15 = vpack.c.bf16 %v594_v14, %v591_v9  ;;  %v5786_v18 = vpop.f32.mrb[19].mxu1  ;;  %v722_v22 = vand.u32 %v7227_v11, %v7229_v12 }
 0x2fb   :  { %v1473_v23 = vshll.u32 %v1468_v15, 16  ;;  %5801 = vmatprep.subr.bf16.mxu1 %v722_v22  ;;  %v1471_v32 = vshrl.u32 %v1468_v15, 16 }
 0x2fc   :  { %5802 = vmatpush3.bf16.msra.mxu1 %v722_v22 }
 0x2fd   :  { %v1475_v26 = vrot.slane %v1473_v23, 1 }
 0x2fe   :  { %v599_v24 = vpop.f32.mrb[20].mxu1 }
 0x2ff   :  { %v7233_v27 = vpack.c.bf16 %v599_v24, %v599_v24  ;;  %v5789_v30 = vpop.f32.mrb[21].mxu1  ;;  %v1476_v36 = vor.u32 %v1475_v26, %v1471_v32 }
 0x300   :  { %v602_v31 = vpop.f32.mrb[22].mxu1 }
 0x301   :  { %v1478_v34 = vshll.u32 %v7233_v27, 16  ;;  %v5790_v35 = vpop.f32.mrb[23].mxu1 }
 0x303   :  { %v1480_v37 = vrot.slane %v1478_v34, 1 }
 0x305   :  { %v7237_v38 = vsel %vm1341_vm4, %v1476_v36, %v1480_v37 }
 0x34d   :  { %v785_v39 = vpop.permute.xlu0 %784 }
 0x34e   :  { %6289 = vmatprep.subr.msk.bf16.mxu0 %vm609_vm3, %v785_v39  ;;  %v795_v41 = vsel %vm609_vm3, %v785_v39, 0 }
 0x34f   :  { %5808 = vmatpush3.bf16.xpose.msra.mxu0 %v795_v41 }
 0x353   :  { %v787_v42 = vpop.permute.xlu1 %786 }
 0x354   :  { %6290 = vmatprep.subr.msk.bf16.mxu0 %vm609_vm3, %v787_v42  ;;  %v798_v45 = vsel %vm609_vm3, %v787_v42, 0 }
 0x357   :  { %v779_v46 = vpop.permute.xlu1 %778  ;;  %5810 = vmatpush3.bf16.xpose.msra.mxu0 %v798_v45 }
 0x358   :  { %5811 = vmatprep.mubr.msk.bf16.mxu0 %vm609_vm3, %v779_v46 }
 0x35b   :  { %v781_v47 = vpop.permute.xlu1 %780 }
 0x35e   :  { %5812 = vmatmul.mubr.msk.bf16.vlgmr.msra.gmra.mrb[28].mxu0 %vm609_vm3, %v781_v47 }
 0x3bf   :  { %v5797_v48 = vpop.f32.mrb[24].mxu0 }
 0x3c0   :  { %v656_v51 = vpop.f32.mrb[25].mxu0  ;;  %v672_v55 = vmul.f32 0.25, %v5797_v48 }
 0x3c1   :  { %v670_v52 = vmul.f32 0.25, %v656_v51  ;;  %v5798_v53 = vpop.f32.mrb[26].mxu0 }
 0x3c2   :  { %v659_v54 = vpop.f32.mrb[27].mxu0  ;;  %v681_v59 = vsel %vm680_vm7, %v672_v55, -inf }
 0x3c3   :  { %v671_v56 = vmul.f32 0.25, %v659_v54  ;;  %v674_v57 = vsel %vm673_vm6, %v670_v52, -inf }
 0x3c4   :  { %675 = vmax.xlane.f32.xlu0 %v674_v57 }
 0x3c5   :  { %v677_v58 = vsel %vm673_vm6, %v671_v56, -inf }
 0x3c6   :  { %678 = vmax.xlane.f32.xlu1 %v677_v58 }
 0x3c8   :  { %682 = vmax.xlane.f32.xlu0 %v681_v59 }
 0x431   :  { %v5813_v60 = vpop.f32.mrb[28].mxu0 }
 0x432   :  { %v850_v61 = vmul.f32 0.25, %v5813_v60  ;;  %v834_v62 = vpop.f32.mrb[29].mxu0 }
 0x433   :  { %v848_v63 = vmul.f32 0.25, %v834_v62  ;;  %v5814_v1 = vpop.f32.mrb[30].mxu0 }
 0x434   :  { %v837_v4 = vpop.f32.mrb[31].mxu0  ;;  %v857_v5 = vsel %vm680_vm7, %v850_v61, -inf }
 0x435   :  { %v849_v6 = vmul.f32 0.25, %v837_v4  ;;  %858 = vmax.xlane.f32.xlu1 %v857_v5  ;;  %v851_v8 = vsel %vm673_vm6, %v848_v63, -inf }
 0x436   :  { %852 = vmax.xlane.f32.xlu0 %v851_v8 }
 0x437   :  { %v854_v9 = vsel %vm673_vm6, %v849_v6, -inf }
 0x43a   :  { %855 = vmax.xlane.f32.xlu0 %v854_v9 }
 0x451   :  { %v676_v10 = vpop.xlane.xlu0 %675 }
 0x452   :  { %v684_v14 = vsub.f32 %v670_v52, %v676_v10 }
 0x453   :  { %v679_v13 = vpop.xlane.xlu1 %678 }
 0x454   :  { %v685_v15 = vsub.f32 %v671_v56, %v679_v13  ;;  %v687_v24 = vmul.f32 1.442695, %v684_v14 }
 0x455   :  { %v683_v18 = vpop.xlane.xlu0 %682 }
 0x456   :  { %v689_v22 = vmul.f32 1.442695, %v685_v15  ;;  %v686_v23 = vsub.f32 %v672_v55, %v683_v18 }
 0x458   :  { %6425 = vpow2.f32 %v689_v22  ;;  %v691_v26 = vmul.f32 1.442695, %v686_v23 }
 0x45a   :  { %6427 = vpow2.f32 %v691_v26 }
 0x45b   :  { %6429 = vpow2.f32 %v687_v24 }
 0x462   :  { %v6426_v30 = vpop.eup %6425 }
 0x463   :  { %v696_v31 = vsel %vm673_vm6, %v6426_v30, 0.0 }
 0x464   :  { %v6428_v32 = vpop.eup %6427  ;;  %697 = vadd.xlane.f32.xlu1 %v696_v31 }
 0x465   :  { %v699_v34 = vsel %vm680_vm7, %v6428_v32, 0.0  ;;  %v6430_v35 = vpop.eup %6429 }
 0x466   :  { %700 = vadd.xlane.f32.xlu0 %v699_v34  ;;  %v693_v36 = vsel %vm673_vm6, %v6430_v35, 0.0 }
 0x46a   :  { %694 = vadd.xlane.f32.xlu0 %v693_v36 }
 0x4c2   :  { %v859_v37 = vpop.xlane.xlu1 %858 }
 0x4c3   :  { %v862_v39 = vsub.f32 %v850_v61, %v859_v37  ;;  %v853_v41 = vpop.xlane.xlu0 %852 }
 0x4c4   :  { %v860_v42 = vsub.f32 %v848_v63, %v853_v41 }
 0x4c5   :  { %v867_v45 = vmul.f32 1.442695, %v862_v39 }
 0x4c6   :  { %v863_v46 = vmul.f32 1.442695, %v860_v42 }
 0x4c7   :  { %6431 = vpow2.f32 %v867_v45  ;;  %v856_v47 = vpop.xlane.xlu0 %855 }
 0x4c8   :  { %v861_v48 = vsub.f32 %v849_v6, %v856_v47  ;;  %6433 = vpow2.f32 %v863_v46 }
 0x4ca   :  { %v865_v51 = vmul.f32 1.442695, %v861_v48 }
 0x4cc   :  { %6435 = vpow2.f32 %v865_v51 }
 0x4d1   :  { %v6432_v52 = vpop.eup %6431 }
 0x4d2   :  { %v875_v53 = vsel %vm680_vm7, %v6432_v52, 0.0  ;;  %v6434_v54 = vpop.eup %6433 }
 0x4d3   :  { %876 = vadd.xlane.f32.xlu1 %v875_v53  ;;  %v869_v56 = vsel %vm673_vm6, %v6434_v54, 0.0 }
 0x4d6   :  { %v6436_v55 = vpop.eup %6435 }
 0x4d7   :  { %870 = vadd.xlane.f32.xlu1 %v869_v56  ;;  %v872_v57 = vsel %vm673_vm6, %v6436_v55, 0.0 }
 0x4d8   :  { %873 = vadd.xlane.f32.xlu0 %v872_v57 }
 0x4e8   :  { %890 = vrot.lane.b32.xlu1 %v7229_v12, %s6849_s26 }
 0x4ec   :  { %971 = vrot.lane.b32.xlu1 %v7185_v21, %s6851_s28 }
 0x4ee   :  { %888 = vrot.lane.b32.xlu0 %v7223_v7, %s6849_s26 }
 0x4f0   :  { %973 = vrot.lane.b32.xlu1 %v7195_v28, %s6851_s28 }
 0x4f1   :  { %v698_v58 = vpop.xlane.xlu1 %697 }
 0x4f2   :  { %967 = vrot.lane.b32.xlu0 %v7183_v20, %s6851_s28 }
 0x4f3   :  { %v701_v59 = vpop.xlane.xlu0 %700 }
 0x4f4   :  { %969 = vrot.lane.b32.xlu1 %v7205_v44, %s6851_s28  ;;  %6437 = vrcp.f32 %v701_v59 }
 0x4f5   :  { %6439 = vrcp.f32 %v698_v58 }
 0x4f7   :  { %v695_v60 = vpop.xlane.xlu0 %694 }
 0x4f8   :  { %6441 = vrcp.f32 %v695_v60 }
 0x4fe   :  { %v6438_v61 = vpop.eup %6437 }
 0x4ff   :  { %v6440_v62 = vpop.eup %6439  ;;  %v707_v1 = vmul.f32 %v6438_v61, %v6428_v32 }
 0x500   :  { %v706_v5 = vmul.f32 %v6440_v62, %v6426_v30 }
 0x501   :  { %v709_v8 = vpack.c.bf16 %v707_v1, %v707_v1 }
 0x502   :  { %v6442_v63 = vpop.eup %6441 }
 0x503   :  { %v705_v4 = vmul.f32 %v6442_v63, %v6430_v35 }
 0x505   :  { %v708_v6 = vpack.c.bf16 %v706_v5, %v705_v4 }
 0x507   :  { %5803 = vmatprep.mubr.msk.bf16.mxu1 %vm673_vm6, %v708_v6 }
 0x508   :  { %5804 = vmatmul.mubr.msk.bf16.vlgmr.msra.gmra.mrb[24].mxu1 %vm673_vm6, %v709_v8 }
 0x560   :  { %v877_v9 = vpop.xlane.xlu1 %876 }
 0x561   :  { %6443 = vrcp.f32 %v877_v9 }
 0x564   :  { %v871_v10 = vpop.xlane.xlu1 %870 }
 0x565   :  { %6445 = vrcp.f32 %v871_v10  ;;  %v874_v13 = vpop.xlane.xlu0 %873 }
 0x566   :  { %6447 = vrcp.f32 %v874_v13 }
 0x568   :  { %v891_v14 = vpop.permute.xlu1 %890 }
 0x569   :  { %v900_v15 = vand.u32 %v891_v14, %v7227_v11  ;;  %v889_v18 = vpop.permute.xlu0 %888 }
 0x56a   :  { %5815 = vmatprep.subr.bf16.mxu1 %v889_v18 }
 0x56b   :  { %5816 = vmatpush3.bf16.msra.mxu1 %v889_v18  ;;  %v6444_v22 = vpop.eup %6443 }
 0x56c   :  { %5817 = vmatprep.subr.bf16.mxu1 %v900_v15  ;;  %v972_v24 = vpop.permute.xlu1 %971  ;;  %v883_v31 = vmul.f32 %v6444_v22, %v6432_v52 }
 0x56d   :  { %v968_v36 = vpop.permute.xlu0 %967  ;;  %v982_v37 = vsel %vm609_vm3, %v972_v24, 0 }
 0x56e   :  { %v885_v35 = vpack.c.bf16 %v883_v31, %v883_v31 }
 0x56f   :  { %v6446_v23 = vpop.eup %6445  ;;  %5818 = vmatpush3.bf16.msra.mxu1 %v900_v15 }
 0x570   :  { %v6448_v26 = vpop.eup %6447  ;;  %6291 = vmatprep.subr.msk.bf16.mxu1 %vm609_vm3, %v972_v24  ;;  %v881_v30 = vmul.f32 %v6446_v23, %v6434_v54  ;;  %v974_v39 = vpop.permute.xlu1 %973 }
 0x571   :  { %v882_v32 = vmul.f32 %v6448_v26, %v6436_v55  ;;  %v985_v41 = vsel %vm609_vm3, %v974_v39, 0 }
 0x573   :  { %v884_v34 = vpack.c.bf16 %v882_v32, %v881_v30 }
 0x574   :  { %v970_v42 = vpop.permute.xlu1 %969 }
 0x575   :  { %5819 = vmatprep.mubr.msk.bf16.mxu1 %vm673_vm6, %v884_v34 }
 0x576   :  { %5820 = vmatmul.mubr.msk.bf16.vlgmr.msra.gmra.mrb[28].mxu1 %vm673_vm6, %v885_v35 }
 0x577   :  { %5827 = vmatprep.mubr.msk.bf16.mxu1 %vm609_vm3, %v968_v36 }
 0x578   :  { %5824 = vmatpush3.bf16.xpose.msra.mxu1 %v982_v37 }
 0x579   :  { %6292 = vmatprep.subr.msk.bf16.mxu1 %vm609_vm3, %v974_v39 }
 0x580   :  { %5826 = vmatpush3.bf16.xpose.msra.mxu1 %v985_v41 }
 0x587   :  { %5828 = vmatmul.mubr.msk.bf16.vlgmr.msra.gmra.mrb[32].mxu1 %vm609_vm3, %v970_v42 }
 0x5db   :  { %v5805_v45 = vpop.f32.mrb[24].mxu1 }
 0x5dc   :  { %775 = vst.msk [vmem:[#allocation2 + $0x10] sm:$0x1] %vm774_vm8, %v5805_v45  ;;  %v758_v46 = vpop.f32.mrb[25].mxu1 }
 0x5dd   :  { %772 = vst.msk [vmem:[#allocation2] sm:$0xff] %vm609_vm3, %v758_v46  ;;  %v5806_v47 = vpop.f32.mrb[26].mxu1 }
 0x5de   :  { %v761_v48 = vpop.f32.mrb[27].mxu1 }
 0x5df   :  { %773 = vst.msk [vmem:[#allocation2 + $0x8] sm:$0xff] %vm609_vm3, %v761_v48 }
 0x649   :  { %v7283_v51 = vpop.f32.mrb[28].mxu1 }
 0x64a   :  { %v7285_v52 = vpop.f32.mrb[29].mxu1 }
 0x64b   :  { %v5822_v53 = vpop.f32.mrb[30].mxu1 }
 0x64c   :  { %v7287_v54 = vpop.f32.mrb[31].mxu1 }
 0x65a   :  { %v5829_v55 = vpop.f32.mrb[32].mxu1 }
 0x65b   :  { %v1021_v56 = vpop.f32.mrb[33].mxu1  ;;  %v1037_v60 = vmul.f32 0.25, %v5829_v55 }
 0x65c   :  { %v1035_v57 = vmul.f32 0.25, %v1021_v56  ;;  %v5830_v58 = vpop.f32.mrb[34].mxu1  ;;  %v7317_v56 = vshrl.u32 %v7233_v27, 16 }
 0x65d   :  { %v1024_v59 = vpop.f32.mrb[35].mxu1  ;;  %v1044_v1 = vsel %vm680_vm7, %v1037_v60, -inf }
 0x65e   :  { %v1036_v61 = vmul.f32 0.25, %v1024_v59  ;;  %v1038_v62 = vsel %vm673_vm6, %v1035_v57, -inf  ;;  %v1492_v58 = vand.u32 %v7317_v56, %v7227_v11 }
 0x65f   :  { %1039 = vmax.xlane.f32.xlu0 %v1038_v62 }
 0x660   :  { %v1041_v63 = vsel %vm673_vm6, %v1036_v61, -inf }
 0x661   :  { %1042 = vmax.xlane.f32.xlu1 %v1041_v63 }
 0x663   :  { %1045 = vmax.xlane.f32.xlu0 %v1044_v1 }
 0x6ec   :  { %v1040_v4 = vpop.xlane.xlu0 %1039 }
 0x6ed   :  { %v1047_v5 = vsub.f32 %v1035_v57, %v1040_v4 }
 0x6ee   :  { %v1043_v6 = vpop.xlane.xlu1 %1042 }
 0x6ef   :  { %v1050_v8 = vmul.f32 1.442695, %v1047_v5  ;;  %v1048_v9 = vsub.f32 %v1036_v61, %v1043_v6 }
 0x6f0   :  { %v1046_v10 = vpop.xlane.xlu0 %1045 }
 0x6f1   :  { %6449 = vpow2.f32 %v1050_v8  ;;  %v1052_v13 = vmul.f32 1.442695, %v1048_v9  ;;  %v1049_v14 = vsub.f32 %v1037_v60, %v1046_v10 }
 0x6f3   :  { %6451 = vpow2.f32 %v1052_v13  ;;  %v1054_v15 = vmul.f32 1.442695, %v1049_v14 }
 0x6f5   :  { %6453 = vpow2.f32 %v1054_v15 }
 0x6fb   :  { %v6450_v18 = vpop.eup %6449 }
 0x6fc   :  { %v1056_v22 = vsel %vm673_vm6, %v6450_v18, 0.0 }
 0x6fd   :  { %v6452_v23 = vpop.eup %6451  ;;  %1057 = vadd.xlane.f32.xlu0 %v1056_v22 }
 0x6fe   :  { %v1059_v30 = vsel %vm673_vm6, %v6452_v23, 0.0 }
 0x6ff   :  { %v6454_v24 = vpop.eup %6453 }
 0x700   :  { %v1062_v26 = vsel %vm680_vm7, %v6454_v24, 0.0 }
 0x701   :  { %1063 = vadd.xlane.f32.xlu1 %v1062_v26  ;;  %1060 = vadd.xlane.f32.xlu0 %v1059_v30 }
 0x712   :  { %1075 = vrot.lane.b32.xlu1 %v7229_v12, %s6851_s28 }
 0x716   :  { %1156 = vrot.lane.b32.xlu1 %v7185_v21, %s6852_s2 }
 0x717   :  { %1073 = vrot.lane.b32.xlu0 %v7223_v7, %s6851_s28 }
 0x71a   :  { %1158 = vrot.lane.b32.xlu1 %v7195_v28, %s6852_s2 }
 0x71b   :  { %1152 = vrot.lane.b32.xlu0 %v7183_v20, %s6852_s2 }
 0x71e   :  { %1154 = vrot.lane.b32.xlu1 %v7205_v44, %s6852_s2 }
 0x78a   :  { %v1058_v31 = vpop.xlane.xlu0 %1057 }
 0x78b   :  { %6455 = vrcp.f32 %v1058_v31 }
 0x78e   :  { %v1061_v32 = vpop.xlane.xlu0 %1060  ;;  %v1064_v34 = vpop.xlane.xlu1 %1063 }
 0x78f   :  { %6457 = vrcp.f32 %v1061_v32 }
 0x790   :  { %6459 = vrcp.f32 %v1064_v34 }
 0x792   :  { %v1074_v35 = vpop.permute.xlu0 %1073  ;;  %v1076_v21 = vpop.permute.xlu1 %1075 }
 0x793   :  { %v1085_v36 = vand.u32 %v1076_v21, %v7227_v11  ;;  %5831 = vmatprep.subr.bf16.mxu0 %v1074_v35 }
 0x794   :  { %5832 = vmatpush3.bf16.msra.mxu0 %v1074_v35 }
 0x795   :  { %5833 = vmatprep.subr.bf16.mxu0 %v1085_v36  ;;  %v6456_v28 = vpop.eup %6455 }
 0x796   :  { %v1157_v37 = vpop.permute.xlu1 %1156  ;;  %v1068_v39 = vmul.f32 %v6456_v28, %v6450_v18  ;;  %v1153_v47 = vpop.permute.xlu0 %1152 }
 0x797   :  { %v1167_v48 = vsel %vm609_vm3, %v1157_v37, 0 }
 0x798   :  { %5834 = vmatpush3.bf16.msra.mxu0 %v1085_v36 }
 0x799   :  { %v6458_v20 = vpop.eup %6457  ;;  %6293 = vmatprep.subr.msk.bf16.mxu0 %vm609_vm3, %v1157_v37 }
 0x79a   :  { %v6460_v44 = vpop.eup %6459  ;;  %v1069_v41 = vmul.f32 %v6458_v20, %v6452_v23  ;;  %v1159_v53 = vpop.permute.xlu1 %1158 }
 0x79b   :  { %v1070_v42 = vmul.f32 %v6460_v44, %v6454_v24  ;;  %v1170_v55 = vsel %vm609_vm3, %v1159_v53, 0 }
 0x79c   :  { %v1071_v45 = vpack.c.bf16 %v1069_v41, %v1068_v39 }
 0x79d   :  { %v1072_v46 = vpack.c.bf16 %v1070_v42, %v1070_v42 }
 0x79e   :  { %5835 = vmatprep.mubr.msk.bf16.mxu0 %vm673_vm6, %v1071_v45  ;;  %v1155_v57 = vpop.permute.xlu1 %1154 }
 0x79f   :  { %5836 = vmatmul.mubr.msk.bf16.vlgmr.msra.gmra.mrb[32].mxu0 %vm673_vm6, %v1072_v46 }
 0x7a0   :  { %5843 = vmatprep.mubr.msk.bf16.mxu0 %vm609_vm3, %v1153_v47 }
 0x7a1   :  { %5840 = vmatpush3.bf16.xpose.msra.mxu0 %v1167_v48 }
 0x7a2   :  { %6294 = vmatprep.subr.msk.bf16.mxu0 %vm609_vm3, %v1159_v53 }
 0x7a9   :  { %5842 = vmatpush3.bf16.xpose.msra.mxu0 %v1170_v55 }
 0x7aa   :  { %5863 = vmatprep.subr.bf16.mxu0 %v7237_v38 }
 0x7b0   :  { %5844 = vmatmul.mubr.msk.bf16.vlgmr.msra.gmra.mrb[36].mxu0 %vm609_vm3, %v1155_v57  ;;  %v7345_v57 = vshrl.u32 %v7209_v50, 16 }
 0x7b1   :  { %5864 = vmatpush3.bf16.msra.mxu0 %v7237_v38 }
 0x7b2   :  { %5865 = vmatprep.subr.bf16.mxu0 %v1492_v58 }
 0x7b5   :  { %5866 = vmatpush3.bf16.msra.mxu0 %v1492_v58  ;;  %v1377_v58 = vsel %vm609_vm3, %v7218_v2, 0 }
 0x872   :  { %v7323_v59 = vpop.f32.mrb[32].mxu0 }
 0x873   :  { %v7325_v60 = vpop.f32.mrb[33].mxu0 }
 0x874   :  { %v5838_v61 = vpop.f32.mrb[34].mxu0 }
 0x875   :  { %v7327_v62 = vpop.f32.mrb[35].mxu0  ;;  %v1380_v61 = vsel %vm609_vm3, %v7345_v57, 0 }
 0x883   :  { %v5845_v63 = vpop.f32.mrb[36].mxu0 }
 0x884   :  { %v1206_v27 = vpop.f32.mrb[37].mxu0  ;;  %v1222_v6 = vmul.f32 0.25, %v5845_v63  ;;  %v7356_v63 = vshrl.u32 %v7207_v49, 16 }
 0x885   :  { %v1220_v1 = vmul.f32 0.25, %v1206_v27  ;;  %v5846_v4 = vpop.f32.mrb[38].mxu0 }
 0x886   :  { %v1209_v5 = vpop.f32.mrb[39].mxu0  ;;  %v1229_v13 = vsel %vm680_vm7, %v1222_v6, -inf }
 0x887   :  { %v1221_v8 = vmul.f32 0.25, %v1209_v5  ;;  %v1223_v9 = vsel %vm673_vm6, %v1220_v1, -inf }
 0x888   :  { %1224 = vmax.xlane.f32.xlu0 %v1223_v9 }
 0x889   :  { %v1226_v10 = vsel %vm673_vm6, %v1221_v8, -inf }
 0x88a   :  { %1227 = vmax.xlane.f32.xlu1 %v1226_v10 }
 0x88c   :  { %1230 = vmax.xlane.f32.xlu0 %v1229_v13 }
 0x915   :  { %v1225_v14 = vpop.xlane.xlu0 %1224 }
 0x916   :  { %v1232_v15 = vsub.f32 %v1220_v1, %v1225_v14 }
 0x917   :  { %v1228_v18 = vpop.xlane.xlu1 %1227 }
 0x918   :  { %v1235_v22 = vmul.f32 1.442695, %v1232_v15  ;;  %v1233_v23 = vsub.f32 %v1221_v8, %v1228_v18 }
 0x919   :  { %v1231_v24 = vpop.xlane.xlu0 %1230 }
 0x91a   :  { %6461 = vpow2.f32 %v1235_v22  ;;  %v1237_v26 = vmul.f32 1.442695, %v1233_v23  ;;  %v1234_v30 = vsub.f32 %v1222_v6, %v1231_v24 }
 0x91c   :  { %6463 = vpow2.f32 %v1237_v26  ;;  %v1239_v31 = vmul.f32 1.442695, %v1234_v30 }
 0x91e   :  { %6465 = vpow2.f32 %v1239_v31 }
 0x924   :  { %v6462_v32 = vpop.eup %6461 }
 0x925   :  { %v1241_v34 = vsel %vm673_vm6, %v6462_v32, 0.0 }
 0x926   :  { %v6464_v35 = vpop.eup %6463  ;;  %1242 = vadd.xlane.f32.xlu0 %v1241_v34 }
 0x927   :  { %v1244_v28 = vsel %vm673_vm6, %v6464_v35, 0.0 }
 0x928   :  { %v6466_v21 = vpop.eup %6465 }
 0x929   :  { %v1247_v36 = vsel %vm680_vm7, %v6466_v21, 0.0 }
 0x92a   :  { %1248 = vadd.xlane.f32.xlu1 %v1247_v36  ;;  %1245 = vadd.xlane.f32.xlu0 %v1244_v28 }
 0x93b   :  { %1260 = vrot.lane.b32.xlu1 %v7229_v12, %s6852_s2 }
 0x940   :  { %1258 = vrot.lane.b32.xlu0 %v7223_v7, %s6852_s2 }
 0x9b3   :  { %v1243_v37 = vpop.xlane.xlu0 %1242 }
 0x9b4   :  { %6467 = vrcp.f32 %v1243_v37 }
 0x9b7   :  { %v1246_v20 = vpop.xlane.xlu0 %1245  ;;  %v1249_v44 = vpop.xlane.xlu1 %1248 }
 0x9b8   :  { %6469 = vrcp.f32 %v1246_v20 }
 0x9b9   :  { %6471 = vrcp.f32 %v1249_v44 }
 0x9bb   :  { %v1259_v39 = vpop.permute.xlu0 %1258  ;;  %v1261_v41 = vpop.permute.xlu1 %1260 }
 0x9bc   :  { %v1270_v42 = vand.u32 %v1261_v41, %v7227_v11  ;;  %5847 = vmatprep.subr.bf16.mxu1 %v1259_v39 }
 0x9bd   :  { %5848 = vmatpush3.bf16.msra.mxu1 %v1259_v39 }
 0x9be   :  { %5849 = vmatprep.subr.bf16.mxu1 %v1270_v42  ;;  %v6468_v45 = vpop.eup %6467 }
 0x9bf   :  { %v1253_v12 = vmul.f32 %v6468_v45, %v6462_v32 }
 0x9c1   :  { %5850 = vmatpush3.bf16.msra.mxu1 %v1270_v42 }
 0x9c2   :  { %v6470_v46 = vpop.eup %6469  ;;  %6295 = vmatprep.subr.msk.bf16.mxu1 %vm609_vm3, %v7218_v2 }
 0x9c3   :  { %v6472_v7 = vpop.eup %6471  ;;  %v1254_v47 = vmul.f32 %v6470_v46, %v6464_v35 }
 0x9c4   :  { %v1255_v48 = vmul.f32 %v6472_v7, %v6466_v21 }
 0x9c5   :  { %v1256_v53 = vpack.c.bf16 %v1254_v47, %v1253_v12 }
 0x9c6   :  { %v1257_v55 = vpack.c.bf16 %v1255_v48, %v1255_v48 }
 0x9c7   :  { %5851 = vmatprep.mubr.msk.bf16.mxu1 %vm673_vm6, %v1256_v53 }
 0x9c8   :  { %5852 = vmatmul.mubr.msk.bf16.vlgmr.msra.gmra.mrb[36].mxu1 %vm673_vm6, %v1257_v55 }
 0x9c9   :  { %5859 = vmatprep.mubr.msk.bf16.mxu1 %vm609_vm3, %v7221_v3 }
 0x9ca   :  { %5856 = vmatpush3.bf16.xpose.msra.mxu1 %v1377_v58 }
 0x9cb   :  { %6296 = vmatprep.subr.msk.bf16.mxu1 %vm609_vm3, %v7345_v57 }
 0x9d2   :  { %5858 = vmatpush3.bf16.xpose.msra.mxu1 %v1380_v61 }
 0x9d9   :  { %5860 = vmatmul.mubr.msk.bf16.vlgmr.msra.gmra.mrb[40].mxu1 %vm609_vm3, %v7356_v63 }
 0xa9b   :  { %v7360_v50 = vpop.f32.mrb[36].mxu1 }
 0xa9c   :  { %v7362_v27 = vpop.f32.mrb[37].mxu1 }
 0xa9d   :  { %v5854_v1 = vpop.f32.mrb[38].mxu1 }
 0xa9e   :  { %v7364_v4 = vpop.f32.mrb[39].mxu1 }
 0xaac   :  { %v5861_v5 = vpop.f32.mrb[40].mxu1 }
 0xaad   :  { %v1416_v6 = vpop.f32.mrb[41].mxu1  ;;  %v1432_v49 = vmul.f32 0.25, %v5861_v5 }
 0xaae   :  { %v1430_v8 = vmul.f32 0.25, %v1416_v6  ;;  %v5862_v9 = vpop.f32.mrb[42].mxu1 }
 0xaaf   :  { %v1419_v10 = vpop.f32.mrb[43].mxu1  ;;  %v1439_v18 = vsel %vm680_vm7, %v1432_v49, -inf }
 0xab0   :  { %v1431_v13 = vmul.f32 0.25, %v1419_v10  ;;  %v1433_v14 = vsel %vm673_vm6, %v1430_v8, -inf }
 0xab1   :  { %1434 = vmax.xlane.f32.xlu1 %v1433_v14 }
 0xab2   :  { %v1436_v15 = vsel %vm673_vm6, %v1431_v13, -inf }
 0xab3   :  { %1437 = vmax.xlane.f32.xlu0 %v1436_v15 }
 0xab7   :  { %1440 = vmax.xlane.f32.xlu0 %v1439_v18 }
 0xb3e   :  { %v1435_v22 = vpop.xlane.xlu1 %1434 }
 0xb3f   :  { %v1442_v23 = vsub.f32 %v1430_v8, %v1435_v22 }
 0xb40   :  { %v1438_v24 = vpop.xlane.xlu0 %1437 }
 0xb41   :  { %v1445_v26 = vmul.f32 1.442695, %v1442_v23  ;;  %v1443_v30 = vsub.f32 %v1431_v13, %v1438_v24 }
 0xb43   :  { %6473 = vpow2.f32 %v1445_v26  ;;  %v1447_v31 = vmul.f32 1.442695, %v1443_v30 }
 0xb44   :  { %v1441_v32 = vpop.xlane.xlu0 %1440 }
 0xb45   :  { %6475 = vpow2.f32 %v1447_v31  ;;  %v1444_v34 = vsub.f32 %v1432_v49, %v1441_v32 }
 0xb47   :  { %v1449_v35 = vmul.f32 1.442695, %v1444_v34 }
 0xb49   :  { %6477 = vpow2.f32 %v1449_v35 }
 0xb4d   :  { %v6474_v21 = vpop.eup %6473 }
 0xb4e   :  { %v1451_v36 = vsel %vm673_vm6, %v6474_v21, 0.0 }
 0xb4f   :  { %v6476_v28 = vpop.eup %6475  ;;  %1452 = vadd.xlane.f32.xlu1 %v1451_v36 }
 0xb50   :  { %v1454_v37 = vsel %vm673_vm6, %v6476_v28, 0.0 }
 0xb51   :  { %1455 = vadd.xlane.f32.xlu0 %v1454_v37 }
 0xb53   :  { %v6478_v20 = vpop.eup %6477 }
 0xb54   :  { %v1457_v44 = vsel %vm680_vm7, %v6478_v20, 0.0 }
 0xb55   :  { %1458 = vadd.xlane.f32.xlu1 %v1457_v44 }
 0xb66   :  { %1551 = vrot.lane.b32.xlu1 %v7345_v57, %s6849_s26 }
 0xb67   :  { %1549 = vrot.lane.b32.xlu0 %v7218_v2, %s6849_s26 }
 0xb6a   :  { %1545 = vrot.lane.b32.xlu1 %v7221_v3, %s6849_s26 }
 0xb6e   :  { %1547 = vrot.lane.b32.xlu1 %v7356_v63, %s6849_s26 }
 0xbdc   :  { %v1453_v39 = vpop.xlane.xlu1 %1452 }
 0xbdd   :  { %6479 = vrcp.f32 %v1453_v39 }
 0xbde   :  { %v1456_v41 = vpop.xlane.xlu0 %1455 }
 0xbdf   :  { %6481 = vrcp.f32 %v1456_v41 }
 0xbe2   :  { %v1459_v42 = vpop.xlane.xlu1 %1458  ;;  %v1550_v45 = vpop.permute.xlu0 %1549 }
 0xbe3   :  { %6483 = vrcp.f32 %v1459_v42  ;;  %6297 = vmatprep.subr.msk.bf16.mxu0 %vm609_vm3, %v1550_v45  ;;  %v1560_v5 = vsel %vm609_vm3, %v1550_v45, 0 }
 0xbe6   :  { %v1552_v48 = vpop.permute.xlu1 %1551 }
 0xbe7   :  { %v6480_v46 = vpop.eup %6479  ;;  %v1563_v6 = vsel %vm609_vm3, %v1552_v48, 0 }
 0xbe8   :  { %v1463_v12 = vmul.f32 %v6480_v46, %v6474_v21 }
 0xbe9   :  { %v6482_v7 = vpop.eup %6481 }
 0xbea   :  { %v1464_v47 = vmul.f32 %v6482_v7, %v6476_v28  ;;  %v1546_v1 = vpop.permute.xlu1 %1545 }
 0xbec   :  { %v1466_v53 = vpack.c.bf16 %v1464_v47, %v1463_v12 }
 0xbed   :  { %v6484_v55 = vpop.eup %6483 }
 0xbee   :  { %5867 = vmatprep.mubr.msk.bf16.mxu0 %vm673_vm6, %v1466_v53  ;;  %v1465_v58 = vmul.f32 %v6484_v55, %v6478_v20  ;;  %v1548_v8 = vpop.permute.xlu1 %1547 }
 0xbf0   :  { %v1467_v61 = vpack.c.bf16 %v1465_v58, %v1465_v58 }
 0xbf2   :  { %5868 = vmatmul.mubr.msk.bf16.vlgmr.msra.gmra.mrb[40].mxu0 %vm673_vm6, %v1467_v61 }
 0xbf3   :  { %5872 = vmatpush3.bf16.xpose.msra.mxu0 %v1560_v5  ;;  %5875 = vmatprep.mubr.msk.bf16.mxu0 %vm609_vm3, %v1546_v1 }
 0xbf4   :  { %6298 = vmatprep.subr.msk.bf16.mxu0 %vm609_vm3, %v1552_v48 }
 0xbfb   :  { %5874 = vmatpush3.bf16.xpose.msra.mxu0 %v1563_v6 }
 0xc02   :  { %5876 = vmatmul.mubr.msk.bf16.vlgmr.msra.gmra.mrb[44].mxu0 %vm609_vm3, %v1548_v8 }
 0xcc5   :  { %v5869_v9 = vpop.f32.mrb[40].mxu0 }
 0xcc6   :  { %1544 = vst.msk [vmem:[#allocation2 + $0x21] sm:$0x1] %vm774_vm8, %v5869_v9  ;;  %v1528_v10 = vpop.f32.mrb[41].mxu0 }
 0xcc7   :  { %1542 = vst.msk [vmem:[#allocation2 + $0x11] sm:$0xff] %vm609_vm3, %v1528_v10  ;;  %v5870_v13 = vpop.f32.mrb[42].mxu0 }
 0xcc8   :  { %v1531_v14 = vpop.f32.mrb[43].mxu0 }
 0xcc9   :  { %1543 = vst.msk [vmem:[#allocation2 + $0x19] sm:$0xff] %vm609_vm3, %v1531_v14 }
 0xcd5   :  { %v5877_v49 = vpop.f32.mrb[44].mxu0 }
 0xcd6   :  { %v1599_v15 = vpop.f32.mrb[45].mxu0  ;;  %v1615_v24 = vmul.f32 0.25, %v5877_v49 }
 0xcd7   :  { %v1613_v18 = vmul.f32 0.25, %v1599_v15  ;;  %v5878_v22 = vpop.f32.mrb[46].mxu0 }
 0xcd8   :  { %v1602_v23 = vpop.f32.mrb[47].mxu0  ;;  %v1622_v32 = vsel %vm680_vm7, %v1615_v24, -inf }
 0xcd9   :  { %v1614_v26 = vmul.f32 0.25, %v1602_v23  ;;  %v1616_v30 = vsel %vm673_vm6, %v1613_v18, -inf }
 0xcda   :  { %1617 = vmax.xlane.f32.xlu0 %v1616_v30 }
 0xcdb   :  { %v1619_v31 = vsel %vm673_vm6, %v1614_v26, -inf }
 0xcdc   :  { %1620 = vmax.xlane.f32.xlu1 %v1619_v31 }
 0xcde   :  { %1623 = vmax.xlane.f32.xlu0 %v1622_v32 }
 0xd67   :  { %v1618_v34 = vpop.xlane.xlu0 %1617 }
 0xd68   :  { %v1625_v35 = vsub.f32 %v1613_v18, %v1618_v34 }
 0xd69   :  { %v1621_v21 = vpop.xlane.xlu1 %1620 }
 0xd6a   :  { %v1628_v36 = vmul.f32 1.442695, %v1625_v35  ;;  %v1626_v28 = vsub.f32 %v1614_v26, %v1621_v21 }
 0xd6b   :  { %v1624_v37 = vpop.xlane.xlu0 %1623 }
 0xd6c   :  { %6485 = vpow2.f32 %v1628_v36  ;;  %v1630_v20 = vmul.f32 1.442695, %v1626_v28  ;;  %v1627_v44 = vsub.f32 %v1615_v24, %v1624_v37 }
 0xd6e   :  { %6487 = vpow2.f32 %v1630_v20  ;;  %v1632_v39 = vmul.f32 1.442695, %v1627_v44 }
 0xd70   :  { %6489 = vpow2.f32 %v1632_v39 }
 0xd76   :  { %v6486_v41 = vpop.eup %6485 }
 0xd77   :  { %v1634_v42 = vsel %vm673_vm6, %v6486_v41, 0.0 }
 0xd78   :  { %v6488_v45 = vpop.eup %6487  ;;  %1635 = vadd.xlane.f32.xlu0 %v1634_v42 }
 0xd79   :  { %v1637_v12 = vsel %vm673_vm6, %v6488_v45, 0.0 }
 0xd7a   :  { %v6490_v46 = vpop.eup %6489 }
 0xd7b   :  { %v1640_v7 = vsel %vm680_vm7, %v6490_v46, 0.0 }
 0xd7c   :  { %1641 = vadd.xlane.f32.xlu1 %v1640_v7  ;;  %1638 = vadd.xlane.f32.xlu0 %v1637_v12 }
 0xd8d   :  { %1653 = vrot.lane.b32.xlu1 %v7317_v56, %s6849_s26 }
 0xd91   :  { %1732 = vrot.lane.b32.xlu1 %v7218_v2, %s6851_s28 }
 0xd92   :  { %1651 = vrot.lane.b32.xlu0 %v7237_v38, %s6849_s26 }
 0xd95   :  { %1734 = vrot.lane.b32.xlu1 %v7345_v57, %s6851_s28 }
 0xd96   :  { %1728 = vrot.lane.b32.xlu0 %v7221_v3, %s6851_s28 }
 0xd99   :  { %1730 = vrot.lane.b32.xlu1 %v7356_v63, %s6851_s28 }
 0xe05   :  { %v1636_v47 = vpop.xlane.xlu0 %1635 }
 0xe06   :  { %6491 = vrcp.f32 %v1636_v47 }
 0xe09   :  { %v1639_v48 = vpop.xlane.xlu0 %1638  ;;  %v1642_v53 = vpop.xlane.xlu1 %1641 }
 0xe0a   :  { %6493 = vrcp.f32 %v1639_v48 }
 0xe0b   :  { %6495 = vrcp.f32 %v1642_v53 }
 0xe0d   :  { %v1652_v55 = vpop.permute.xlu0 %1651  ;;  %v1654_v58 = vpop.permute.xlu1 %1653 }
 0xe0e   :  { %v1663_v61 = vand.u32 %v1654_v58, %v7227_v11  ;;  %5879 = vmatprep.subr.bf16.mxu1 %v1652_v55 }
 0xe0f   :  { %5880 = vmatpush3.bf16.msra.mxu1 %v1652_v55 }
 0xe10   :  { %5881 = vmatprep.subr.bf16.mxu1 %v1663_v61  ;;  %v6492_v1 = vpop.eup %6491 }
 0xe11   :  { %v1733_v5 = vpop.permute.xlu1 %1732  ;;  %v1646_v9 = vmul.f32 %v6492_v1, %v6486_v41  ;;  %v1729_v15 = vpop.permute.xlu0 %1728 }
 0xe12   :  { %v1743_v18 = vsel %vm609_vm3, %v1733_v5, 0 }
 0xe13   :  { %5882 = vmatpush3.bf16.msra.mxu1 %v1663_v61 }
 0xe14   :  { %v6494_v6 = vpop.eup %6493  ;;  %6299 = vmatprep.subr.msk.bf16.mxu1 %vm609_vm3, %v1733_v5 }
 0xe15   :  { %v6496_v8 = vpop.eup %6495  ;;  %v1647_v10 = vmul.f32 %v6494_v6, %v6488_v45  ;;  %v1735_v22 = vpop.permute.xlu1 %1734 }
 0xe16   :  { %v1648_v13 = vmul.f32 %v6496_v8, %v6490_v46  ;;  %v1746_v23 = vsel %vm609_vm3, %v1735_v22, 0 }
 0xe17   :  { %v1649_v14 = vpack.c.bf16 %v1647_v10, %v1646_v9 }
 0xe18   :  { %v1650_v49 = vpack.c.bf16 %v1648_v13, %v1648_v13 }
 0xe19   :  { %5883 = vmatprep.mubr.msk.bf16.mxu1 %vm673_vm6, %v1649_v14  ;;  %v1731_v24 = vpop.permute.xlu1 %1730 }
 0xe1a   :  { %5884 = vmatmul.mubr.msk.bf16.vlgmr.msra.gmra.mrb[44].mxu1 %vm673_vm6, %v1650_v49 }
 0xe1b   :  { %5891 = vmatprep.mubr.msk.bf16.mxu1 %vm609_vm3, %v1729_v15 }
 0xe1c   :  { %5888 = vmatpush3.bf16.xpose.msra.mxu1 %v1743_v18 }
 0xe1d   :  { %6300 = vmatprep.subr.msk.bf16.mxu1 %vm609_vm3, %v1735_v22 }
 0xe24   :  { %5890 = vmatpush3.bf16.xpose.msra.mxu1 %v1746_v23 }
 0xe2b   :  { %5892 = vmatmul.mubr.msk.bf16.vlgmr.msra.gmra.mrb[48].mxu1 %vm609_vm3, %v1731_v24 }
 0xeed   :  { %v7418_v26 = vpop.f32.mrb[44].mxu1 }
 0xeee   :  { %v7420_v30 = vpop.f32.mrb[45].mxu1 }
 0xeef   :  { %v5886_v31 = vpop.f32.mrb[46].mxu1 }
 0xef0   :  { %v7422_v32 = vpop.f32.mrb[47].mxu1 }
 0xefe   :  { %v5893_v34 = vpop.f32.mrb[48].mxu1 }
 0xeff   :  { %v1782_v35 = vpop.f32.mrb[49].mxu1  ;;  %v1798_v37 = vmul.f32 0.25, %v5893_v34 }
 0xf00   :  { %v1796_v21 = vmul.f32 0.25, %v1782_v35  ;;  %v5894_v36 = vpop.f32.mrb[50].mxu1 }
 0xf01   :  { %v1785_v28 = vpop.f32.mrb[51].mxu1  ;;  %v1805_v41 = vsel %vm680_vm7, %v1798_v37, -inf }
 0xf02   :  { %v1797_v20 = vmul.f32 0.25, %v1785_v28  ;;  %v1799_v44 = vsel %vm673_vm6, %v1796_v21, -inf }
 0xf03   :  { %1800 = vmax.xlane.f32.xlu0 %v1799_v44 }
 0xf04   :  { %v1802_v39 = vsel %vm673_vm6, %v1797_v20, -inf }
 0xf05   :  { %1803 = vmax.xlane.f32.xlu1 %v1802_v39 }
 0xf07   :  { %1806 = vmax.xlane.f32.xlu0 %v1805_v41 }
 0xf90   :  { %v1801_v42 = vpop.xlane.xlu0 %1800 }
 0xf91   :  { %v1808_v45 = vsub.f32 %v1796_v21, %v1801_v42 }
 0xf92   :  { %v1804_v46 = vpop.xlane.xlu1 %1803 }
 0xf93   :  { %v1811_v7 = vmul.f32 1.442695, %v1808_v45  ;;  %v1809_v12 = vsub.f32 %v1797_v20, %v1804_v46 }
 0xf94   :  { %v1807_v47 = vpop.xlane.xlu0 %1806 }
 0xf95   :  { %6497 = vpow2.f32 %v1811_v7  ;;  %v1813_v48 = vmul.f32 1.442695, %v1809_v12  ;;  %v1810_v53 = vsub.f32 %v1798_v37, %v1807_v47 }
 0xf97   :  { %6499 = vpow2.f32 %v1813_v48  ;;  %v1815_v55 = vmul.f32 1.442695, %v1810_v53 }
 0xf99   :  { %6501 = vpow2.f32 %v1815_v55 }
 0xf9f   :  { %v6498_v58 = vpop.eup %6497 }
 0xfa0   :  { %v1817_v61 = vsel %vm673_vm6, %v6498_v58, 0.0 }
 0xfa1   :  { %v6500_v1 = vpop.eup %6499  ;;  %1818 = vadd.xlane.f32.xlu0 %v1817_v61 }
 0xfa2   :  { %v1820_v8 = vsel %vm673_vm6, %v6500_v1, 0.0 }
 0xfa3   :  { %v6502_v5 = vpop.eup %6501 }
 0xfa4   :  { %v1823_v6 = vsel %vm680_vm7, %v6502_v5, 0.0 }
 0xfa5   :  { %1824 = vadd.xlane.f32.xlu1 %v1823_v6  ;;  %1821 = vadd.xlane.f32.xlu0 %v1820_v8 }
 0xfb6   :  { %1836 = vrot.lane.b32.xlu1 %v7317_v56, %s6851_s28 }
 0xfba   :  { %1915 = vrot.lane.b32.xlu1 %v7218_v2, %s6852_s2 }
 0xfbb   :  { %1834 = vrot.lane.b32.xlu0 %v7237_v38, %s6851_s28 }
 0xfbe   :  { %1917 = vrot.lane.b32.xlu1 %v7345_v57, %s6852_s2 }
 0xfbf   :  { %1911 = vrot.lane.b32.xlu0 %v7221_v3, %s6852_s2 }
 0xfc2   :  { %1913 = vrot.lane.b32.xlu1 %v7356_v63, %s6852_s2 }
0x102e   :  { %v1819_v9 = vpop.xlane.xlu0 %1818 }
0x102f   :  { %6503 = vrcp.f32 %v1819_v9 }
0x1032   :  { %v1822_v10 = vpop.xlane.xlu0 %1821  ;;  %v1825_v13 = vpop.xlane.xlu1 %1824 }
0x1033   :  { %6505 = vrcp.f32 %v1822_v10 }
0x1034   :  { %6507 = vrcp.f32 %v1825_v13 }
0x1036   :  { %v1835_v14 = vpop.permute.xlu0 %1834  ;;  %v1837_v2 = vpop.permute.xlu1 %1836 }
0x1037   :  { %v1846_v49 = vand.u32 %v1837_v2, %v7227_v11  ;;  %5895 = vmatprep.subr.bf16.mxu0 %v1835_v14 }
0x1038   :  { %5896 = vmatpush3.bf16.msra.mxu0 %v1835_v14 }
0x1039   :  { %5897 = vmatprep.subr.bf16.mxu0 %v1846_v49  ;;  %v6504_v57 = vpop.eup %6503 }
0x103a   :  { %v1916_v15 = vpop.permute.xlu1 %1915  ;;  %v1829_v18 = vmul.f32 %v6504_v57, %v6498_v58  ;;  %v1912_v34 = vpop.permute.xlu0 %1911 }
0x103b   :  { %v1926_v35 = vsel %vm609_vm3, %v1916_v15, 0 }
0x103c   :  { %5898 = vmatpush3.bf16.msra.mxu0 %v1846_v49 }
0x103d   :  { %v6506_v3 = vpop.eup %6505  ;;  %6301 = vmatprep.subr.msk.bf16.mxu0 %vm609_vm3, %v1916_v15 }
0x103e   :  { %v6508_v63 = vpop.eup %6507  ;;  %v1830_v22 = vmul.f32 %v6506_v3, %v6500_v1  ;;  %v1918_v21 = vpop.permute.xlu1 %1917 }
0x103f   :  { %v1831_v23 = vmul.f32 %v6508_v63, %v6502_v5  ;;  %v1929_v36 = vsel %vm609_vm3, %v1918_v21, 0 }
0x1040   :  { %v1832_v24 = vpack.c.bf16 %v1830_v22, %v1829_v18 }
0x1041   :  { %v1833_v31 = vpack.c.bf16 %v1831_v23, %v1831_v23 }
0x1042   :  { %5899 = vmatprep.mubr.msk.bf16.mxu0 %vm673_vm6, %v1832_v24  ;;  %v1914_v28 = vpop.permute.xlu1 %1913  ;;  %v6355_v24 = vld [vmem:[%s8404_s3 + $0x60] sm:$0xff]  }
0x1043   :  { %5900 = vmatmul.mubr.msk.bf16.vlgmr.msra.gmra.mrb[48].mxu0 %vm673_vm6, %v1833_v31 }
0x1044   :  { %5907 = vmatprep.mubr.msk.bf16.mxu0 %vm609_vm3, %v1912_v34 }
0x1045   :  { %5904 = vmatpush3.bf16.xpose.msra.mxu0 %v1926_v35 }
0x1046   :  { %6302 = vmatprep.subr.msk.bf16.mxu0 %vm609_vm3, %v1918_v21  ;;  %v6356_v21 = vld [vmem:[%s8404_s3 + $0x68] sm:$0xff]  }
0x104d   :  { %5906 = vmatpush3.bf16.xpose.msra.mxu0 %v1929_v36 }
0x104e   :  { %5939 = vmatprep.subr.bf16.mxu0 %v6847_v0 }
0x1054   :  { %5908 = vmatmul.mubr.msk.bf16.vlgmr.msra.gmra.mrb[52].mxu0 %vm609_vm3, %v1914_v28 }
0x1055   :  { %5947 = vmatprep.mubr.msk.bf16.mxu0 %vm6848_vm0, %v6847_v0 }
0x1116   :  { %v7454_v37 = vpop.f32.mrb[48].mxu0 }
0x1117   :  { %v1882_v20 = vpop.f32.mrb[49].mxu0 }
0x1118   :  { %v5902_v44 = vpop.f32.mrb[50].mxu0 }
0x1119   :  { %v1885_v39 = vpop.f32.mrb[51].mxu0 }
0x1127   :  { %v5909_v41 = vpop.f32.mrb[52].mxu0 }
0x1128   :  { %v1965_v42 = vpop.f32.mrb[53].mxu0  ;;  %v1981_v12 = vmul.f32 0.25, %v5909_v41  ;;  %v6358_v41 = vld [vmem:[%s8404_s3 + $0x78] sm:$0xff]  }
0x1129   :  { %v1979_v45 = vmul.f32 0.25, %v1965_v42  ;;  %v5910_v46 = vpop.f32.mrb[54].mxu0 }
0x112a   :  { %v1968_v7 = vpop.f32.mrb[55].mxu0  ;;  %v1988_v55 = vsel %vm680_vm7, %v1981_v12, -inf }
0x112b   :  { %v1980_v47 = vmul.f32 0.25, %v1968_v7  ;;  %v1982_v48 = vsel %vm673_vm6, %v1979_v45, -inf }
0x112c   :  { %1983 = vmax.xlane.f32.xlu0 %v1982_v48 }
0x112d   :  { %v1985_v53 = vsel %vm673_vm6, %v1980_v47, -inf }
0x112e   :  { %1986 = vmax.xlane.f32.xlu1 %v1985_v53 }
0x1130   :  { %1989 = vmax.xlane.f32.xlu0 %v1988_v55 }
0x11b9   :  { %v1984_v58 = vpop.xlane.xlu0 %1983 }
0x11ba   :  { %v1991_v61 = vsub.f32 %v1979_v45, %v1984_v58 }
0x11bb   :  { %v1987_v1 = vpop.xlane.xlu1 %1986 }
0x11bc   :  { %v1994_v5 = vmul.f32 1.442695, %v1991_v61  ;;  %v1992_v6 = vsub.f32 %v1980_v47, %v1987_v1 }
0x11bd   :  { %v1990_v8 = vpop.xlane.xlu0 %1989 }
0x11be   :  { %6509 = vpow2.f32 %v1994_v5  ;;  %v1996_v9 = vmul.f32 1.442695, %v1992_v6  ;;  %v1993_v10 = vsub.f32 %v1981_v12, %v1990_v8  ;;  %v7536_v8 = vsub.s32 2, %v7130_v17 }
0x11c0   :  { %6511 = vpow2.f32 %v1996_v9  ;;  %v1998_v13 = vmul.f32 1.442695, %v1993_v10  ;;  %v7539_v10 = vld [vmem:[#allocation9] sm:$0xff] }
0x11c2   :  { %6513 = vpow2.f32 %v1998_v13  ;;  %v7543_v13 = vrot.slane %v7539_v10, %v7536_v8 }
0x11c8   :  { %v6510_v14 = vpop.eup %6509 }
0x11c9   :  { %v2000_v2 = vsel %vm673_vm6, %v6510_v14, 0.0 }
0x11ca   :  { %v6512_v49 = vpop.eup %6511  ;;  %2001 = vadd.xlane.f32.xlu0 %v2000_v2 }
0x11cb   :  { %v2003_v3 = vsel %vm673_vm6, %v6512_v49, 0.0 }
0x11cc   :  { %v6514_v57 = vpop.eup %6513 }
0x11cd   :  { %v2006_v15 = vsel %vm680_vm7, %v6514_v57, 0.0 }
0x11ce   :  { %2007 = vadd.xlane.f32.xlu1 %v2006_v15  ;;  %2004 = vadd.xlane.f32.xlu0 %v2003_v3  ;;  %v6359_v3 = vld [vmem:[#allocation7] sm:$0xff]  }
0x11cf   :  { %5940 = vmatpush3.bf16.msra.mxu0 %v6359_v3 }
0x11d0   :  { %5941 = vmatprep.subr.bf16.mxu0 %v6847_v0 }
0x11df   :  { %2019 = vrot.lane.b32.xlu1 %v7317_v56, %s6852_s2 }
0x11e3   :  { %953 = vrot.lane.b32.xlu1 %v7285_v52, %s6853_s1 }
0x11e4   :  { %2017 = vrot.lane.b32.xlu0 %v7237_v38, %s6852_s2 }
0x11e7   :  { %955 = vrot.lane.b32.xlu1 %v7287_v54, %s6853_s1 }
0x11e8   :  { %1138 = vrot.lane.b32.xlu0 %v7325_v60, %s6854_s25 }
0x11eb   :  { %1140 = vrot.lane.b32.xlu1 %v7327_v62, %s6854_s25 }
0x11ec   :  { %1323 = vrot.lane.b32.xlu0 %v7362_v27, %s6855_s12 }
0x11ef   :  { %1325 = vrot.lane.b32.xlu1 %v7364_v4, %s6855_s12 }
0x11f0   :  { %957 = vrot.lane.b32.xlu0 %v7283_v51, %s6853_s1 }
0x11f3   :  { %1716 = vrot.lane.b32.xlu1 %v7420_v30, %s6853_s1 }
0x11f4   :  { %1718 = vrot.lane.b32.xlu0 %v7422_v32, %s6853_s1 }
0x11f7   :  { %1142 = vrot.lane.b32.xlu1 %v7323_v59, %s6854_s25 }
0x11f8   :  { %1899 = vrot.lane.b32.xlu0 %v1882_v20, %s6854_s25  ;;  %v6357_v20 = vld [vmem:[%s8404_s3 + $0x70] sm:$0xff]  }
0x11fb   :  { %1901 = vrot.lane.b32.xlu1 %v1885_v39, %s6854_s25 }
0x11fc   :  { %1327 = vrot.lane.b32.xlu0 %v7360_v50, %s6855_s12 }
0x1257   :  { %v2002_v38 = vpop.xlane.xlu0 %2001 }
0x1258   :  { %6515 = vrcp.f32 %v2002_v38  ;;  %v6360_v38 = vld [vmem:[#allocation7 + $0x8] sm:$0xff]  }
0x1259   :  { %5942 = vmatpush3.bf16.msra.mxu0 %v6360_v38 }
0x125a   :  { %5943 = vmatprep.subr.bf16.mxu0 %v6847_v0 }
0x125b   :  { %v2005_v52 = vpop.xlane.xlu0 %2004  ;;  %v2008_v51 = vpop.xlane.xlu1 %2007 }
0x125c   :  { %6517 = vrcp.f32 %v2005_v52  ;;  %v6361_v52 = vld [vmem:[#allocation7 + $0x10] sm:$0xff]  }
0x125d   :  { %6519 = vrcp.f32 %v2008_v51  ;;  %5944 = vmatpush3.bf16.msra.mxu0 %v6361_v52  ;;  %v6362_v51 = vld [vmem:[#allocation7 + $0x18] sm:$0xff]  }
0x125e   :  { %5945 = vmatprep.subr.bf16.mxu0 %v6847_v0 }
0x125f   :  { %v2018_v54 = vpop.permute.xlu0 %2017  ;;  %v2020_v56 = vpop.permute.xlu1 %2019 }
0x1260   :  { %v2029_v60 = vand.u32 %v2020_v56, %v7227_v11  ;;  %5911 = vmatprep.subr.bf16.mxu1 %v2018_v54 }
0x1261   :  { %5912 = vmatpush3.bf16.msra.mxu1 %v2018_v54  ;;  %5946 = vmatpush3.bf16.msra.mxu0 %v6362_v51 }
0x1262   :  { %5913 = vmatprep.subr.bf16.mxu1 %v2029_v60  ;;  %v6516_v27 = vpop.eup %6515  ;;  %5987 = vmatprep.subr.bf16.mxu0 %v6847_v0 }
0x1263   :  { %v1139_v59 = vpop.permute.xlu0 %1138  ;;  %v954_v62 = vpop.permute.xlu1 %953  ;;  %v2012_v63 = vmul.f32 %v6516_v27, %v6510_v14 }
0x1264   :  { %963 = vst.msk [vmem:[#allocation2] sm:$0xff] %vm962_vm9, %v954_v62 }
0x1265   :  { %5914 = vmatpush3.bf16.msra.mxu1 %v2029_v60  ;;  %1148 = vst.msk [vmem:[#allocation2] sm:$0xff] %vm1147_vm10, %v1139_v59 }
0x1266   :  { %v6518_v50 = vpop.eup %6517  ;;  %5919 = vmatprep.subr.bf16.mxu1 %v6847_v0 }
0x1267   :  { %v6520_v4 = vpop.eup %6519  ;;  %v1324_v30 = vpop.permute.xlu0 %1323  ;;  %v2013_v18 = vmul.f32 %v6518_v50, %v6512_v49 }
0x1268   :  { %v956_v32 = vpop.permute.xlu1 %955  ;;  %1333 = vst.msk [vmem:[#allocation2] sm:$0xff] %vm1332_vm11, %v1324_v30  ;;  %v2014_v22 = vmul.f32 %v6520_v4, %v6514_v57 }
0x1269   :  { %964 = vst.msk [vmem:[#allocation2 + $0x8] sm:$0xff] %vm962_vm9, %v956_v32  ;;  %v2015_v23 = vpack.c.bf16 %v2013_v18, %v2012_v63 }
0x126a   :  { %v2016_v31 = vpack.c.bf16 %v2014_v22, %v2014_v22 }
0x126b   :  { %5915 = vmatprep.mubr.msk.bf16.mxu1 %vm673_vm6, %v2015_v23  ;;  %v958_v34 = vpop.permute.xlu0 %957 }
0x126c   :  { %v1141_v35 = vpop.permute.xlu1 %1140  ;;  %966 = vst.msk [vmem:[#allocation2 + $0x10] sm:$0x1] %vm965_vm12, %v958_v34  ;;  %5916 = vmatmul.mubr.msk.bf16.vlgmr.msra.gmra.mrb[52].mxu1 %vm673_vm6, %v2016_v31 }
0x126d   :  { %1149 = vst.msk [vmem:[#allocation2 + $0x8] sm:$0xff] %vm1147_vm10, %v1141_v35  ;;  %5920 = vmatpush3.bf16.msra.mxu1 %v6355_v24  ;;  %5927 = vmatprep.mubr.msk.bf16.mxu1 %vm6848_vm0, %v6847_v0 }
0x126e   :  { %5921 = vmatprep.subr.bf16.mxu1 %v6847_v0 }
0x126f   :  { %v1719_v36 = vpop.permute.xlu0 %1718  ;;  %v2094_v46 = vld [vmem:[#allocation2] sm:$0xff] }
0x1270   :  { %v1326_v28 = vpop.permute.xlu1 %1325  ;;  %1726 = vst.msk [vmem:[#allocation2 + $0x19] sm:$0xff] %vm962_vm9, %v1719_v36 }
0x1271   :  { %1334 = vst.msk [vmem:[#allocation2 + $0x8] sm:$0xff] %vm1332_vm11, %v1326_v28  ;;  %5922 = vmatpush3.bf16.msra.mxu1 %v6356_v21 }
0x1272   :  { %5923 = vmatprep.subr.bf16.mxu1 %v6847_v0 }
0x1273   :  { %v1900_v44 = vpop.permute.xlu0 %1899 }
0x1274   :  { %v1717_v39 = vpop.permute.xlu1 %1716 }
0x1275   :  { %1725 = vst.msk [vmem:[#allocation2 + $0x11] sm:$0xff] %vm962_vm9, %v1717_v39  ;;  %5924 = vmatpush3.bf16.msra.mxu1 %v6357_v20 }
0x1276   :  { %1908 = vst.msk [vmem:[#allocation2 + $0x11] sm:$0xff] %vm1147_vm10, %v1900_v44  ;;  %5925 = vmatprep.subr.bf16.mxu1 %v6847_v0 }
0x1277   :  { %v1328_v42 = vpop.permute.xlu0 %1327 }
0x1278   :  { %v1143_v45 = vpop.permute.xlu1 %1142  ;;  %v2095_v7 = vld [vmem:[#allocation2 + $0x8] sm:$0xff] }
0x1279   :  { %1151 = vst.msk [vmem:[#allocation2 + $0x10] sm:$0x1] %vm1150_vm13, %v1143_v45  ;;  %v2108_v12 = vpack.c.bf16 %v2095_v7, %v2094_v46  ;;  %5926 = vmatpush3.bf16.msra.mxu1 %v6358_v41  ;;  %v7578_v41 = vsub.s32 3, %v7130_v17 }
0x127a   :  { %1336 = vst.msk [vmem:[#allocation2 + $0x10] sm:$0x1] %vm1335_vm14, %v1328_v42  ;;  %5959 = vmatprep.subr.bf16.mxu1 %v6847_v0 }
0x127b   :  { %v7583_v7 = vrot.slane %v7539_v10, %v7578_v41 }
0x127c   :  { %v1902_v47 = vpop.permute.xlu1 %1901  ;;  %5928 = vmatmul.mubr.msk.bf16.vlgmr.msra.gmra.mrb[56].mxu1 %vm165_vm1, %v2108_v12  ;;  %v7586_v12 = vsub.s32 4, %v7130_v17 }
0x127d   :  { %1909 = vst.msk [vmem:[#allocation2 + $0x19] sm:$0xff] %vm1147_vm10, %v1902_v47  ;;  %5931 = vmatprep.mubr.msk.bf16.mxu1 %vm6848_vm0, %v6847_v0 }
0x133f   :  { %v5917_v48 = vpop.f32.mrb[52].mxu1 }
0x1340   :  { %v2065_v53 = vpop.f32.mrb[53].mxu1 }
0x1341   :  { %2082 = vrot.lane.b32.xlu1 %v2065_v53, %s6855_s12  ;;  %v5918_v55 = vpop.f32.mrb[54].mxu1 }
0x1342   :  { %v2068_v58 = vpop.f32.mrb[55].mxu1 }
0x1343   :  { %2084 = vrot.lane.b32.xlu0 %v2068_v58, %s6855_s12  ;;  %v7592_v58 = vrot.slane %v7539_v10, %v7586_v12 }
0x1345   :  { %1720 = vrot.lane.b32.xlu1 %v7418_v26, %s6853_s1 }
0x1347   :  { %1903 = vrot.lane.b32.xlu0 %v7454_v37, %s6854_s25 }
0x1349   :  { %2086 = vrot.lane.b32.xlu1 %v5917_v48, %s6855_s12 }
0x134f   :  { %v2178_v61 = vpop.f32.mrb[56].mxu1 }
0x1350   :  { %v5929_v1 = vpop.f32.mrb[57].mxu1  ;;  %v2200_v9 = vadd.f32 %v2178_v61, %v7055_v16 }
0x1351   :  { %v2181_v5 = vpop.f32.mrb[58].mxu1 }
0x1352   :  { %v5930_v6 = vpop.f32.mrb[59].mxu1  ;;  %v7546_v26 = vadd.f32 %v7543_v13, %v2200_v9  ;;  %v2201_v37 = vadd.f32 %v2181_v5, %v7057_v19  ;;  %v6363_v9 = vld [vmem:[%s8406_s5] sm:$0xff]  }
0x1353   :  { %5960 = vmatpush3.bf16.msra.mxu1 %v6363_v9 }
0x1354   :  { %v7550_v14 = vadd.f32 %v7543_v13, %v2201_v37  ;;  %v2214_v2 = vsel %vm165_vm1, %v7546_v26, 0.0  ;;  %v2234_v16 = vmul.f32 %v7546_v26, %v7546_v26  ;;  %v6364_v37 = vld [vmem:[%s8406_s5 + $0x8] sm:$0xff]   ;;  %5961 = vmatprep.subr.bf16.mxu1 %v6847_v0 }
0x1356   :  { %v2239_v49 = vsel %vm165_vm1, %v2234_v16, 0.0  ;;  %v2235_v57 = vmul.f32 %v7550_v14, %v7550_v14  ;;  %v2217_v15 = vsel %vm165_vm1, %v7550_v14, 0.0  ;;  %v6366_v16 = vld [vmem:[%s8406_s5 + $0x18] sm:$0xff]  }
0x1357   :  { %5962 = vmatpush3.bf16.msra.mxu1 %v6364_v37 }
0x1358   :  { %v2242_v19 = vsel %vm165_vm1, %v2235_v57, 0.0  ;;  %5963 = vmatprep.subr.bf16.mxu1 %v6847_v0  ;;  %v6368_v57 = vld [vmem:[%s8406_s5 + $0x28] sm:$0xff]  }
0x1366   :  { %2215 = vadd.xlane.f32.xlu0 %v2214_v2  ;;  %v6365_v2 = vld [vmem:[%s8406_s5 + $0x10] sm:$0xff]  }
0x1367   :  { %5964 = vmatpush3.bf16.msra.mxu1 %v6365_v2 }
0x1368   :  { %5965 = vmatprep.subr.bf16.mxu1 %v6847_v0 }
0x136a   :  { %2240 = vadd.xlane.f32.xlu0 %v2239_v49  ;;  %v6367_v49 = vld [vmem:[%s8406_s5 + $0x20] sm:$0xff]  }
0x136b   :  { %5966 = vmatpush3.bf16.msra.mxu1 %v6366_v16 }
0x136c   :  { %5967 = vmatprep.subr.bf16.mxu1 %v6847_v0 }
0x136d   :  { %2218 = vadd.xlane.f32.xlu1 %v2217_v15  ;;  %v6369_v15 = vld [vmem:[%s8406_s5 + $0x30] sm:$0xff]  }
0x136e   :  { %2243 = vadd.xlane.f32.xlu0 %v2242_v19  ;;  %v6370_v19 = vld [vmem:[%s8406_s5 + $0x38] sm:$0xff]  }
0x136f   :  { %5968 = vmatpush3.bf16.msra.mxu1 %v6367_v49 }
0x1370   :  { %5969 = vmatprep.subr.bf16.mxu1 %v6847_v0 }
0x1373   :  { %5970 = vmatpush3.bf16.msra.mxu1 %v6368_v57 }
0x1374   :  { %5971 = vmatprep.subr.bf16.mxu1 %v6847_v0 }
0x1377   :  { %5972 = vmatpush3.bf16.msra.mxu1 %v6369_v15 }
0x1378   :  { %5973 = vmatprep.subr.bf16.mxu1 %v6847_v0 }
0x137b   :  { %5974 = vmatpush3.bf16.msra.mxu1 %v6370_v19 }
0x137c   :  { %6027 = vmatprep.subr.bf16.mxu1 %v6847_v0 }
0x13b3   :  { %v2083_v54 = vpop.permute.xlu1 %2082 }
0x13b4   :  { %2091 = vst.msk [vmem:[#allocation2 + $0x11] sm:$0xff] %vm1332_vm11, %v2083_v54 }
0x13b5   :  { %v2085_v56 = vpop.permute.xlu0 %2084 }
0x13b6   :  { %2092 = vst.msk [vmem:[#allocation2 + $0x19] sm:$0xff] %vm1332_vm11, %v2085_v56 }
0x13b7   :  { %v1721_v60 = vpop.permute.xlu1 %1720 }
0x13b8   :  { %1727 = vst.msk [vmem:[#allocation2 + $0x21] sm:$0x1] %vm965_vm12, %v1721_v60 }
0x13b9   :  { %v1904_v59 = vpop.permute.xlu0 %1903 }
0x13ba   :  { %1910 = vst.msk [vmem:[#allocation2 + $0x21] sm:$0x1] %vm1150_vm13, %v1904_v59 }
0x13bb   :  { %v2087_v62 = vpop.permute.xlu1 %2086  ;;  %v2096_v27 = vld [vmem:[#allocation2 + $0x10] sm:$0xff] }
0x13bc   :  { %2093 = vst.msk [vmem:[#allocation2 + $0x21] sm:$0x1] %vm1335_vm14, %v2087_v62 }
0x13bd   :  { %v2097_v50 = vld [vmem:[#allocation2 + $0x18] sm:$0xff] }
0x13be   :  { %v2109_v4 = vpack.c.bf16 %v2097_v50, %v2096_v27 }
0x13c0   :  { %5932 = vmatmul.mubr.msk.bf16.gmra.mrb[60].mxu1 %vm165_vm1, %v2109_v4 }
0x13c1   :  { %5935 = vmatprep.mubr.msk.bf16.mxu1 %vm6848_vm0, %v6847_v0 }
0x13c3   :  { %v2098_v30 = vld [vmem:[#allocation2 + $0x20] sm:$0x3] }
0x13c4   :  { %v2110_v32 = vpack.c.bf16 %v2098_v30, %v2098_v30 }
0x13c8   :  { %5936 = vmatmul.mubr.msk.bf16.gmra.mrb[64].mxu1 %vm165_vm1, %v2110_v32 }
0x13c9   :  { %5975 = vmatprep.mubr.msk.bf16.mxu1 %vm6848_vm0, %v6847_v0 }
0x13f3   :  { %v2216_v63 = vpop.xlane.xlu0 %2215 }
0x13f4   :  { %v2229_v18 = vmul.f32 0.015625, %v2216_v63 }
0x13f6   :  { %v2259_v23 = vmul.f32 %v2229_v18, %v2229_v18  ;;  %v2269_v45 = vsub.f32 %v7546_v26, %v2229_v18 }
0x13f7   :  { %v2241_v22 = vpop.xlane.xlu0 %2240 }
0x13f8   :  { %v2254_v24 = vmul.f32 0.015625, %v2241_v22 }
0x13fa   :  { %v2264_v31 = vsub.f32 %v2254_v24, %v2259_v23  ;;  %v2219_v34 = vpop.xlane.xlu1 %2218 }
0x13fb   :  { %v2230_v35 = vmul.f32 0.015625, %v2219_v34  ;;  %v2244_v21 = vpop.xlane.xlu0 %2243  ;;  %v2320_v34 = vsub.s32 5, %v7130_v17 }
0x13fc   :  { %v2274_v36 = vadd.f32 1e-05, %v2264_v31  ;;  %v2255_v28 = vmul.f32 0.015625, %v2244_v21 }
0x13fd   :  { %v2260_v20 = vmul.f32 %v2230_v35, %v2230_v35  ;;  %v2270_v47 = vsub.f32 %v7550_v14, %v2230_v35 }
0x13fe   :  { %6521 = vrsqrt.f32 %v2274_v36 }
0x13ff   :  { %v2265_v44 = vsub.f32 %v2255_v28, %v2260_v20 }
0x1401   :  { %v2275_v39 = vadd.f32 1e-05, %v2265_v44 }
0x1403   :  { %6523 = vrsqrt.f32 %v2275_v39 }
0x1408   :  { %v6522_v42 = vpop.eup %6521 }
0x1409   :  { %v2284_v46 = vmul.f32 %v6522_v42, %v2269_v45 }
0x140b   :  { %v2293_v55 = vmul.f32 %v7583_v7, %v2284_v46 }
0x140d   :  { %v6524_v48 = vpop.eup %6523  ;;  %v2302_v1 = vadd.f32 %v7592_v58, %v2293_v55 }
0x140e   :  { %v2285_v53 = vmul.f32 %v6524_v48, %v2270_v47 }
0x1410   :  { %v2294_v61 = vmul.f32 %v7583_v7, %v2285_v53 }
0x1412   :  { %v2303_v5 = vadd.f32 %v7592_v58, %v2294_v61 }
0x1414   :  { %v2315_v6 = vpack.c.bf16 %v2303_v5, %v2302_v1 }
0x1416   :  { %5948 = vmatmul.mubr.msk.bf16.vlgmr.msra.gmra.mrb[56].mxu0 %vm165_vm1, %v2315_v6 }
0x1417   :  { %5951 = vmatprep.mubr.msk.bf16.mxu0 %vm6848_vm0, %v6847_v0 }
0x1493   :  { %v2186_v3 = vpop.f32.mrb[60].mxu1 }
0x1494   :  { %v2202_v38 = vadd.f32 %v2186_v3, %v7074_v29  ;;  %v5933_v52 = vpop.f32.mrb[61].mxu1 }
0x1495   :  { %v2189_v51 = vpop.f32.mrb[62].mxu1 }
0x1496   :  { %v7634_v54 = vadd.f32 %v7543_v13, %v2202_v38  ;;  %v2203_v56 = vadd.f32 %v2189_v51, %v7077_v33  ;;  %v5934_v60 = vpop.f32.mrb[63].mxu1 }
0x1498   :  { %v7638_v59 = vadd.f32 %v7543_v13, %v2203_v56  ;;  %v2220_v62 = vsel %vm165_vm1, %v7634_v54, 0.0  ;;  %v2236_v27 = vmul.f32 %v7634_v54, %v7634_v54 }
0x1499   :  { %2221 = vadd.xlane.f32.xlu0 %v2220_v62 }
0x149a   :  { %v2223_v29 = vsel %vm165_vm1, %v7638_v59, 0.0  ;;  %v2237_v50 = vmul.f32 %v7638_v59, %v7638_v59  ;;  %v2245_v32 = vsel %vm165_vm1, %v2236_v27, 0.0 }
0x149b   :  { %2224 = vadd.xlane.f32.xlu1 %v2223_v29  ;;  %v2194_v4 = vpop.f32.mrb[64].mxu1 }
0x149c   :  { %v2204_v33 = vadd.f32 %v2194_v4, %v7092_v43  ;;  %v5937_v30 = vpop.f32.mrb[65].mxu1  ;;  %v2248_v23 = vsel %vm165_vm1, %v2237_v50, 0.0 }
0x149d   :  { %2246 = vadd.xlane.f32.xlu0 %v2245_v32  ;;  %v2197_v63 = vpop.f32.mrb[66].mxu1 }
0x149e   :  { %v7651_v18 = vadd.f32 %v7543_v13, %v2204_v33  ;;  %v5938_v22 = vpop.f32.mrb[67].mxu1  ;;  %v7663_v13 = vrot.slane %v7539_v10, %v2320_v34 }
0x149f   :  { %2249 = vadd.xlane.f32.xlu1 %v2248_v23 }
0x14a0   :  { %v2226_v24 = vsel %vm244_vm2, %v7651_v18, 0.0  ;;  %v2238_v31 = vmul.f32 %v7651_v18, %v7651_v18 }
0x14a1   :  { %2227 = vadd.xlane.f32.xlu0 %v2226_v24 }
0x14a2   :  { %v2251_v43 = vsel %vm244_vm2, %v2238_v31, 0.0 }
0x14a3   :  { %2252 = vadd.xlane.f32.xlu1 %v2251_v43 }
0x14e9   :  { %v2389_v35 = vpop.f32.mrb[56].mxu0 }
0x14ea   :  { %v2390_v21 = vadd.f32 %v2389_v35, %v7663_v13  ;;  %v5949_v36 = vpop.f32.mrb[57].mxu0 }
0x14eb   :  { %v2392_v28 = vpop.f32.mrb[58].mxu0 }
0x14ec   :  { %v2416_v20 = vmul.f32 0.70710677, %v2390_v21  ;;  %v2393_v44 = vadd.f32 %v2392_v28, %v7663_v13  ;;  %v5950_v39 = vpop.f32.mrb[59].mxu0  ;;  %v2411_v48 = vmul.f32 0.5, %v2390_v21 }
0x14ee   :  { %6525 = verf.f32 %v2416_v20  ;;  %v2417_v42 = vmul.f32 0.70710677, %v2393_v44  ;;  %v2412_v53 = vmul.f32 0.5, %v2393_v44 }
0x14f0   :  { %6527 = verf.f32 %v2417_v42 }
0x14f8   :  { %v6526_v45 = vpop.eup %6525 }
0x14f9   :  { %v2426_v46 = vadd.f32 1.0, %v6526_v45 }
0x14fa   :  { %v6528_v47 = vpop.eup %6527 }
0x14fb   :  { %v2427_v55 = vadd.f32 1.0, %v6528_v47  ;;  %v2431_v61 = vmul.f32 %v2426_v46, %v2411_v48  ;;  %v2566_v46 = vsub.s32 6, %v7130_v17 }
0x14fd   :  { %v2432_v1 = vmul.f32 %v2427_v55, %v2412_v53  ;;  %v7688_v47 = vrot.slane %v7539_v10, %v2566_v46 }
0x14ff   :  { %v2452_v5 = vpack.c.bf16 %v2432_v1, %v2431_v61 }
0x1501   :  { %5976 = vmatmul.mubr.bf16.vlgmr.msra.gmra.mrb[68].mxu1 %v2452_v5 }
0x1502   :  { %5979 = vmatprep.mubr.msk.bf16.mxu1 %vm6848_vm0, %v6847_v0 }
0x1526   :  { %v2222_v6 = vpop.xlane.xlu0 %2221 }
0x1527   :  { %v2231_v9 = vmul.f32 0.015625, %v2222_v6 }
0x1528   :  { %v2225_v37 = vpop.xlane.xlu1 %2224 }
0x1529   :  { %v2232_v2 = vmul.f32 0.015625, %v2225_v37  ;;  %v2261_v49 = vmul.f32 %v2231_v9, %v2231_v9  ;;  %v2271_v30 = vsub.f32 %v7634_v54, %v2231_v9 }
0x152a   :  { %v2247_v16 = vpop.xlane.xlu0 %2246 }
0x152b   :  { %v2256_v57 = vmul.f32 0.015625, %v2247_v16  ;;  %v2262_v19 = vmul.f32 %v2232_v2, %v2232_v2  ;;  %v2272_v63 = vsub.f32 %v7638_v59, %v2232_v2  ;;  %v6371_v2 = vld [vmem:[%s8404_s3 + $0x80] sm:$0xff]  }
0x152c   :  { %v2250_v15 = vpop.xlane.xlu1 %2249  ;;  %v6372_v16 = vld [vmem:[%s8404_s3 + $0xc0] sm:$0xff]   ;;  %5988 = vmatpush3.bf16.msra.mxu0 %v6371_v2 }
0x152d   :  { %v2266_v3 = vsub.f32 %v2256_v57, %v2261_v49  ;;  %v2257_v38 = vmul.f32 0.015625, %v2250_v15  ;;  %6028 = vmatpush3.bf16.msra.mxu1 %v6372_v16  ;;  %5989 = vmatprep.subr.bf16.mxu0 %v6847_v0  ;;  %v6373_v49 = vld [vmem:[%s8404_s3 + $0x88] sm:$0xff]   ;;  %v6375_v15 = vld [vmem:[%s8404_s3 + $0x90] sm:$0xff]  }
0x152e   :  { %v2228_v52 = vpop.xlane.xlu0 %2227  ;;  %6029 = vmatprep.subr.bf16.mxu1 %v6847_v0  ;;  %v6374_v57 = vld [vmem:[%s8404_s3 + $0xc8] sm:$0xff]  }
0x152f   :  { %v2276_v51 = vadd.f32 1e-05, %v2266_v3  ;;  %v2267_v56 = vsub.f32 %v2257_v38, %v2262_v19  ;;  %v2233_v60 = vmul.f32 0.015625, %v2228_v52  ;;  %v6376_v19 = vld [vmem:[%s8404_s3 + $0xd0] sm:$0xff]   ;;  %v6377_v3 = vld [vmem:[%s8404_s3 + $0x98] sm:$0xff]  }
0x1530   :  { %v2253_v62 = vpop.xlane.xlu1 %2252  ;;  %5990 = vmatpush3.bf16.msra.mxu0 %v6373_v49  ;;  %v6378_v38 = vld [vmem:[%s8404_s3 + $0xd8] sm:$0xff]  }
0x1531   :  { %6529 = vrsqrt.f32 %v2276_v51  ;;  %v2277_v27 = vadd.f32 1e-05, %v2267_v56  ;;  %v2263_v29 = vmul.f32 %v2233_v60, %v2233_v60  ;;  %v2258_v50 = vmul.f32 0.015625, %v2253_v62  ;;  %6030 = vmatpush3.bf16.msra.mxu1 %v6374_v57  ;;  %5991 = vmatprep.subr.bf16.mxu0 %v6847_v0  ;;  %v2574_v49 = vld [vmem:[#allocation9 + $0x8] sm:$0xff] }
0x1532   :  { %v2273_v35 = vsub.f32 %v7651_v18, %v2233_v60  ;;  %6031 = vmatprep.subr.bf16.mxu1 %v6847_v0 }
0x1533   :  { %6531 = vrsqrt.f32 %v2277_v27  ;;  %v2268_v4 = vsub.f32 %v2258_v50, %v2263_v29 }
0x1534   :  { %5992 = vmatpush3.bf16.msra.mxu0 %v6375_v15  ;;  %v7748_v15 = vrot.slane %v2574_v49, %v7133_v25 }
0x1535   :  { %v2278_v33 = vadd.f32 1e-05, %v2268_v4  ;;  %6032 = vmatpush3.bf16.msra.mxu1 %v6376_v19  ;;  %5993 = vmatprep.subr.bf16.mxu0 %v6847_v0 }
0x1536   :  { %6033 = vmatprep.subr.bf16.mxu1 %v6847_v0 }
0x1537   :  { %6533 = vrsqrt.f32 %v2278_v33 }
0x1538   :  { %5994 = vmatpush3.bf16.msra.mxu0 %v6377_v3 }
0x1539   :  { %6034 = vmatpush3.bf16.msra.mxu1 %v6378_v38  ;;  %6007 = vmatprep.subr.bf16.mxu0 %v6847_v0 }
0x153b   :  { %v6530_v32 = vpop.eup %6529 }
0x153c   :  { %v2286_v22 = vmul.f32 %v6530_v32, %v2271_v30 }
0x153d   :  { %v6532_v23 = vpop.eup %6531 }
0x153e   :  { %v2287_v24 = vmul.f32 %v6532_v23, %v2272_v63  ;;  %v2295_v31 = vmul.f32 %v7583_v7, %v2286_v22 }
0x1540   :  { %v2296_v43 = vmul.f32 %v7583_v7, %v2287_v24  ;;  %v2304_v36 = vadd.f32 %v7592_v58, %v2295_v31 }
0x1541   :  { %v6534_v21 = vpop.eup %6533 }
0x1542   :  { %v2305_v28 = vadd.f32 %v7592_v58, %v2296_v43  ;;  %v2288_v20 = vmul.f32 %v6534_v21, %v2273_v35 }
0x1544   :  { %v2316_v44 = vpack.c.bf16 %v2305_v28, %v2304_v36  ;;  %v2297_v39 = vmul.f32 %v7583_v7, %v2288_v20 }
0x1546   :  { %5952 = vmatmul.mubr.msk.bf16.gmra.mrb[60].mxu0 %vm165_vm1, %v2316_v44  ;;  %v2306_v42 = vadd.f32 %v7592_v58, %v2297_v39 }
0x1547   :  { %5955 = vmatprep.mubr.msk.bf16.mxu0 %vm6848_vm0, %v6847_v0 }
0x1548   :  { %v2317_v45 = vpack.c.bf16 %v2306_v42, %v2306_v42 }
0x154e   :  { %5956 = vmatmul.mubr.msk.bf16.gmra.mrb[64].mxu0 %vm165_vm1, %v2317_v45 }
0x154f   :  { %5995 = vmatprep.mubr.msk.bf16.mxu0 %vm6848_vm0, %v6847_v0 }
0x15d4   :  { %v2537_v7 = vpop.f32.mrb[68].mxu1 }
0x15d5   :  { %v2559_v48 = vadd.f32 %v2537_v7, %v7546_v26  ;;  %v5977_v53 = vpop.f32.mrb[69].mxu1 }
0x15d6   :  { %v2540_v55 = vpop.f32.mrb[70].mxu1 }
0x15d7   :  { %v7692_v58 = vadd.f32 %v7688_v47, %v2559_v48  ;;  %v2560_v61 = vadd.f32 %v2540_v55, %v7550_v14  ;;  %v5978_v1 = vpop.f32.mrb[71].mxu1 }
0x15d9   :  { %v7696_v5 = vadd.f32 %v7688_v47, %v2560_v61  ;;  %v2575_v6 = vsel %vm165_vm1, %v7692_v58, 0.0  ;;  %v2595_v10 = vmul.f32 %v7692_v58, %v7692_v58 }
0x15da   :  { %2576 = vadd.xlane.f32.xlu0 %v2575_v6 }
0x15db   :  { %v2578_v26 = vsel %vm165_vm1, %v7696_v5, 0.0  ;;  %v2596_v9 = vmul.f32 %v7696_v5, %v7696_v5  ;;  %v2600_v14 = vsel %vm165_vm1, %v2595_v10, 0.0 }
0x15dc   :  { %2579 = vadd.xlane.f32.xlu1 %v2578_v26 }
0x15dd   :  { %v2603_v37 = vsel %vm165_vm1, %v2596_v9, 0.0 }
0x15de   :  { %2601 = vadd.xlane.f32.xlu0 %v2600_v14 }
0x15e0   :  { %2604 = vadd.xlane.f32.xlu1 %v2603_v37 }
0x1619   :  { %v2397_v52 = vpop.f32.mrb[60].mxu0 }
0x161a   :  { %v2398_v51 = vadd.f32 %v2397_v52, %v7663_v13  ;;  %v5953_v56 = vpop.f32.mrb[61].mxu0 }
0x161b   :  { %v2400_v60 = vpop.f32.mrb[62].mxu0 }
0x161c   :  { %v2418_v62 = vmul.f32 0.70710677, %v2398_v51  ;;  %v2401_v27 = vadd.f32 %v2400_v60, %v7663_v13  ;;  %v5954_v29 = vpop.f32.mrb[63].mxu0  ;;  %v2413_v43 = vmul.f32 0.5, %v2398_v51  ;;  %v7752_v51 = vrot.slane %v2574_v49, %v7138_v40 }
0x161e   :  { %6535 = verf.f32 %v2418_v62  ;;  %v2419_v50 = vmul.f32 0.70710677, %v2401_v27  ;;  %v2414_v35 = vmul.f32 0.5, %v2401_v27 }
0x1620   :  { %6537 = verf.f32 %v2419_v50 }
0x1621   :  { %v2405_v4 = vpop.f32.mrb[64].mxu0 }
0x1622   :  { %v2406_v33 = vadd.f32 %v2405_v4, %v7663_v13  ;;  %v5957_v30 = vpop.f32.mrb[65].mxu0 }
0x1623   :  { %v2408_v32 = vpop.f32.mrb[66].mxu0 }
0x1624   :  { %v2420_v63 = vmul.f32 0.70710677, %v2406_v33  ;;  %v5958_v22 = vpop.f32.mrb[67].mxu0  ;;  %v2415_v39 = vmul.f32 0.5, %v2406_v33 }
0x1626   :  { %6539 = verf.f32 %v2420_v63 }
0x1628   :  { %v6536_v23 = vpop.eup %6535 }
0x1629   :  { %v2428_v24 = vadd.f32 1.0, %v6536_v23 }
0x162a   :  { %v6538_v31 = vpop.eup %6537 }
0x162b   :  { %v2429_v21 = vadd.f32 1.0, %v6538_v31  ;;  %v2433_v36 = vmul.f32 %v2428_v24, %v2413_v43 }
0x162d   :  { %v2434_v28 = vmul.f32 %v2429_v21, %v2414_v35 }
0x162f   :  { %v2453_v20 = vpack.c.bf16 %v2434_v28, %v2433_v36 }
0x1630   :  { %v6540_v44 = vpop.eup %6539 }
0x1631   :  { %v2430_v42 = vadd.f32 1.0, %v6540_v44  ;;  %5980 = vmatmul.mubr.bf16.gmra.mrb[72].mxu1 %v2453_v20 }
0x1632   :  { %5983 = vmatprep.mubr.msk.bf16.mxu1 %vm6848_vm0, %v6847_v0 }
0x1633   :  { %v2435_v13 = vmul.f32 %v2430_v42, %v2415_v39 }
0x1635   :  { %v2454_v45 = vpack.c.bf16 %v2435_v13, %v2435_v13 }
0x1639   :  { %5984 = vmatmul.mubr.bf16.gmra.mrb[76].mxu1 %v2454_v45 }
0x163a   :  { %6035 = vmatprep.mubr.msk.bf16.mxu1 %vm6848_vm0, %v6847_v0 }
0x1667   :  { %v2577_v7 = vpop.xlane.xlu0 %2576 }
0x1668   :  { %v2590_v48 = vmul.f32 0.015625, %v2577_v7  ;;  %v6379_v7 = vld [vmem:[%s8404_s3 + $0xa0] sm:$0xff]  }
0x1669   :  { %v2580_v53 = vpop.xlane.xlu1 %2579 }
0x166a   :  { %v2591_v55 = vmul.f32 0.015625, %v2580_v53  ;;  %v2620_v1 = vmul.f32 %v2590_v48, %v2590_v48  ;;  %v2630_v57 = vsub.f32 %v7692_v58, %v2590_v48  ;;  %v6381_v48 = vld [vmem:[%s8404_s3 + $0xb0] sm:$0xff]   ;;  %v6382_v53 = vld [vmem:[%s8404_s3 + $0xb8] sm:$0xff]  }
0x166b   :  { %v2602_v61 = vpop.xlane.xlu0 %2601 }
0x166c   :  { %v2615_v6 = vmul.f32 0.015625, %v2602_v61  ;;  %v2621_v26 = vmul.f32 %v2591_v55, %v2591_v55  ;;  %v2631_v3 = vsub.f32 %v7696_v5, %v2591_v55 }
0x166d   :  { %v2605_v10 = vpop.xlane.xlu1 %2604 }
0x166e   :  { %v2625_v9 = vsub.f32 %v2615_v6, %v2620_v1  ;;  %v2616_v14 = vmul.f32 0.015625, %v2605_v10 }
0x1670   :  { %v2635_v37 = vadd.f32 1e-05, %v2625_v9  ;;  %v2626_v2 = vsub.f32 %v2616_v14, %v2621_v26 }
0x1672   :  { %6541 = vrsqrt.f32 %v2635_v37  ;;  %v2636_v16 = vadd.f32 1e-05, %v2626_v2 }
0x1674   :  { %6543 = vrsqrt.f32 %v2636_v16 }
0x167c   :  { %v6542_v19 = vpop.eup %6541 }
0x167d   :  { %v2645_v38 = vmul.f32 %v6542_v19, %v2630_v57 }
0x167e   :  { %v6544_v52 = vpop.eup %6543 }
0x167f   :  { %v2654_v56 = vmul.f32 %v7748_v15, %v2645_v38  ;;  %v2646_v60 = vmul.f32 %v6544_v52, %v2631_v3 }
0x1681   :  { %v2655_v62 = vmul.f32 %v7748_v15, %v2646_v60  ;;  %v2663_v27 = vadd.f32 %v7752_v51, %v2654_v56 }
0x1683   :  { %v2664_v29 = vadd.f32 %v7752_v51, %v2655_v62 }
0x1685   :  { %v7758_v50 = vpack.c.bf16 %v2664_v29, %v2663_v27 }
0x1687   :  { %5996 = vmatmul.mubr.msk.bf16.vlgmr.msra.gmra.mrb[68].mxu0 %vm165_vm1, %v7758_v50  ;;  %6036 = vmatmul.mubr.msk.bf16.vlgmr.msra.gmra.mrb[80].mxu1 %vm165_vm1, %v7758_v50 }
0x1688   :  { %5999 = vmatprep.mubr.msk.bf16.mxu0 %vm6848_vm0, %v6847_v0  ;;  %6039 = vmatprep.mubr.msk.bf16.mxu1 %vm6848_vm0, %v6847_v0 }
0x1689   :  { %6008 = vmatpush3.bf16.msra.mxu0 %v6379_v7 }
0x168a   :  { %6009 = vmatprep.subr.bf16.mxu0 %v6847_v0 }
0x1704   :  { %v2545_v4 = vpop.f32.mrb[72].mxu1 }
0x1705   :  { %v2561_v33 = vadd.f32 %v2545_v4, %v7634_v54  ;;  %v5981_v30 = vpop.f32.mrb[73].mxu1 }
0x1706   :  { %v2548_v32 = vpop.f32.mrb[74].mxu1 }
0x1707   :  { %v7770_v63 = vadd.f32 %v7688_v47, %v2561_v33  ;;  %v2562_v22 = vadd.f32 %v2548_v32, %v7638_v59  ;;  %v5982_v23 = vpop.f32.mrb[75].mxu1 }
0x1709   :  { %v7774_v24 = vadd.f32 %v7688_v47, %v2562_v22  ;;  %v2581_v31 = vsel %vm165_vm1, %v7770_v63, 0.0  ;;  %v2597_v43 = vmul.f32 %v7770_v63, %v7770_v63 }
0x170a   :  { %2582 = vadd.xlane.f32.xlu0 %v2581_v31 }
0x170b   :  { %v2584_v54 = vsel %vm165_vm1, %v7774_v24, 0.0  ;;  %v2598_v35 = vmul.f32 %v7774_v24, %v7774_v24  ;;  %v2606_v28 = vsel %vm165_vm1, %v2597_v43, 0.0 }
0x170c   :  { %2585 = vadd.xlane.f32.xlu1 %v2584_v54  ;;  %v2553_v21 = vpop.f32.mrb[76].mxu1 }
0x170d   :  { %v2563_v59 = vadd.f32 %v2553_v21, %v7651_v18  ;;  %v5985_v36 = vpop.f32.mrb[77].mxu1  ;;  %v2609_v42 = vsel %vm165_vm1, %v2598_v35, 0.0 }
0x170e   :  { %2607 = vadd.xlane.f32.xlu0 %v2606_v28  ;;  %v2556_v20 = vpop.f32.mrb[78].mxu1 }
0x170f   :  { %v7787_v44 = vadd.f32 %v7688_v47, %v2563_v59  ;;  %v5986_v39 = vpop.f32.mrb[79].mxu1  ;;  %v6380_v47 = vld [vmem:[%s8404_s3 + $0xa8] sm:$0xff]  }
0x1710   :  { %2610 = vadd.xlane.f32.xlu1 %v2609_v42  ;;  %6010 = vmatpush3.bf16.msra.mxu0 %v6380_v47 }
0x1711   :  { %v2587_v13 = vsel %vm244_vm2, %v7787_v44, 0.0  ;;  %v2599_v45 = vmul.f32 %v7787_v44, %v7787_v44  ;;  %6011 = vmatprep.subr.bf16.mxu0 %v6847_v0 }
0x1712   :  { %2588 = vadd.xlane.f32.xlu0 %v2587_v13 }
0x1713   :  { %v2612_v18 = vsel %vm244_vm2, %v2599_v45, 0.0 }
0x1714   :  { %2613 = vadd.xlane.f32.xlu1 %v2612_v18  ;;  %6012 = vmatpush3.bf16.msra.mxu0 %v6381_v48 }
0x1715   :  { %6013 = vmatprep.subr.bf16.mxu0 %v6847_v0 }
0x1718   :  { %6014 = vmatpush3.bf16.msra.mxu0 %v6382_v53 }
0x175a   :  { %v2747_v55 = vpop.f32.mrb[68].mxu0  ;;  %v2925_v61 = vpop.f32.mrb[80].mxu1 }
0x175b   :  { %v5997_v1 = vpop.f32.mrb[69].mxu0  ;;  %v6037_v6 = vpop.f32.mrb[81].mxu1 }
0x175c   :  { %v2750_v10 = vpop.f32.mrb[70].mxu0  ;;  %v2928_v26 = vpop.f32.mrb[82].mxu1 }
0x175d   :  { %v7810_v9 = vpack.c.bf16 %v2750_v10, %v2747_v55  ;;  %v7812_v14 = vpack.c.bf16 %v2928_v26, %v2925_v61  ;;  %v5998_v37 = vpop.f32.mrb[71].mxu0  ;;  %v6038_v2 = vpop.f32.mrb[83].mxu1 }
0x175f   :  { %6055 = vmatprep.subr.bf16.mxu1 %v7812_v14 }
0x1760   :  { %6056 = vmatpush3.bf16.msra.mxu1 %v7812_v14 }
0x1797   :  { %v2583_v16 = vpop.xlane.xlu0 %2582 }
0x1798   :  { %v2592_v49 = vmul.f32 0.015625, %v2583_v16 }
0x1799   :  { %v2586_v57 = vpop.xlane.xlu1 %2585 }
0x179a   :  { %v2593_v19 = vmul.f32 0.015625, %v2586_v57  ;;  %v2622_v38 = vmul.f32 %v2592_v49, %v2592_v49  ;;  %v2632_v35 = vsub.f32 %v7770_v63, %v2592_v49 }
0x179b   :  { %v2608_v3 = vpop.xlane.xlu0 %2607 }
0x179c   :  { %v2617_v52 = vmul.f32 0.015625, %v2608_v3  ;;  %v2623_v60 = vmul.f32 %v2593_v19, %v2593_v19  ;;  %v2633_v59 = vsub.f32 %v7774_v24, %v2593_v19 }
0x179d   :  { %v2611_v56 = vpop.xlane.xlu1 %2610 }
0x179e   :  { %v2627_v62 = vsub.f32 %v2617_v52, %v2622_v38  ;;  %v2618_v27 = vmul.f32 0.015625, %v2611_v56 }
0x179f   :  { %v2589_v29 = vpop.xlane.xlu0 %2588 }
0x17a0   :  { %v2637_v4 = vadd.f32 1e-05, %v2627_v62  ;;  %v2628_v33 = vsub.f32 %v2618_v27, %v2623_v60  ;;  %v2594_v30 = vmul.f32 0.015625, %v2589_v29 }
0x17a1   :  { %v2614_v32 = vpop.xlane.xlu1 %2613 }
0x17a2   :  { %6545 = vrsqrt.f32 %v2637_v4  ;;  %v2638_v22 = vadd.f32 1e-05, %v2628_v33  ;;  %v2624_v23 = vmul.f32 %v2594_v30, %v2594_v30  ;;  %v2619_v31 = vmul.f32 0.015625, %v2614_v32 }
0x17a3   :  { %v2634_v13 = vsub.f32 %v7787_v44, %v2594_v30 }
0x17a4   :  { %6547 = vrsqrt.f32 %v2638_v22  ;;  %v2629_v43 = vsub.f32 %v2619_v31, %v2624_v23 }
0x17a6   :  { %v2639_v54 = vadd.f32 1e-05, %v2629_v43 }
0x17a8   :  { %6549 = vrsqrt.f32 %v2639_v54 }
0x17ac   :  { %v6546_v21 = vpop.eup %6545 }
0x17ad   :  { %v2647_v36 = vmul.f32 %v6546_v21, %v2632_v35 }
0x17ae   :  { %v6548_v28 = vpop.eup %6547 }
0x17af   :  { %v2648_v20 = vmul.f32 %v6548_v28, %v2633_v59  ;;  %v2656_v39 = vmul.f32 %v7748_v15, %v2647_v36 }
0x17b1   :  { %v2657_v42 = vmul.f32 %v7748_v15, %v2648_v20  ;;  %v2665_v18 = vadd.f32 %v7752_v51, %v2656_v39 }
0x17b2   :  { %v6550_v45 = vpop.eup %6549 }
0x17b3   :  { %v2666_v7 = vadd.f32 %v7752_v51, %v2657_v42  ;;  %v2649_v47 = vmul.f32 %v6550_v45, %v2634_v13 }
0x17b5   :  { %v2669_v48 = vpack.c.bf16 %v2666_v7, %v2665_v18  ;;  %v2658_v53 = vmul.f32 %v7748_v15, %v2649_v47 }
0x17b7   :  { %6000 = vmatmul.mubr.msk.bf16.gmra.mrb[72].mxu0 %vm165_vm1, %v2669_v48  ;;  %6040 = vmatmul.mubr.msk.bf16.gmra.mrb[84].mxu1 %vm165_vm1, %v2669_v48  ;;  %v2667_v55 = vadd.f32 %v7752_v51, %v2658_v53 }
0x17b8   :  { %6003 = vmatprep.mubr.msk.bf16.mxu0 %vm6848_vm0, %v6847_v0  ;;  %6043 = vmatprep.mubr.msk.bf16.mxu1 %vm6848_vm0, %v6847_v0 }
0x17b9   :  { %v2670_v61 = vpack.c.bf16 %v2667_v55, %v2667_v55 }
0x17bf   :  { %6004 = vmatmul.mubr.msk.bf16.gmra.mrb[76].mxu0 %vm165_vm1, %v2670_v61  ;;  %6044 = vmatmul.mubr.msk.bf16.gmra.mrb[88].mxu1 %vm165_vm1, %v2670_v61 }
0x17c0   :  { %6015 = vmatprep.mubr.msk.bf16.mxu0 %vm6848_vm0, %v6847_v0 }
0x17c7   :  { %6016 = vmatmul.mubr.msk.bf16.vlgmr.msra.gmra.mrb[80].mxu0 %vm165_vm1, %v7758_v50 }
0x17c8   :  { %6019 = vmatprep.mubr.msk.bf16.mxu0 %vm6848_vm0, %v6847_v0 }
0x17cf   :  { %6020 = vmatmul.mubr.msk.bf16.gmra.mrb[84].mxu0 %vm165_vm1, %v2669_v48 }
0x17d0   :  { %6023 = vmatprep.mubr.msk.bf16.mxu0 %vm6848_vm0, %v6847_v0 }
0x17d7   :  { %6024 = vmatmul.mubr.msk.bf16.gmra.mrb[88].mxu0 %vm165_vm1, %v2670_v61 }
0x17d8   :  { %6051 = vmatprep.mubr.msk.bf16.mxu0 %vm609_vm3, %v7810_v9 }
0x188a   :  { %v2755_v15 = vpop.f32.mrb[72].mxu0  ;;  %v2933_v51 = vpop.f32.mrb[84].mxu1 }
0x188b   :  { %v7845_v1 = vpack.c.bf16 %v2933_v51, %v2933_v51  ;;  %v6001_v6 = vpop.f32.mrb[73].mxu0  ;;  %v6041_v10 = vpop.f32.mrb[85].mxu1 }
0x188c   :  { %v2758_v50 = vpop.f32.mrb[74].mxu0  ;;  %v2936_v26 = vpop.f32.mrb[86].mxu1 }
0x188d   :  { %v3666_v37 = vpack.c.bf16 %v2758_v50, %v2755_v15  ;;  %v3796_v2 = vpack.c.bf16 %v2936_v26, %v2933_v51  ;;  %v6002_v16 = vpop.f32.mrb[75].mxu0  ;;  %v6042_v49 = vpop.f32.mrb[87].mxu1  ;;  %v3058_v57 = vand.u32 %v7845_v1, %v7227_v11  ;;  %v7879_v26 = vpack.c.bf16 %v2755_v15, %v2755_v15 }
0x188f   :  { %v3673_v19 = vshll.u32 %v3666_v37, 16  ;;  %v3801_v3 = vshll.u32 %v3796_v2, 16  ;;  %6057 = vmatprep.subr.bf16.mxu1 %v3058_v57  ;;  %v3671_v32 = vshrl.u32 %v3666_v37, 16  ;;  %v3799_v22 = vshrl.u32 %v3796_v2, 16 }
0x1890   :  { %6058 = vmatpush3.bf16.msra.mxu1 %v3058_v57 }
0x1891   :  { %v3675_v56 = vrot.slane %v3673_v19, 1  ;;  %v3803_v60 = vrot.slane %v3801_v3, 1 }
0x1892   :  { %v2763_v38 = vpop.f32.mrb[76].mxu0  ;;  %v2941_v52 = vpop.f32.mrb[88].mxu1 }
0x1893   :  { %v7849_v62 = vpack.c.bf16 %v2763_v38, %v2763_v38  ;;  %v7851_v27 = vpack.c.bf16 %v2941_v52, %v2941_v52  ;;  %v6005_v29 = vpop.f32.mrb[77].mxu0  ;;  %v6045_v4 = vpop.f32.mrb[89].mxu1  ;;  %v3676_v35 = vor.u32 %v3675_v56, %v3671_v32  ;;  %v3804_v21 = vor.u32 %v3803_v60, %v3799_v22 }
0x1894   :  { %v2766_v33 = vpop.f32.mrb[78].mxu0  ;;  %v2944_v30 = vpop.f32.mrb[90].mxu1 }
0x1895   :  { %v3678_v23 = vshll.u32 %v7849_v62, 16  ;;  %v3806_v31 = vshll.u32 %v7851_v27, 16  ;;  %v6006_v43 = vpop.f32.mrb[79].mxu0  ;;  %v6046_v54 = vpop.f32.mrb[91].mxu1 }
0x1897   :  { %v3680_v59 = vrot.slane %v3678_v23, 1  ;;  %v3808_v36 = vrot.slane %v3806_v31, 1 }
0x1899   :  { %v7856_v28 = vsel %vm1341_vm4, %v3804_v21, %v3808_v36  ;;  %v7859_v20 = vsel %vm1341_vm4, %v3676_v35, %v3680_v59 }
0x189a   :  { %v2836_v39 = vpop.f32.mrb[80].mxu0 }
0x189b   :  { %v6017_v42 = vpop.f32.mrb[81].mxu0 }
0x189c   :  { %v2839_v13 = vpop.f32.mrb[82].mxu0 }
0x189d   :  { %v7861_v45 = vpack.c.bf16 %v2839_v13, %v2836_v39  ;;  %v6018_v18 = vpop.f32.mrb[83].mxu0 }
0x189f   :  { %3119 = vrot.lane.b32.xlu0 %v7861_v45, %s6849_s26  ;;  %6303 = vmatprep.subr.msk.bf16.mxu0 %vm609_vm3, %v7861_v45  ;;  %v2958_v7 = vsel %vm609_vm3, %v7861_v45, 0 }
0x18a0   :  { %6048 = vmatpush3.bf16.xpose.msra.mxu0 %v2958_v7 }
0x18a2   :  { %v2844_v47 = vpop.f32.mrb[84].mxu0 }
0x18a3   :  { %v7869_v48 = vpack.c.bf16 %v2844_v47, %v2844_v47  ;;  %v6021_v53 = vpop.f32.mrb[85].mxu0 }
0x18a4   :  { %v2847_v55 = vpop.f32.mrb[86].mxu0 }
0x18a5   :  { %v3668_v61 = vpack.c.bf16 %v2847_v55, %v2844_v47  ;;  %3121 = vrot.lane.b32.xlu1 %v7869_v48, %s6849_s26  ;;  %v6022_v51 = vpop.f32.mrb[87].mxu0  ;;  %6304 = vmatprep.subr.msk.bf16.mxu0 %vm609_vm3, %v7869_v48  ;;  %v2961_v10 = vsel %vm609_vm3, %v7869_v48, 0 }
0x18a7   :  { %v3687_v6 = vshll.u32 %v3668_v61, 16  ;;  %v3685_v57 = vshrl.u32 %v3668_v61, 16 }
0x18a8   :  { %6050 = vmatpush3.bf16.xpose.msra.mxu0 %v2961_v10 }
0x18a9   :  { %3113 = vrot.lane.b32.xlu1 %v7810_v9, %s6849_s26  ;;  %v3689_v37 = vrot.slane %v3687_v6, 1 }
0x18aa   :  { %v2852_v50 = vpop.f32.mrb[88].mxu0 }
0x18ab   :  { %v7881_v2 = vpack.c.bf16 %v2852_v50, %v2852_v50  ;;  %v6025_v16 = vpop.f32.mrb[89].mxu0  ;;  %v3690_v38 = vor.u32 %v3689_v37, %v3685_v57 }
0x18ac   :  { %v2855_v49 = vpop.f32.mrb[90].mxu0 }
0x18ad   :  { %v3692_v19 = vshll.u32 %v7881_v2, 16  ;;  %3115 = vrot.lane.b32.xlu1 %v7879_v26, %s6849_s26  ;;  %v6026_v3 = vpop.f32.mrb[91].mxu0 }
0x18af   :  { %v3694_v52 = vrot.slane %v3692_v19, 1  ;;  %6052 = vmatmul.mubr.msk.bf16.vlgmr.msra.gmra.mrb[92].mxu0 %vm609_vm3, %v7879_v26 }
0x18b1   :  { %v7889_v15 = vsel %vm1341_vm4, %v3690_v38, %v3694_v52 }
0x1911   :  { %v3120_v56 = vpop.permute.xlu0 %3119 }
0x1912   :  { %6305 = vmatprep.subr.msk.bf16.mxu0 %vm609_vm3, %v3120_v56  ;;  %v3130_v60 = vsel %vm609_vm3, %v3120_v56, 0 }
0x1913   :  { %6064 = vmatpush3.bf16.xpose.msra.mxu0 %v3130_v60 }
0x1917   :  { %v3122_v29 = vpop.permute.xlu1 %3121 }
0x1918   :  { %6306 = vmatprep.subr.msk.bf16.mxu0 %vm609_vm3, %v3122_v29  ;;  %v3133_v4 = vsel %vm609_vm3, %v3122_v29, 0 }
0x191b   :  { %v3114_v33 = vpop.permute.xlu1 %3113  ;;  %6066 = vmatpush3.bf16.xpose.msra.mxu0 %v3133_v4 }
0x191c   :  { %6067 = vmatprep.mubr.msk.bf16.mxu0 %vm609_vm3, %v3114_v33 }
0x191f   :  { %v3116_v30 = vpop.permute.xlu1 %3115 }
0x1922   :  { %6068 = vmatmul.mubr.msk.bf16.vlgmr.msra.gmra.mrb[96].mxu0 %vm609_vm3, %v3116_v30 }
0x1982   :  { %v6053_v32 = vpop.f32.mrb[92].mxu0 }
0x1983   :  { %v2997_v22 = vpop.f32.mrb[93].mxu0  ;;  %v3013_v54 = vmul.f32 0.25, %v6053_v32 }
0x1984   :  { %v3011_v23 = vmul.f32 0.25, %v2997_v22  ;;  %v6054_v31 = vpop.f32.mrb[94].mxu0 }
0x1985   :  { %v3000_v43 = vpop.f32.mrb[95].mxu0  ;;  %v3020_v36 = vsel %vm680_vm7, %v3013_v54, -inf }
0x1986   :  { %v3012_v35 = vmul.f32 0.25, %v3000_v43  ;;  %v3014_v21 = vsel %vm673_vm6, %v3011_v23, -inf }
0x1987   :  { %3015 = vmax.xlane.f32.xlu0 %v3014_v21 }
0x1988   :  { %v3017_v59 = vsel %vm673_vm6, %v3012_v35, -inf }
0x1989   :  { %3018 = vmax.xlane.f32.xlu1 %v3017_v59 }
0x198b   :  { %3021 = vmax.xlane.f32.xlu0 %v3020_v36 }
0x19f5   :  { %v6069_v39 = vpop.f32.mrb[96].mxu0 }
0x19f6   :  { %v3185_v42 = vmul.f32 0.25, %v6069_v39  ;;  %v3169_v13 = vpop.f32.mrb[97].mxu0 }
0x19f7   :  { %v3183_v18 = vmul.f32 0.25, %v3169_v13  ;;  %v6070_v7 = vpop.f32.mrb[98].mxu0 }
0x19f8   :  { %v3172_v47 = vpop.f32.mrb[99].mxu0  ;;  %v3192_v53 = vsel %vm680_vm7, %v3185_v42, -inf }
0x19f9   :  { %v3184_v55 = vmul.f32 0.25, %v3172_v47  ;;  %3193 = vmax.xlane.f32.xlu1 %v3192_v53  ;;  %v3186_v61 = vsel %vm673_vm6, %v3183_v18, -inf }
0x19fa   :  { %3187 = vmax.xlane.f32.xlu0 %v3186_v61 }
0x19fb   :  { %v3189_v51 = vsel %vm673_vm6, %v3184_v55, -inf }
0x19fe   :  { %3190 = vmax.xlane.f32.xlu0 %v3189_v51 }
0x1a14   :  { %v3016_v6 = vpop.xlane.xlu0 %3015 }
0x1a15   :  { %v3023_v50 = vsub.f32 %v3011_v23, %v3016_v6 }
0x1a16   :  { %v3019_v10 = vpop.xlane.xlu1 %3018 }
0x1a17   :  { %v3024_v37 = vsub.f32 %v3012_v35, %v3019_v10  ;;  %v3026_v19 = vmul.f32 1.442695, %v3023_v50 }
0x1a18   :  { %v3022_v16 = vpop.xlane.xlu0 %3021 }
0x1a19   :  { %v3028_v49 = vmul.f32 1.442695, %v3024_v37  ;;  %v3025_v57 = vsub.f32 %v3013_v54, %v3022_v16 }
0x1a1b   :  { %6551 = vpow2.f32 %v3028_v49  ;;  %v3030_v3 = vmul.f32 1.442695, %v3025_v57 }
0x1a1d   :  { %6553 = vpow2.f32 %v3030_v3 }
0x1a1e   :  { %6555 = vpow2.f32 %v3026_v19 }
0x1a25   :  { %v6552_v38 = vpop.eup %6551 }
0x1a26   :  { %v3035_v52 = vsel %vm673_vm6, %v6552_v38, 0.0 }
0x1a27   :  { %v6554_v56 = vpop.eup %6553  ;;  %3036 = vadd.xlane.f32.xlu1 %v3035_v52 }
0x1a28   :  { %v3038_v60 = vsel %vm680_vm7, %v6554_v56, 0.0  ;;  %v6556_v29 = vpop.eup %6555 }
0x1a29   :  { %3039 = vadd.xlane.f32.xlu0 %v3038_v60  ;;  %v3032_v4 = vsel %vm673_vm6, %v6556_v29, 0.0 }
0x1a2d   :  { %3033 = vadd.xlane.f32.xlu0 %v3032_v4 }
0x1a86   :  { %v3194_v33 = vpop.xlane.xlu1 %3193 }
0x1a87   :  { %v3197_v30 = vsub.f32 %v3185_v42, %v3194_v33  ;;  %v3188_v32 = vpop.xlane.xlu0 %3187 }
0x1a88   :  { %v3195_v22 = vsub.f32 %v3183_v18, %v3188_v32 }
0x1a89   :  { %v3202_v23 = vmul.f32 1.442695, %v3197_v30 }
0x1a8a   :  { %v3198_v31 = vmul.f32 1.442695, %v3195_v22 }
0x1a8b   :  { %6557 = vpow2.f32 %v3202_v23  ;;  %v3191_v43 = vpop.xlane.xlu0 %3190 }
0x1a8c   :  { %v3196_v54 = vsub.f32 %v3184_v55, %v3191_v43  ;;  %6559 = vpow2.f32 %v3198_v31 }
0x1a8e   :  { %v3200_v35 = vmul.f32 1.442695, %v3196_v54 }
0x1a90   :  { %6561 = vpow2.f32 %v3200_v35 }
0x1a95   :  { %v6558_v21 = vpop.eup %6557 }
0x1a96   :  { %v3210_v59 = vsel %vm680_vm7, %v6558_v21, 0.0  ;;  %v6560_v36 = vpop.eup %6559 }
0x1a97   :  { %3211 = vadd.xlane.f32.xlu1 %v3210_v59  ;;  %v3204_v13 = vsel %vm673_vm6, %v6560_v36, 0.0 }
0x1a9a   :  { %v6562_v39 = vpop.eup %6561 }
0x1a9b   :  { %3205 = vadd.xlane.f32.xlu1 %v3204_v13  ;;  %v3207_v42 = vsel %vm673_vm6, %v6562_v39, 0.0 }
0x1a9c   :  { %3208 = vadd.xlane.f32.xlu0 %v3207_v42 }
0x1aac   :  { %3225 = vrot.lane.b32.xlu1 %v7845_v1, %s6849_s26 }
0x1ab0   :  { %3304 = vrot.lane.b32.xlu1 %v7861_v45, %s6851_s28 }
0x1ab2   :  { %3223 = vrot.lane.b32.xlu0 %v7812_v14, %s6849_s26 }
0x1ab4   :  { %3306 = vrot.lane.b32.xlu1 %v7869_v48, %s6851_s28  ;;  %v3037_v18 = vpop.xlane.xlu1 %3036 }
0x1ab6   :  { %3300 = vrot.lane.b32.xlu0 %v7810_v9, %s6851_s28  ;;  %v3040_v7 = vpop.xlane.xlu0 %3039 }
0x1ab7   :  { %6563 = vrcp.f32 %v3040_v7 }
0x1ab8   :  { %3302 = vrot.lane.b32.xlu1 %v7879_v26, %s6851_s28  ;;  %6565 = vrcp.f32 %v3037_v18 }
0x1aba   :  { %v3034_v47 = vpop.xlane.xlu0 %3033 }
0x1abb   :  { %6567 = vrcp.f32 %v3034_v47 }
0x1ac1   :  { %v6564_v53 = vpop.eup %6563 }
0x1ac2   :  { %v6566_v55 = vpop.eup %6565  ;;  %v3046_v51 = vmul.f32 %v6564_v53, %v6554_v56 }
0x1ac3   :  { %v3045_v10 = vmul.f32 %v6566_v55, %v6552_v38 }
0x1ac4   :  { %v3048_v37 = vpack.c.bf16 %v3046_v51, %v3046_v51 }
0x1ac5   :  { %v6568_v61 = vpop.eup %6567 }
0x1ac6   :  { %v3044_v6 = vmul.f32 %v6568_v61, %v6556_v29 }
0x1ac8   :  { %v3047_v50 = vpack.c.bf16 %v3045_v10, %v3044_v6 }
0x1aca   :  { %6059 = vmatprep.mubr.msk.bf16.mxu1 %vm673_vm6, %v3047_v50 }
0x1acb   :  { %6060 = vmatmul.mubr.msk.bf16.vlgmr.msra.gmra.mrb[92].mxu1 %vm673_vm6, %v3048_v37 }
0x1b24   :  { %v3212_v16 = vpop.xlane.xlu1 %3211 }
0x1b25   :  { %6569 = vrcp.f32 %v3212_v16 }
0x1b28   :  { %v3206_v49 = vpop.xlane.xlu1 %3205 }
0x1b29   :  { %6571 = vrcp.f32 %v3206_v49  ;;  %v3209_v57 = vpop.xlane.xlu0 %3208 }
0x1b2a   :  { %6573 = vrcp.f32 %v3209_v57 }
0x1b2c   :  { %v3226_v19 = vpop.permute.xlu1 %3225 }
0x1b2d   :  { %v3235_v3 = vand.u32 %v3226_v19, %v7227_v11  ;;  %v3224_v52 = vpop.permute.xlu0 %3223 }
0x1b2e   :  { %6071 = vmatprep.subr.bf16.mxu1 %v3224_v52 }
0x1b2f   :  { %6072 = vmatpush3.bf16.msra.mxu1 %v3224_v52  ;;  %v6570_v38 = vpop.eup %6569 }
0x1b30   :  { %6073 = vmatprep.subr.bf16.mxu1 %v3235_v3  ;;  %v3305_v60 = vpop.permute.xlu1 %3304  ;;  %v3218_v33 = vmul.f32 %v6570_v38, %v6558_v21 }
0x1b31   :  { %v3301_v23 = vpop.permute.xlu0 %3300  ;;  %v3315_v31 = vsel %vm609_vm3, %v3305_v60, 0 }
0x1b32   :  { %v3220_v22 = vpack.c.bf16 %v3218_v33, %v3218_v33 }
0x1b33   :  { %v6572_v56 = vpop.eup %6571  ;;  %6074 = vmatpush3.bf16.msra.mxu1 %v3235_v3 }
0x1b34   :  { %v6574_v29 = vpop.eup %6573  ;;  %6307 = vmatprep.subr.msk.bf16.mxu1 %vm609_vm3, %v3305_v60  ;;  %v3216_v4 = vmul.f32 %v6572_v56, %v6560_v36  ;;  %v3307_v43 = vpop.permute.xlu1 %3306 }
0x1b35   :  { %v3217_v30 = vmul.f32 %v6574_v29, %v6562_v39  ;;  %v3318_v54 = vsel %vm609_vm3, %v3307_v43, 0 }
0x1b37   :  { %v3219_v32 = vpack.c.bf16 %v3217_v30, %v3216_v4 }
0x1b38   :  { %v3303_v35 = vpop.permute.xlu1 %3302 }
0x1b39   :  { %6075 = vmatprep.mubr.msk.bf16.mxu1 %vm673_vm6, %v3219_v32 }
0x1b3a   :  { %6076 = vmatmul.mubr.msk.bf16.vlgmr.msra.gmra.mrb[96].mxu1 %vm673_vm6, %v3220_v22 }
0x1b3b   :  { %6083 = vmatprep.mubr.msk.bf16.mxu1 %vm609_vm3, %v3301_v23 }
0x1b3c   :  { %6080 = vmatpush3.bf16.xpose.msra.mxu1 %v3315_v31 }
0x1b3d   :  { %6308 = vmatprep.subr.msk.bf16.mxu1 %vm609_vm3, %v3307_v43 }
0x1b44   :  { %6082 = vmatpush3.bf16.xpose.msra.mxu1 %v3318_v54 }
0x1b4b   :  { %6084 = vmatmul.mubr.msk.bf16.vlgmr.msra.gmra.mrb[100].mxu1 %vm609_vm3, %v3303_v35 }
0x1b9e   :  { %v6061_v21 = vpop.f32.mrb[92].mxu1 }
0x1b9f   :  { %3110 = vst.msk [vmem:[#allocation2 + $0x10] sm:$0x1] %vm774_vm8, %v6061_v21  ;;  %v3094_v59 = vpop.f32.mrb[93].mxu1 }
0x1ba0   :  { %3108 = vst.msk [vmem:[#allocation2] sm:$0xff] %vm609_vm3, %v3094_v59  ;;  %v6062_v36 = vpop.f32.mrb[94].mxu1 }
0x1ba1   :  { %v3097_v39 = vpop.f32.mrb[95].mxu1 }
0x1ba2   :  { %3109 = vst.msk [vmem:[#allocation2 + $0x8] sm:$0xff] %vm609_vm3, %v3097_v39 }
0x1c0d   :  { %v7935_v13 = vpop.f32.mrb[96].mxu1 }
0x1c0e   :  { %v7937_v42 = vpop.f32.mrb[97].mxu1 }
0x1c0f   :  { %v6078_v18 = vpop.f32.mrb[98].mxu1 }
0x1c10   :  { %v7939_v7 = vpop.f32.mrb[99].mxu1 }
0x1c1e   :  { %v6085_v47 = vpop.f32.mrb[100].mxu1 }
0x1c1f   :  { %v3354_v53 = vpop.f32.mrb[101].mxu1  ;;  %v3370_v6 = vmul.f32 0.25, %v6085_v47 }
0x1c20   :  { %v3368_v55 = vmul.f32 0.25, %v3354_v53  ;;  %v6086_v61 = vpop.f32.mrb[102].mxu1 }
0x1c21   :  { %v3357_v51 = vpop.f32.mrb[103].mxu1  ;;  %v3377_v16 = vsel %vm680_vm7, %v3370_v6, -inf }
0x1c22   :  { %v3369_v10 = vmul.f32 0.25, %v3357_v51  ;;  %v3371_v50 = vsel %vm673_vm6, %v3368_v55, -inf }
0x1c23   :  { %3372 = vmax.xlane.f32.xlu0 %v3371_v50 }
0x1c24   :  { %v3374_v37 = vsel %vm673_vm6, %v3369_v10, -inf }
0x1c25   :  { %3375 = vmax.xlane.f32.xlu1 %v3374_v37 }
0x1c27   :  { %3378 = vmax.xlane.f32.xlu0 %v3377_v16 }
0x1cb0   :  { %v3373_v49 = vpop.xlane.xlu0 %3372 }
0x1cb1   :  { %v3380_v57 = vsub.f32 %v3368_v55, %v3373_v49 }
0x1cb2   :  { %v3376_v19 = vpop.xlane.xlu1 %3375 }
0x1cb3   :  { %v3383_v3 = vmul.f32 1.442695, %v3380_v57  ;;  %v3381_v52 = vsub.f32 %v3369_v10, %v3376_v19  ;;  %v7969_v10 = vshrl.u32 %v7851_v27, 16 }
0x1cb4   :  { %v3379_v38 = vpop.xlane.xlu0 %3378 }
0x1cb5   :  { %6575 = vpow2.f32 %v3383_v3  ;;  %v3385_v56 = vmul.f32 1.442695, %v3381_v52  ;;  %v3382_v60 = vsub.f32 %v3370_v6, %v3379_v38  ;;  %v3820_v37 = vand.u32 %v7969_v10, %v7227_v11 }
0x1cb7   :  { %6577 = vpow2.f32 %v3385_v56  ;;  %v3387_v29 = vmul.f32 1.442695, %v3382_v60 }
0x1cb9   :  { %6579 = vpow2.f32 %v3387_v29 }
0x1cbf   :  { %v6576_v4 = vpop.eup %6575 }
0x1cc0   :  { %v3389_v33 = vsel %vm673_vm6, %v6576_v4, 0.0 }
0x1cc1   :  { %v6578_v30 = vpop.eup %6577  ;;  %3390 = vadd.xlane.f32.xlu0 %v3389_v33 }
0x1cc2   :  { %v3392_v23 = vsel %vm673_vm6, %v6578_v30, 0.0 }
0x1cc3   :  { %v6580_v32 = vpop.eup %6579 }
0x1cc4   :  { %v3395_v22 = vsel %vm680_vm7, %v6580_v32, 0.0 }
0x1cc5   :  { %3396 = vadd.xlane.f32.xlu1 %v3395_v22  ;;  %3393 = vadd.xlane.f32.xlu0 %v3392_v23 }
0x1cd6   :  { %3408 = vrot.lane.b32.xlu1 %v7845_v1, %s6851_s28 }
0x1cda   :  { %3487 = vrot.lane.b32.xlu1 %v7861_v45, %s6852_s2 }
0x1cdb   :  { %3406 = vrot.lane.b32.xlu0 %v7812_v14, %s6851_s28 }
0x1cde   :  { %3489 = vrot.lane.b32.xlu1 %v7869_v48, %s6852_s2 }
0x1cdf   :  { %3483 = vrot.lane.b32.xlu0 %v7810_v9, %s6852_s2 }
0x1ce2   :  { %3485 = vrot.lane.b32.xlu1 %v7879_v26, %s6852_s2 }
0x1d4e   :  { %v3391_v31 = vpop.xlane.xlu0 %3390 }
0x1d4f   :  { %6581 = vrcp.f32 %v3391_v31 }
0x1d52   :  { %v3394_v43 = vpop.xlane.xlu0 %3393  ;;  %v3397_v54 = vpop.xlane.xlu1 %3396 }
0x1d53   :  { %6583 = vrcp.f32 %v3394_v43 }
0x1d54   :  { %6585 = vrcp.f32 %v3397_v54 }
0x1d56   :  { %v3407_v35 = vpop.permute.xlu0 %3406  ;;  %v3409_v45 = vpop.permute.xlu1 %3408 }
0x1d57   :  { %v3418_v21 = vand.u32 %v3409_v45, %v7227_v11  ;;  %6087 = vmatprep.subr.bf16.mxu0 %v3407_v35 }
0x1d58   :  { %6088 = vmatpush3.bf16.msra.mxu0 %v3407_v35 }
0x1d59   :  { %6089 = vmatprep.subr.bf16.mxu0 %v3418_v21  ;;  %v6582_v48 = vpop.eup %6581 }
0x1d5a   :  { %v3488_v59 = vpop.permute.xlu1 %3487  ;;  %v3401_v36 = vmul.f32 %v6582_v48, %v6576_v4  ;;  %v3484_v55 = vpop.permute.xlu0 %3483 }
0x1d5b   :  { %v3498_v61 = vsel %vm609_vm3, %v3488_v59, 0 }
0x1d5c   :  { %6090 = vmatpush3.bf16.msra.mxu0 %v3418_v21 }
0x1d5d   :  { %v6584_v9 = vpop.eup %6583  ;;  %6309 = vmatprep.subr.msk.bf16.mxu0 %vm609_vm3, %v3488_v59 }
0x1d5e   :  { %v6586_v26 = vpop.eup %6585  ;;  %v3402_v39 = vmul.f32 %v6584_v9, %v6578_v30  ;;  %v3490_v51 = vpop.permute.xlu1 %3489 }
0x1d5f   :  { %v3403_v18 = vmul.f32 %v6586_v26, %v6580_v32  ;;  %v3501_v6 = vsel %vm609_vm3, %v3490_v51, 0 }
0x1d60   :  { %v3404_v47 = vpack.c.bf16 %v3402_v39, %v3401_v36 }
0x1d61   :  { %v3405_v53 = vpack.c.bf16 %v3403_v18, %v3403_v18 }
0x1d62   :  { %6091 = vmatprep.mubr.msk.bf16.mxu0 %vm673_vm6, %v3404_v47  ;;  %v3486_v50 = vpop.permute.xlu1 %3485 }
0x1d63   :  { %6092 = vmatmul.mubr.msk.bf16.vlgmr.msra.gmra.mrb[100].mxu0 %vm673_vm6, %v3405_v53 }
0x1d64   :  { %6099 = vmatprep.mubr.msk.bf16.mxu0 %vm609_vm3, %v3484_v55 }
0x1d65   :  { %6096 = vmatpush3.bf16.xpose.msra.mxu0 %v3498_v61 }
0x1d66   :  { %6310 = vmatprep.subr.msk.bf16.mxu0 %vm609_vm3, %v3490_v51 }
0x1d6d   :  { %6098 = vmatpush3.bf16.xpose.msra.mxu0 %v3501_v6 }
0x1d6e   :  { %6119 = vmatprep.subr.bf16.mxu0 %v7856_v28 }
0x1d74   :  { %6100 = vmatmul.mubr.msk.bf16.vlgmr.msra.gmra.mrb[104].mxu0 %vm609_vm3, %v3486_v50 }
0x1d75   :  { %6120 = vmatpush3.bf16.msra.mxu0 %v7856_v28 }
0x1d76   :  { %6121 = vmatprep.subr.bf16.mxu0 %v3820_v37 }
0x1d79   :  { %6122 = vmatpush3.bf16.msra.mxu0 %v3820_v37 }
0x1e36   :  { %v7975_v16 = vpop.f32.mrb[100].mxu0 }
0x1e37   :  { %v7977_v49 = vpop.f32.mrb[101].mxu0 }
0x1e38   :  { %v6094_v57 = vpop.f32.mrb[102].mxu0 }
0x1e39   :  { %v7979_v19 = vpop.f32.mrb[103].mxu0 }
0x1e47   :  { %v6101_v3 = vpop.f32.mrb[104].mxu0 }
0x1e48   :  { %v3537_v27 = vpop.f32.mrb[105].mxu0  ;;  %v3553_v60 = vmul.f32 0.25, %v6101_v3 }
0x1e49   :  { %v3551_v52 = vmul.f32 0.25, %v3537_v27  ;;  %v6102_v38 = vpop.f32.mrb[106].mxu0 }
0x1e4a   :  { %v3540_v56 = vpop.f32.mrb[107].mxu0  ;;  %v3560_v30 = vsel %vm680_vm7, %v3553_v60, -inf  ;;  %v3705_v38 = vsel %vm609_vm3, %v7889_v15, 0 }
0x1e4b   :  { %v3552_v29 = vmul.f32 0.25, %v3540_v56  ;;  %v3554_v4 = vsel %vm673_vm6, %v3551_v52, -inf }
0x1e4c   :  { %3555 = vmax.xlane.f32.xlu0 %v3554_v4 }
0x1e4d   :  { %v3557_v33 = vsel %vm673_vm6, %v3552_v29, -inf }
0x1e4e   :  { %3558 = vmax.xlane.f32.xlu1 %v3557_v33 }
0x1e50   :  { %3561 = vmax.xlane.f32.xlu0 %v3560_v30 }
0x1ed9   :  { %v3556_v32 = vpop.xlane.xlu0 %3555 }
0x1eda   :  { %v3563_v22 = vsub.f32 %v3551_v52, %v3556_v32  ;;  %v7997_v52 = vshrl.u32 %v7881_v2, 16 }
0x1edb   :  { %v3559_v23 = vpop.xlane.xlu1 %3558 }
0x1edc   :  { %v3566_v31 = vmul.f32 1.442695, %v3563_v22  ;;  %v3564_v43 = vsub.f32 %v3552_v29, %v3559_v23  ;;  %v3708_v56 = vsel %vm609_vm3, %v7997_v52, 0 }
0x1edd   :  { %v3562_v54 = vpop.xlane.xlu0 %3561 }
0x1ede   :  { %6587 = vpow2.f32 %v3566_v31  ;;  %v3568_v35 = vmul.f32 1.442695, %v3564_v43  ;;  %v3565_v45 = vsub.f32 %v3553_v60, %v3562_v54  ;;  %v8008_v60 = vshrl.u32 %v7849_v62, 16 }
0x1ee0   :  { %6589 = vpow2.f32 %v3568_v35  ;;  %v3570_v21 = vmul.f32 1.442695, %v3565_v45 }
0x1ee2   :  { %6591 = vpow2.f32 %v3570_v21 }
0x1ee8   :  { %v6588_v48 = vpop.eup %6587 }
0x1ee9   :  { %v3572_v59 = vsel %vm673_vm6, %v6588_v48, 0.0 }
0x1eea   :  { %v6590_v9 = vpop.eup %6589  ;;  %3573 = vadd.xlane.f32.xlu0 %v3572_v59 }
0x1eeb   :  { %v3575_v39 = vsel %vm673_vm6, %v6590_v9, 0.0 }
0x1eec   :  { %v6592_v26 = vpop.eup %6591 }
0x1eed   :  { %v3578_v36 = vsel %vm680_vm7, %v6592_v26, 0.0 }
0x1eee   :  { %3579 = vadd.xlane.f32.xlu1 %v3578_v36  ;;  %3576 = vadd.xlane.f32.xlu0 %v3575_v39 }
0x1eff   :  { %3591 = vrot.lane.b32.xlu1 %v7845_v1, %s6852_s2 }
0x1f04   :  { %3589 = vrot.lane.b32.xlu0 %v7812_v14, %s6852_s2 }
0x1f77   :  { %v3574_v18 = vpop.xlane.xlu0 %3573 }
0x1f78   :  { %6593 = vrcp.f32 %v3574_v18 }
0x1f7b   :  { %v3577_v47 = vpop.xlane.xlu0 %3576  ;;  %v3580_v53 = vpop.xlane.xlu1 %3579 }
0x1f7c   :  { %6595 = vrcp.f32 %v3577_v47 }
0x1f7d   :  { %6597 = vrcp.f32 %v3580_v53 }
0x1f7f   :  { %v3590_v55 = vpop.permute.xlu0 %3589  ;;  %v3592_v61 = vpop.permute.xlu1 %3591 }
0x1f80   :  { %v3601_v51 = vand.u32 %v3592_v61, %v7227_v11  ;;  %6103 = vmatprep.subr.bf16.mxu1 %v3590_v55 }
0x1f81   :  { %6104 = vmatpush3.bf16.msra.mxu1 %v3590_v55 }
0x1f82   :  { %6105 = vmatprep.subr.bf16.mxu1 %v3601_v51  ;;  %v6594_v6 = vpop.eup %6593 }
0x1f83   :  { %v3584_v1 = vmul.f32 %v6594_v6, %v6588_v48 }
0x1f85   :  { %6106 = vmatpush3.bf16.msra.mxu1 %v3601_v51 }
0x1f86   :  { %v6596_v50 = vpop.eup %6595  ;;  %6311 = vmatprep.subr.msk.bf16.mxu1 %vm609_vm3, %v7889_v15 }
0x1f87   :  { %v6598_v14 = vpop.eup %6597  ;;  %v3585_v37 = vmul.f32 %v6596_v50, %v6590_v9 }
0x1f88   :  { %v3586_v57 = vmul.f32 %v6598_v14, %v6592_v26 }
0x1f89   :  { %v3587_v3 = vpack.c.bf16 %v3585_v37, %v3584_v1 }
0x1f8a   :  { %v3588_v27 = vpack.c.bf16 %v3586_v57, %v3586_v57 }
0x1f8b   :  { %6107 = vmatprep.mubr.msk.bf16.mxu1 %vm673_vm6, %v3587_v3 }
0x1f8c   :  { %6108 = vmatmul.mubr.msk.bf16.vlgmr.msra.gmra.mrb[104].mxu1 %vm673_vm6, %v3588_v27 }
0x1f8d   :  { %6115 = vmatprep.mubr.msk.bf16.mxu1 %vm609_vm3, %v7859_v20 }
0x1f8e   :  { %6112 = vmatpush3.bf16.xpose.msra.mxu1 %v3705_v38 }
0x1f8f   :  { %6312 = vmatprep.subr.msk.bf16.mxu1 %vm609_vm3, %v7997_v52 }
0x1f96   :  { %6114 = vmatpush3.bf16.xpose.msra.mxu1 %v3708_v56 }
0x1f9d   :  { %6116 = vmatmul.mubr.msk.bf16.vlgmr.msra.gmra.mrb[108].mxu1 %vm609_vm3, %v8008_v60 }
0x205f   :  { %v8012_v2 = vpop.f32.mrb[104].mxu1 }
0x2060   :  { %v8014_v29 = vpop.f32.mrb[105].mxu1 }
0x2061   :  { %v6110_v4 = vpop.f32.mrb[106].mxu1 }
0x2062   :  { %v8016_v33 = vpop.f32.mrb[107].mxu1 }
0x2070   :  { %v6117_v30 = vpop.f32.mrb[108].mxu1 }
0x2071   :  { %v3744_v32 = vpop.f32.mrb[109].mxu1  ;;  %v3760_v62 = vmul.f32 0.25, %v6117_v30 }
0x2072   :  { %v3758_v22 = vmul.f32 0.25, %v3744_v32  ;;  %v6118_v23 = vpop.f32.mrb[110].mxu1 }
0x2073   :  { %v3747_v31 = vpop.f32.mrb[111].mxu1  ;;  %v3767_v45 = vsel %vm680_vm7, %v3760_v62, -inf }
0x2074   :  { %v3759_v43 = vmul.f32 0.25, %v3747_v31  ;;  %v3761_v54 = vsel %vm673_vm6, %v3758_v22, -inf }
0x2075   :  { %3762 = vmax.xlane.f32.xlu1 %v3761_v54 }
0x2076   :  { %v3764_v35 = vsel %vm673_vm6, %v3759_v43, -inf }
0x2077   :  { %3765 = vmax.xlane.f32.xlu0 %v3764_v35 }
0x207b   :  { %3768 = vmax.xlane.f32.xlu0 %v3767_v45 }
0x2102   :  { %v3763_v21 = vpop.xlane.xlu1 %3762 }
0x2103   :  { %v3770_v48 = vsub.f32 %v3758_v22, %v3763_v21 }
0x2104   :  { %v3766_v59 = vpop.xlane.xlu0 %3765 }
0x2105   :  { %v3773_v9 = vmul.f32 1.442695, %v3770_v48  ;;  %v3771_v26 = vsub.f32 %v3759_v43, %v3766_v59 }
0x2107   :  { %6599 = vpow2.f32 %v3773_v9  ;;  %v3775_v36 = vmul.f32 1.442695, %v3771_v26 }
0x2108   :  { %v3769_v39 = vpop.xlane.xlu0 %3768 }
0x2109   :  { %6601 = vpow2.f32 %v3775_v36  ;;  %v3772_v18 = vsub.f32 %v3760_v62, %v3769_v39 }
0x210b   :  { %v3777_v47 = vmul.f32 1.442695, %v3772_v18 }
0x210d   :  { %6603 = vpow2.f32 %v3777_v47 }
0x2111   :  { %v6600_v53 = vpop.eup %6599 }
0x2112   :  { %v3779_v55 = vsel %vm673_vm6, %v6600_v53, 0.0 }
0x2113   :  { %v6602_v61 = vpop.eup %6601  ;;  %3780 = vadd.xlane.f32.xlu1 %v3779_v55 }
0x2114   :  { %v3782_v51 = vsel %vm673_vm6, %v6602_v61, 0.0 }
0x2115   :  { %3783 = vadd.xlane.f32.xlu0 %v3782_v51 }
0x2117   :  { %v6604_v6 = vpop.eup %6603 }
0x2118   :  { %v3785_v50 = vsel %vm680_vm7, %v6604_v6, 0.0 }
0x2119   :  { %3786 = vadd.xlane.f32.xlu1 %v3785_v50 }
0x212a   :  { %3879 = vrot.lane.b32.xlu1 %v7997_v52, %s6849_s26 }
0x212b   :  { %3877 = vrot.lane.b32.xlu0 %v7889_v15, %s6849_s26 }
0x212e   :  { %3873 = vrot.lane.b32.xlu1 %v7859_v20, %s6849_s26 }
0x2132   :  { %3875 = vrot.lane.b32.xlu1 %v8008_v60, %s6849_s26 }
0x21a0   :  { %v3781_v14 = vpop.xlane.xlu1 %3780 }
0x21a1   :  { %6605 = vrcp.f32 %v3781_v14 }
0x21a2   :  { %v3784_v1 = vpop.xlane.xlu0 %3783 }
0x21a3   :  { %6607 = vrcp.f32 %v3784_v1 }
0x21a6   :  { %v3787_v37 = vpop.xlane.xlu1 %3786  ;;  %v3878_v57 = vpop.permute.xlu0 %3877 }
0x21a7   :  { %6609 = vrcp.f32 %v3787_v37  ;;  %6313 = vmatprep.subr.msk.bf16.mxu0 %vm609_vm3, %v3878_v57  ;;  %v3888_v31 = vsel %vm609_vm3, %v3878_v57, 0 }
0x21aa   :  { %v3880_v4 = vpop.permute.xlu1 %3879 }
0x21ab   :  { %v6606_v3 = vpop.eup %6605  ;;  %v3891_v54 = vsel %vm609_vm3, %v3880_v4, 0 }
0x21ac   :  { %v3791_v38 = vmul.f32 %v6606_v3, %v6600_v53 }
0x21ad   :  { %v6608_v27 = vpop.eup %6607 }
0x21ae   :  { %v3792_v56 = vmul.f32 %v6608_v27, %v6602_v61  ;;  %v3874_v43 = vpop.permute.xlu1 %3873 }
0x21b0   :  { %v3794_v30 = vpack.c.bf16 %v3792_v56, %v3791_v38 }
0x21b1   :  { %v6610_v32 = vpop.eup %6609 }
0x21b2   :  { %v3793_v22 = vmul.f32 %v6610_v32, %v6604_v6  ;;  %6123 = vmatprep.mubr.msk.bf16.mxu0 %vm673_vm6, %v3794_v30  ;;  %v3876_v62 = vpop.permute.xlu1 %3875 }
0x21b4   :  { %v3795_v23 = vpack.c.bf16 %v3793_v22, %v3793_v22 }
0x21b6   :  { %6124 = vmatmul.mubr.msk.bf16.vlgmr.msra.gmra.mrb[108].mxu0 %vm673_vm6, %v3795_v23 }
0x21b7   :  { %6128 = vmatpush3.bf16.xpose.msra.mxu0 %v3888_v31  ;;  %6131 = vmatprep.mubr.msk.bf16.mxu0 %vm609_vm3, %v3874_v43 }
0x21b8   :  { %6314 = vmatprep.subr.msk.bf16.mxu0 %vm609_vm3, %v3880_v4 }
0x21bf   :  { %6130 = vmatpush3.bf16.xpose.msra.mxu0 %v3891_v54 }
0x21c6   :  { %6132 = vmatmul.mubr.msk.bf16.vlgmr.msra.gmra.mrb[112].mxu0 %vm609_vm3, %v3876_v62 }
0x2289   :  { %v6125_v35 = vpop.f32.mrb[108].mxu0 }
0x228a   :  { %3872 = vst.msk [vmem:[#allocation2 + $0x21] sm:$0x1] %vm774_vm8, %v6125_v35  ;;  %v3856_v45 = vpop.f32.mrb[109].mxu0 }
0x228b   :  { %3870 = vst.msk [vmem:[#allocation2 + $0x11] sm:$0xff] %vm609_vm3, %v3856_v45  ;;  %v6126_v21 = vpop.f32.mrb[110].mxu0 }
0x228c   :  { %v3859_v48 = vpop.f32.mrb[111].mxu0 }
0x228d   :  { %3871 = vst.msk [vmem:[#allocation2 + $0x19] sm:$0xff] %vm609_vm3, %v3859_v48 }
0x2299   :  { %v6133_v59 = vpop.f32.mrb[112].mxu0 }
0x229a   :  { %v3927_v9 = vpop.f32.mrb[113].mxu0  ;;  %v3943_v18 = vmul.f32 0.25, %v6133_v59 }
0x229b   :  { %v3941_v26 = vmul.f32 0.25, %v3927_v9  ;;  %v6134_v36 = vpop.f32.mrb[114].mxu0 }
0x229c   :  { %v3930_v39 = vpop.f32.mrb[115].mxu0  ;;  %v3950_v61 = vsel %vm680_vm7, %v3943_v18, -inf }
0x229d   :  { %v3942_v47 = vmul.f32 0.25, %v3930_v39  ;;  %v3944_v53 = vsel %vm673_vm6, %v3941_v26, -inf }
0x229e   :  { %3945 = vmax.xlane.f32.xlu0 %v3944_v53 }
0x229f   :  { %v3947_v55 = vsel %vm673_vm6, %v3942_v47, -inf }
0x22a0   :  { %3948 = vmax.xlane.f32.xlu1 %v3947_v55 }
0x22a2   :  { %3951 = vmax.xlane.f32.xlu0 %v3950_v61 }
0x232b   :  { %v3946_v51 = vpop.xlane.xlu0 %3945 }
0x232c   :  { %v3953_v6 = vsub.f32 %v3941_v26, %v3946_v51 }
0x232d   :  { %v3949_v50 = vpop.xlane.xlu1 %3948 }
0x232e   :  { %v3956_v14 = vmul.f32 1.442695, %v3953_v6  ;;  %v3954_v1 = vsub.f32 %v3942_v47, %v3949_v50 }
0x232f   :  { %v3952_v37 = vpop.xlane.xlu0 %3951 }
0x2330   :  { %6611 = vpow2.f32 %v3956_v14  ;;  %v3958_v57 = vmul.f32 1.442695, %v3954_v1  ;;  %v3955_v3 = vsub.f32 %v3943_v18, %v3952_v37 }
0x2332   :  { %6613 = vpow2.f32 %v3958_v57  ;;  %v3960_v27 = vmul.f32 1.442695, %v3955_v3 }
0x2334   :  { %6615 = vpow2.f32 %v3960_v27 }
0x233a   :  { %v6612_v38 = vpop.eup %6611 }
0x233b   :  { %v3962_v56 = vsel %vm673_vm6, %v6612_v38, 0.0 }
0x233c   :  { %v6614_v4 = vpop.eup %6613  ;;  %3963 = vadd.xlane.f32.xlu0 %v3962_v56 }
0x233d   :  { %v3965_v22 = vsel %vm673_vm6, %v6614_v4, 0.0 }
0x233e   :  { %v6616_v30 = vpop.eup %6615 }
0x233f   :  { %v3968_v32 = vsel %vm680_vm7, %v6616_v30, 0.0 }
0x2340   :  { %3969 = vadd.xlane.f32.xlu1 %v3968_v32  ;;  %3966 = vadd.xlane.f32.xlu0 %v3965_v22 }
0x2351   :  { %3981 = vrot.lane.b32.xlu1 %v7969_v10, %s6849_s26 }
0x2355   :  { %4060 = vrot.lane.b32.xlu1 %v7889_v15, %s6851_s28 }
0x2356   :  { %3979 = vrot.lane.b32.xlu0 %v7856_v28, %s6849_s26 }
0x2359   :  { %4062 = vrot.lane.b32.xlu1 %v7997_v52, %s6851_s28 }
0x235a   :  { %4056 = vrot.lane.b32.xlu0 %v7859_v20, %s6851_s28 }
0x235d   :  { %4058 = vrot.lane.b32.xlu1 %v8008_v60, %s6851_s28 }
0x23c9   :  { %v3964_v23 = vpop.xlane.xlu0 %3963 }
0x23ca   :  { %6617 = vrcp.f32 %v3964_v23 }
0x23cd   :  { %v3967_v31 = vpop.xlane.xlu0 %3966  ;;  %v3970_v43 = vpop.xlane.xlu1 %3969 }
0x23ce   :  { %6619 = vrcp.f32 %v3967_v31 }
0x23cf   :  { %6621 = vrcp.f32 %v3970_v43 }
0x23d1   :  { %v3980_v54 = vpop.permute.xlu0 %3979  ;;  %v3982_v62 = vpop.permute.xlu1 %3981 }
0x23d2   :  { %v3991_v35 = vand.u32 %v3982_v62, %v7227_v11  ;;  %6135 = vmatprep.subr.bf16.mxu1 %v3980_v54 }
0x23d3   :  { %6136 = vmatpush3.bf16.msra.mxu1 %v3980_v54 }
0x23d4   :  { %6137 = vmatprep.subr.bf16.mxu1 %v3991_v35  ;;  %v6618_v45 = vpop.eup %6617 }
0x23d5   :  { %v4061_v21 = vpop.permute.xlu1 %4060  ;;  %v3974_v9 = vmul.f32 %v6618_v45, %v6612_v38  ;;  %v4057_v47 = vpop.permute.xlu0 %4056 }
0x23d6   :  { %v4071_v53 = vsel %vm609_vm3, %v4061_v21, 0 }
0x23d7   :  { %6138 = vmatpush3.bf16.msra.mxu1 %v3991_v35 }
0x23d8   :  { %v6620_v48 = vpop.eup %6619  ;;  %6315 = vmatprep.subr.msk.bf16.mxu1 %vm609_vm3, %v4061_v21 }
0x23d9   :  { %v6622_v59 = vpop.eup %6621  ;;  %v3975_v26 = vmul.f32 %v6620_v48, %v6614_v4  ;;  %v4063_v55 = vpop.permute.xlu1 %4062 }
0x23da   :  { %v3976_v36 = vmul.f32 %v6622_v59, %v6616_v30  ;;  %v4074_v61 = vsel %vm609_vm3, %v4063_v55, 0 }
0x23db   :  { %v3977_v39 = vpack.c.bf16 %v3975_v26, %v3974_v9 }
0x23dc   :  { %v3978_v18 = vpack.c.bf16 %v3976_v36, %v3976_v36 }
0x23dd   :  { %6139 = vmatprep.mubr.msk.bf16.mxu1 %vm673_vm6, %v3977_v39  ;;  %v4059_v51 = vpop.permute.xlu1 %4058 }
0x23de   :  { %6140 = vmatmul.mubr.msk.bf16.vlgmr.msra.gmra.mrb[112].mxu1 %vm673_vm6, %v3978_v18 }
0x23df   :  { %6147 = vmatprep.mubr.msk.bf16.mxu1 %vm609_vm3, %v4057_v47 }
0x23e0   :  { %6144 = vmatpush3.bf16.xpose.msra.mxu1 %v4071_v53 }
0x23e1   :  { %6316 = vmatprep.subr.msk.bf16.mxu1 %vm609_vm3, %v4063_v55 }
0x23e8   :  { %6146 = vmatpush3.bf16.xpose.msra.mxu1 %v4074_v61 }
0x23ef   :  { %6148 = vmatmul.mubr.msk.bf16.vlgmr.msra.gmra.mrb[116].mxu1 %vm609_vm3, %v4059_v51 }
0x24b1   :  { %v8070_v6 = vpop.f32.mrb[112].mxu1 }
0x24b2   :  { %v8072_v50 = vpop.f32.mrb[113].mxu1 }
0x24b3   :  { %v6142_v14 = vpop.f32.mrb[114].mxu1 }
0x24b4   :  { %v8074_v1 = vpop.f32.mrb[115].mxu1 }
0x24c2   :  { %v6149_v37 = vpop.f32.mrb[116].mxu1 }
0x24c3   :  { %v4110_v57 = vpop.f32.mrb[117].mxu1  ;;  %v4126_v56 = vmul.f32 0.25, %v6149_v37 }
0x24c4   :  { %v4124_v3 = vmul.f32 0.25, %v4110_v57  ;;  %v6150_v27 = vpop.f32.mrb[118].mxu1 }
0x24c5   :  { %v4113_v38 = vpop.f32.mrb[119].mxu1  ;;  %v4133_v22 = vsel %vm680_vm7, %v4126_v56, -inf }
0x24c6   :  { %v4125_v4 = vmul.f32 0.25, %v4113_v38  ;;  %v4127_v30 = vsel %vm673_vm6, %v4124_v3, -inf }
0x24c7   :  { %4128 = vmax.xlane.f32.xlu0 %v4127_v30 }
0x24c8   :  { %v4130_v32 = vsel %vm673_vm6, %v4125_v4, -inf }
0x24c9   :  { %4131 = vmax.xlane.f32.xlu1 %v4130_v32 }
0x24cb   :  { %4134 = vmax.xlane.f32.xlu0 %v4133_v22 }
0x2554   :  { %v4129_v23 = vpop.xlane.xlu0 %4128 }
0x2555   :  { %v4136_v31 = vsub.f32 %v4124_v3, %v4129_v23 }
0x2556   :  { %v4132_v43 = vpop.xlane.xlu1 %4131 }
0x2557   :  { %v4139_v54 = vmul.f32 1.442695, %v4136_v31  ;;  %v4137_v62 = vsub.f32 %v4125_v4, %v4132_v43 }
0x2558   :  { %v4135_v35 = vpop.xlane.xlu0 %4134 }
0x2559   :  { %6623 = vpow2.f32 %v4139_v54  ;;  %v4141_v45 = vmul.f32 1.442695, %v4137_v62  ;;  %v4138_v21 = vsub.f32 %v4126_v56, %v4135_v35 }
0x255b   :  { %6625 = vpow2.f32 %v4141_v45  ;;  %v4143_v48 = vmul.f32 1.442695, %v4138_v21 }
0x255d   :  { %6627 = vpow2.f32 %v4143_v48 }
0x2563   :  { %v6624_v59 = vpop.eup %6623 }
0x2564   :  { %v4145_v9 = vsel %vm673_vm6, %v6624_v59, 0.0 }
0x2565   :  { %v6626_v26 = vpop.eup %6625  ;;  %4146 = vadd.xlane.f32.xlu0 %v4145_v9 }
0x2566   :  { %v4148_v18 = vsel %vm673_vm6, %v6626_v26, 0.0 }
0x2567   :  { %v6628_v36 = vpop.eup %6627 }
0x2568   :  { %v4151_v39 = vsel %vm680_vm7, %v6628_v36, 0.0 }
0x2569   :  { %4152 = vadd.xlane.f32.xlu1 %v4151_v39  ;;  %4149 = vadd.xlane.f32.xlu0 %v4148_v18 }
0x257a   :  { %4164 = vrot.lane.b32.xlu1 %v7969_v10, %s6851_s28 }
0x257e   :  { %4243 = vrot.lane.b32.xlu1 %v7889_v15, %s6852_s2 }
0x257f   :  { %4162 = vrot.lane.b32.xlu0 %v7856_v28, %s6851_s28 }
0x2582   :  { %4245 = vrot.lane.b32.xlu1 %v7997_v52, %s6852_s2 }
0x2583   :  { %4239 = vrot.lane.b32.xlu0 %v7859_v20, %s6852_s2 }
0x2586   :  { %4241 = vrot.lane.b32.xlu1 %v8008_v60, %s6852_s2 }
0x25f2   :  { %v4147_v47 = vpop.xlane.xlu0 %4146 }
0x25f3   :  { %6629 = vrcp.f32 %v4147_v47 }
0x25f6   :  { %v4150_v53 = vpop.xlane.xlu0 %4149  ;;  %v4153_v55 = vpop.xlane.xlu1 %4152 }
0x25f7   :  { %6631 = vrcp.f32 %v4150_v53 }
0x25f8   :  { %6633 = vrcp.f32 %v4153_v55 }
0x25fa   :  { %v4163_v61 = vpop.permute.xlu0 %4162  ;;  %v4165_v15 = vpop.permute.xlu1 %4164 }
0x25fb   :  { %v4174_v51 = vand.u32 %v4165_v15, %v7227_v11  ;;  %6151 = vmatprep.subr.bf16.mxu0 %v4163_v61 }
0x25fc   :  { %6152 = vmatpush3.bf16.msra.mxu0 %v4163_v61 }
0x25fd   :  { %6153 = vmatprep.subr.bf16.mxu0 %v4174_v51  ;;  %v6630_v52 = vpop.eup %6629 }
0x25fe   :  { %v4244_v14 = vpop.permute.xlu1 %4243  ;;  %v4157_v37 = vmul.f32 %v6630_v52, %v6624_v59  ;;  %v4240_v56 = vpop.permute.xlu0 %4239 }
0x25ff   :  { %v4254_v4 = vsel %vm609_vm3, %v4244_v14, 0 }
0x2600   :  { %6154 = vmatpush3.bf16.msra.mxu0 %v4174_v51 }
0x2601   :  { %v6632_v20 = vpop.eup %6631  ;;  %6317 = vmatprep.subr.msk.bf16.mxu0 %vm609_vm3, %v4244_v14 }
0x2602   :  { %v6634_v60 = vpop.eup %6633  ;;  %v4158_v57 = vmul.f32 %v6632_v20, %v6626_v26  ;;  %v4246_v30 = vpop.permute.xlu1 %4245 }
0x2603   :  { %v4159_v3 = vmul.f32 %v6634_v60, %v6628_v36  ;;  %v4257_v32 = vsel %vm609_vm3, %v4246_v30, 0 }
0x2604   :  { %v4160_v27 = vpack.c.bf16 %v4158_v57, %v4157_v37 }
0x2605   :  { %v4161_v38 = vpack.c.bf16 %v4159_v3, %v4159_v3 }
0x2606   :  { %6155 = vmatprep.mubr.msk.bf16.mxu0 %vm673_vm6, %v4160_v27  ;;  %v4242_v22 = vpop.permute.xlu1 %4241 }
0x2607   :  { %6156 = vmatmul.mubr.msk.bf16.vlgmr.msra.gmra.mrb[116].mxu0 %vm673_vm6, %v4161_v38 }
0x2608   :  { %6163 = vmatprep.mubr.msk.bf16.mxu0 %vm609_vm3, %v4240_v56 }
0x2609   :  { %6160 = vmatpush3.bf16.xpose.msra.mxu0 %v4254_v4 }
0x260a   :  { %6318 = vmatprep.subr.msk.bf16.mxu0 %vm609_vm3, %v4246_v30  ;;  %v6383_v30 = vld [vmem:[%s8404_s3 + $0xe0] sm:$0xff]  }
0x2611   :  { %6162 = vmatpush3.bf16.xpose.msra.mxu0 %v4257_v32 }
0x2612   :  { %6195 = vmatprep.subr.bf16.mxu0 %v6847_v0 }
0x2618   :  { %6164 = vmatmul.mubr.msk.bf16.vlgmr.msra.gmra.mrb[120].mxu0 %vm609_vm3, %v4242_v22  ;;  %vm4896_vm3 = vcmask 517121  }
0x2619   :  { %6203 = vmatprep.mubr.msk.bf16.mxu0 %vm6848_vm0, %v6847_v0 }
0x26da   :  { %v8106_v23 = vpop.f32.mrb[116].mxu0 }
0x26db   :  { %v4210_v31 = vpop.f32.mrb[117].mxu0 }
0x26dc   :  { %v6158_v43 = vpop.f32.mrb[118].mxu0 }
0x26dd   :  { %v4213_v54 = vpop.f32.mrb[119].mxu0  ;;  %v6384_v43 = vld [vmem:[%s8404_s3 + $0xe8] sm:$0xff]  }
0x26eb   :  { %v6165_v62 = vpop.f32.mrb[120].mxu0 }
0x26ec   :  { %v4293_v35 = vpop.f32.mrb[121].mxu0  ;;  %v4309_v59 = vmul.f32 0.25, %v6165_v62 }
0x26ed   :  { %v4307_v45 = vmul.f32 0.25, %v4293_v35  ;;  %v6166_v21 = vpop.f32.mrb[122].mxu0  ;;  %v6385_v35 = vld [vmem:[%s8404_s3 + $0xf0] sm:$0xff]  }
0x26ee   :  { %v4296_v48 = vpop.f32.mrb[123].mxu0  ;;  %v4316_v39 = vsel %vm680_vm7, %v4309_v59, -inf }
0x26ef   :  { %v4308_v9 = vmul.f32 0.25, %v4296_v48  ;;  %v4310_v26 = vsel %vm673_vm6, %v4307_v45, -inf  ;;  %v6386_v48 = vld [vmem:[%s8404_s3 + $0xf8] sm:$0xff]  }
0x26f0   :  { %4311 = vmax.xlane.f32.xlu0 %v4310_v26 }
0x26f1   :  { %v4313_v36 = vsel %vm673_vm6, %v4308_v9, -inf }
0x26f2   :  { %4314 = vmax.xlane.f32.xlu1 %v4313_v36 }
0x26f4   :  { %4317 = vmax.xlane.f32.xlu0 %v4316_v39 }
0x277d   :  { %v4312_v18 = vpop.xlane.xlu0 %4311 }
0x277e   :  { %v4319_v47 = vsub.f32 %v4307_v45, %v4312_v18 }
0x277f   :  { %v4315_v53 = vpop.xlane.xlu1 %4314 }
0x2780   :  { %v4322_v55 = vmul.f32 1.442695, %v4319_v47  ;;  %v4320_v61 = vsub.f32 %v4308_v9, %v4315_v53 }
0x2781   :  { %v4318_v15 = vpop.xlane.xlu0 %4317 }
0x2782   :  { %6635 = vpow2.f32 %v4322_v55  ;;  %v4324_v51 = vmul.f32 1.442695, %v4320_v61  ;;  %v4321_v52 = vsub.f32 %v4309_v59, %v4318_v15 }
0x2784   :  { %6637 = vpow2.f32 %v4324_v51  ;;  %v4326_v14 = vmul.f32 1.442695, %v4321_v52 }
0x2786   :  { %6639 = vpow2.f32 %v4326_v14 }
0x278c   :  { %v6636_v20 = vpop.eup %6635 }
0x278d   :  { %v4328_v60 = vsel %vm673_vm6, %v6636_v20, 0.0 }
0x278e   :  { %v6638_v37 = vpop.eup %6637  ;;  %4329 = vadd.xlane.f32.xlu0 %v4328_v60  ;;  %v8185_v60 = vld [vmem:[#allocation9 + $0x8] sm:$0xff] }
0x278f   :  { %v4331_v27 = vsel %vm673_vm6, %v6638_v37, 0.0 }
0x2790   :  { %v6640_v57 = vpop.eup %6639 }
0x2791   :  { %v4334_v3 = vsel %vm680_vm7, %v6640_v57, 0.0 }
0x2792   :  { %4335 = vadd.xlane.f32.xlu1 %v4334_v3  ;;  %4332 = vadd.xlane.f32.xlu0 %v4331_v27 }
0x27a3   :  { %4347 = vrot.lane.b32.xlu1 %v7969_v10, %s6852_s2 }
0x27a7   :  { %3288 = vrot.lane.b32.xlu1 %v7937_v42, %s6853_s1 }
0x27a8   :  { %4345 = vrot.lane.b32.xlu0 %v7856_v28, %s6852_s2 }
0x27ab   :  { %3290 = vrot.lane.b32.xlu1 %v7939_v7, %s6853_s1 }
0x27ac   :  { %3471 = vrot.lane.b32.xlu0 %v7977_v49, %s6854_s25 }
0x27af   :  { %3473 = vrot.lane.b32.xlu1 %v7979_v19, %s6854_s25 }
0x27b0   :  { %3654 = vrot.lane.b32.xlu0 %v8014_v29, %s6855_s12 }
0x27b3   :  { %3656 = vrot.lane.b32.xlu1 %v8016_v33, %s6855_s12 }
0x27b4   :  { %3292 = vrot.lane.b32.xlu0 %v7935_v13, %s6853_s1 }
0x27b7   :  { %4044 = vrot.lane.b32.xlu1 %v8072_v50, %s6853_s1 }
0x27b8   :  { %4046 = vrot.lane.b32.xlu0 %v8074_v1, %s6853_s1 }
0x27bb   :  { %3475 = vrot.lane.b32.xlu1 %v7975_v16, %s6854_s25 }
0x27bc   :  { %4227 = vrot.lane.b32.xlu0 %v4210_v31, %s6854_s25 }
0x27bf   :  { %4229 = vrot.lane.b32.xlu1 %v4213_v54, %s6854_s25 }
0x27c0   :  { %3658 = vrot.lane.b32.xlu0 %v8012_v2, %s6855_s12 }
0x281b   :  { %v4330_v28 = vpop.xlane.xlu0 %4329 }
0x281c   :  { %6641 = vrcp.f32 %v4330_v28 }
0x281f   :  { %v4333_v42 = vpop.xlane.xlu0 %4332  ;;  %v4336_v13 = vpop.xlane.xlu1 %4335 }
0x2820   :  { %6643 = vrcp.f32 %v4333_v42 }
0x2821   :  { %6645 = vrcp.f32 %v4336_v13 }
0x2823   :  { %v4346_v7 = vpop.permute.xlu0 %4345  ;;  %v4348_v10 = vpop.permute.xlu1 %4347 }
0x2824   :  { %v4357_v49 = vand.u32 %v4348_v10, %v7227_v11  ;;  %6167 = vmatprep.subr.bf16.mxu1 %v4346_v7  ;;  %v6387_v10 = vld [vmem:[#allocation7 + $0x20] sm:$0xff]  }
0x2825   :  { %6168 = vmatpush3.bf16.msra.mxu1 %v4346_v7  ;;  %6196 = vmatpush3.bf16.msra.mxu0 %v6387_v10 }
0x2826   :  { %6169 = vmatprep.subr.bf16.mxu1 %v4357_v49  ;;  %v6642_v29 = vpop.eup %6641  ;;  %6197 = vmatprep.subr.bf16.mxu0 %v6847_v0 }
0x2827   :  { %v3472_v16 = vpop.permute.xlu0 %3471  ;;  %v3289_v19 = vpop.permute.xlu1 %3288  ;;  %v4340_v38 = vmul.f32 %v6642_v29, %v6636_v20 }
0x2828   :  { %3297 = vst.msk [vmem:[#allocation2] sm:$0xff] %vm962_vm9, %v3289_v19  ;;  %v6390_v19 = vld [vmem:[#allocation7 + $0x38] sm:$0xff]  }
0x2829   :  { %3480 = vst.msk [vmem:[#allocation2] sm:$0xff] %vm1147_vm10, %v3472_v16  ;;  %6170 = vmatpush3.bf16.msra.mxu1 %v4357_v49  ;;  %v6388_v49 = vld [vmem:[#allocation7 + $0x28] sm:$0xff]   ;;  %v6389_v16 = vld [vmem:[#allocation7 + $0x30] sm:$0xff]  }
0x282a   :  { %v6644_v2 = vpop.eup %6643  ;;  %6175 = vmatprep.subr.bf16.mxu1 %v6847_v0  ;;  %6198 = vmatpush3.bf16.msra.mxu0 %v6388_v49 }
0x282b   :  { %v6646_v33 = vpop.eup %6645  ;;  %v3655_v50 = vpop.permute.xlu0 %3654  ;;  %v4341_v56 = vmul.f32 %v6644_v2, %v6638_v37  ;;  %v8189_v37 = vrot.slane %v8185_v60, %v7536_v8  ;;  %6199 = vmatprep.subr.bf16.mxu0 %v6847_v0 }
0x282c   :  { %v3291_v1 = vpop.permute.xlu1 %3290  ;;  %v4342_v11 = vmul.f32 %v6646_v33, %v6640_v57  ;;  %3663 = vst.msk [vmem:[#allocation2] sm:$0xff] %vm1332_vm11, %v3655_v50 }
0x282d   :  { %3298 = vst.msk [vmem:[#allocation2 + $0x8] sm:$0xff] %vm962_vm9, %v3291_v1  ;;  %v4343_v4 = vpack.c.bf16 %v4341_v56, %v4340_v38 }
0x282e   :  { %v4344_v32 = vpack.c.bf16 %v4342_v11, %v4342_v11  ;;  %6200 = vmatpush3.bf16.msra.mxu0 %v6389_v16 }
0x282f   :  { %6171 = vmatprep.mubr.msk.bf16.mxu1 %vm673_vm6, %v4343_v4  ;;  %v3293_v22 = vpop.permute.xlu0 %3292  ;;  %6201 = vmatprep.subr.bf16.mxu0 %v6847_v0 }
0x2830   :  { %v3474_v31 = vpop.permute.xlu1 %3473  ;;  %3299 = vst.msk [vmem:[#allocation2 + $0x10] sm:$0x1] %vm965_vm12, %v3293_v22  ;;  %6172 = vmatmul.mubr.msk.bf16.vlgmr.msra.gmra.mrb[120].mxu1 %vm673_vm6, %v4344_v32 }
0x2831   :  { %3481 = vst.msk [vmem:[#allocation2 + $0x8] sm:$0xff] %vm1147_vm10, %v3474_v31  ;;  %6176 = vmatpush3.bf16.msra.mxu1 %v6383_v30  ;;  %6183 = vmatprep.mubr.msk.bf16.mxu1 %vm6848_vm0, %v6847_v0 }
0x2832   :  { %6177 = vmatprep.subr.bf16.mxu1 %v6847_v0  ;;  %6202 = vmatpush3.bf16.msra.mxu0 %v6390_v19  ;;  %v6392_v19 = vld [vmem:[%s8406_s5 + $0x48] sm:$0xff]  }
0x2833   :  { %v4047_v54 = vpop.permute.xlu0 %4046  ;;  %v4422_v26 = vld [vmem:[#allocation2] sm:$0xff]  ;;  %6243 = vmatprep.subr.bf16.mxu0 %v6847_v0 }
0x2834   :  { %v3657_v62 = vpop.permute.xlu1 %3656  ;;  %4054 = vst.msk [vmem:[#allocation2 + $0x19] sm:$0xff] %vm962_vm9, %v4047_v54 }
0x2835   :  { %3664 = vst.msk [vmem:[#allocation2 + $0x8] sm:$0xff] %vm1332_vm11, %v3657_v62  ;;  %6178 = vmatpush3.bf16.msra.mxu1 %v6384_v43 }
0x2836   :  { %6179 = vmatprep.subr.bf16.mxu1 %v6847_v0 }
0x2837   :  { %v4228_v45 = vpop.permute.xlu0 %4227 }
0x2838   :  { %v4045_v21 = vpop.permute.xlu1 %4044 }
0x2839   :  { %4053 = vst.msk [vmem:[#allocation2 + $0x11] sm:$0xff] %vm962_vm9, %v4045_v21  ;;  %6180 = vmatpush3.bf16.msra.mxu1 %v6385_v35 }
0x283a   :  { %4236 = vst.msk [vmem:[#allocation2 + $0x11] sm:$0xff] %vm1147_vm10, %v4228_v45  ;;  %6181 = vmatprep.subr.bf16.mxu1 %v6847_v0 }
0x283b   :  { %v3659_v59 = vpop.permute.xlu0 %3658 }
0x283c   :  { %v3476_v9 = vpop.permute.xlu1 %3475  ;;  %v4423_v36 = vld [vmem:[#allocation2 + $0x8] sm:$0xff] }
0x283d   :  { %3482 = vst.msk [vmem:[#allocation2 + $0x10] sm:$0x1] %vm1150_vm13, %v3476_v9  ;;  %v4436_v39 = vpack.c.bf16 %v4423_v36, %v4422_v26  ;;  %6182 = vmatpush3.bf16.msra.mxu1 %v6386_v48  ;;  %v8215_v9 = vrot.slane %v8185_v60, %v7578_v41 }
0x283e   :  { %3665 = vst.msk [vmem:[#allocation2 + $0x10] sm:$0x1] %vm1335_vm14, %v3659_v59  ;;  %6215 = vmatprep.subr.bf16.mxu1 %v6847_v0 }
0x2840   :  { %v4230_v18 = vpop.permute.xlu1 %4229  ;;  %6184 = vmatmul.mubr.msk.bf16.vlgmr.msra.gmra.mrb[124].mxu1 %vm165_vm1, %v4436_v39 }
0x2841   :  { %4237 = vst.msk [vmem:[#allocation2 + $0x19] sm:$0xff] %vm1147_vm10, %v4230_v18  ;;  %6187 = vmatprep.mubr.msk.bf16.mxu1 %vm6848_vm0, %v6847_v0 }
0x2903   :  { %v8180_v47 = vpop.f32.mrb[120].mxu1 }
0x2904   :  { %v4393_v53 = vpop.f32.mrb[121].mxu1 }
0x2905   :  { %4410 = vrot.lane.b32.xlu1 %v4393_v53, %s6855_s12  ;;  %v6174_v55 = vpop.f32.mrb[122].mxu1 }
0x2906   :  { %v4396_v61 = vpop.f32.mrb[123].mxu1  ;;  %v8220_v55 = vrot.slane %v8185_v60, %v7586_v12 }
0x2907   :  { %4412 = vrot.lane.b32.xlu0 %v4396_v61, %s6855_s12 }
0x2913   :  { %v4506_v15 = vpop.f32.mrb[124].mxu1 }
0x2914   :  { %v6185_v51 = vpop.f32.mrb[125].mxu1  ;;  %v4528_v20 = vadd.f32 %v4506_v15, %v7692_v58 }
0x2915   :  { %v4509_v52 = vpop.f32.mrb[126].mxu1 }
0x2916   :  { %v6186_v14 = vpop.f32.mrb[127].mxu1  ;;  %v4529_v57 = vadd.f32 %v4509_v52, %v7696_v5  ;;  %v8193_v3 = vadd.f32 %v8189_v37, %v4528_v20 }
0x2917   :  { %v6391_v14 = vld [vmem:[%s8406_s5 + $0x40] sm:$0xff]  }
0x2918   :  { %v4538_v27 = vadd.f32 %v8189_v37, %v4529_v57  ;;  %v4562_v42 = vmul.f32 %v8193_v3, %v8193_v3  ;;  %v4542_v58 = vsel %vm165_vm1, %v8193_v3, 0.0  ;;  %6216 = vmatpush3.bf16.msra.mxu1 %v6391_v14 }
0x2919   :  { %6217 = vmatprep.subr.bf16.mxu1 %v6847_v0 }
0x291a   :  { %v4545_v28 = vsel %vm165_vm1, %v4538_v27, 0.0  ;;  %v4567_v13 = vsel %vm165_vm1, %v4562_v42, 0.0  ;;  %v4563_v7 = vmul.f32 %v4538_v27, %v4538_v27 }
0x291c   :  { %v4570_v5 = vsel %vm165_vm1, %v4563_v7, 0.0  ;;  %6218 = vmatpush3.bf16.msra.mxu1 %v6392_v19 }
0x291d   :  { %6219 = vmatprep.subr.bf16.mxu1 %v6847_v0 }
0x2926   :  { %4546 = vadd.xlane.f32.xlu0 %v4545_v28 }
0x2929   :  { %4543 = vadd.xlane.f32.xlu1 %v4542_v58 }
0x292a   :  { %4568 = vadd.xlane.f32.xlu0 %v4567_v13 }
0x292e   :  { %4571 = vadd.xlane.f32.xlu0 %v4570_v5 }
0x2977   :  { %v4411_v29 = vpop.permute.xlu1 %4410 }
0x2978   :  { %4419 = vst.msk [vmem:[#allocation2 + $0x11] sm:$0xff] %vm1332_vm11, %v4411_v29  ;;  %v6393_v29 = vld [vmem:[%s8406_s5 + $0x50] sm:$0xff]  }
0x2979   :  { %v4413_v2 = vpop.permute.xlu0 %4412  ;;  %6220 = vmatpush3.bf16.msra.mxu1 %v6393_v29 }
0x297a   :  { %4420 = vst.msk [vmem:[#allocation2 + $0x19] sm:$0xff] %vm1332_vm11, %v4413_v2  ;;  %6221 = vmatprep.subr.bf16.mxu1 %v6847_v0  ;;  %v6394_v2 = vld [vmem:[%s8406_s5 + $0x58] sm:$0xff]  }
0x297d   :  { %6222 = vmatpush3.bf16.msra.mxu1 %v6394_v2 }
0x297e   :  { %6223 = vmatprep.subr.bf16.mxu1 %v6847_v0 }
0x297f   :  { %v4424_v33 = vld [vmem:[#allocation2 + $0x10] sm:$0xff] }
0x2981   :  { %v4425_v50 = vld [vmem:[#allocation2 + $0x18] sm:$0xff] }
0x2982   :  { %v4437_v1 = vpack.c.bf16 %v4425_v50, %v4424_v33  ;;  %v6395_v33 = vld [vmem:[%s8406_s5 + $0x60] sm:$0xff]   ;;  %v6398_v50 = vld [vmem:[%s8406_s5 + $0x78] sm:$0xff]  }
0x2983   :  { %6224 = vmatpush3.bf16.msra.mxu1 %v6395_v33 }
0x2984   :  { %6188 = vmatmul.mubr.msk.bf16.gmra.mrb[128].mxu1 %vm165_vm1, %v4437_v1  ;;  %6225 = vmatprep.subr.bf16.mxu1 %v6847_v0 }
0x2985   :  { %6191 = vmatprep.mubr.msk.bf16.mxu1 %vm6848_vm0, %v6847_v0 }
0x29b3   :  { %v4547_v38 = vpop.xlane.xlu0 %4546 }
0x29b4   :  { %v4558_v30 = vmul.f32 0.015625, %v4547_v38 }
0x29b6   :  { %v4544_v56 = vpop.xlane.xlu1 %4543  ;;  %v4588_v54 = vmul.f32 %v4558_v30, %v4558_v30  ;;  %v4598_v36 = vsub.f32 %v4538_v27, %v4558_v30 }
0x29b7   :  { %v4557_v11 = vmul.f32 0.015625, %v4544_v56  ;;  %v4569_v4 = vpop.xlane.xlu0 %4568 }
0x29b8   :  { %v4582_v32 = vmul.f32 0.015625, %v4569_v4 }
0x29b9   :  { %v4587_v22 = vmul.f32 %v4557_v11, %v4557_v11  ;;  %v4597_v48 = vsub.f32 %v8193_v3, %v4557_v11 }
0x29bb   :  { %v4592_v31 = vsub.f32 %v4582_v32, %v4587_v22  ;;  %v4572_v43 = vpop.xlane.xlu0 %4571 }
0x29bc   :  { %v4583_v62 = vmul.f32 0.015625, %v4572_v43 }
0x29bd   :  { %v4602_v35 = vadd.f32 1e-05, %v4592_v31 }
0x29be   :  { %v4593_v45 = vsub.f32 %v4583_v62, %v4588_v54 }
0x29bf   :  { %6647 = vrsqrt.f32 %v4602_v35 }
0x29c0   :  { %v4603_v21 = vadd.f32 1e-05, %v4593_v45 }
0x29c2   :  { %6649 = vrsqrt.f32 %v4603_v21 }
0x29c9   :  { %v6648_v59 = vpop.eup %6647 }
0x29ca   :  { %v4612_v26 = vmul.f32 %v6648_v59, %v4597_v48 }
0x29cc   :  { %v6650_v39 = vpop.eup %6649  ;;  %v4621_v53 = vmul.f32 %v8215_v9, %v4612_v26 }
0x29cd   :  { %v4613_v18 = vmul.f32 %v6650_v39, %v4598_v36 }
0x29ce   :  { %v4630_v15 = vadd.f32 %v8220_v55, %v4621_v53 }
0x29cf   :  { %v4622_v61 = vmul.f32 %v8215_v9, %v4613_v18 }
0x29d1   :  { %v4631_v51 = vadd.f32 %v8220_v55, %v4622_v61 }
0x29d3   :  { %v4644_v52 = vpack.c.bf16 %v4631_v51, %v4630_v15 }
0x29d5   :  { %6204 = vmatmul.mubr.msk.bf16.vlgmr.msra.gmra.mrb[124].mxu0 %vm165_vm1, %v4644_v52 }
0x29d6   :  { %6207 = vmatprep.mubr.msk.bf16.mxu0 %vm6848_vm0, %v6847_v0 }
0x2a57   :  { %v4514_v20 = vpop.f32.mrb[128].mxu1 }
0x2a58   :  { %v4530_v57 = vadd.f32 %v4514_v20, %v7770_v63  ;;  %v6189_v27 = vpop.f32.mrb[129].mxu1 }
0x2a59   :  { %v4517_v28 = vpop.f32.mrb[130].mxu1 }
0x2a5a   :  { %v8234_v42 = vadd.f32 %v8189_v37, %v4530_v57  ;;  %v4531_v58 = vadd.f32 %v4517_v28, %v7774_v24  ;;  %v6190_v13 = vpop.f32.mrb[131].mxu1 }
0x2a5c   :  { %v8238_v7 = vadd.f32 %v8189_v37, %v4531_v58  ;;  %v4548_v5 = vsel %vm165_vm1, %v8234_v42, 0.0  ;;  %v4564_v10 = vmul.f32 %v8234_v42, %v8234_v42 }
0x2a5d   :  { %4549 = vadd.xlane.f32.xlu1 %v4548_v5 }
0x2a5e   :  { %v4551_v63 = vsel %vm165_vm1, %v8238_v7, 0.0  ;;  %v4565_v49 = vmul.f32 %v8238_v7, %v8238_v7  ;;  %v4573_v24 = vsel %vm165_vm1, %v4564_v10, 0.0 }
0x2a5f   :  { %4552 = vadd.xlane.f32.xlu0 %v4551_v63 }
0x2a60   :  { %v4576_v16 = vsel %vm165_vm1, %v4565_v49, 0.0 }
0x2a61   :  { %4574 = vadd.xlane.f32.xlu1 %v4573_v24 }
0x2a63   :  { %4577 = vadd.xlane.f32.xlu0 %v4576_v16 }
0x2a72   :  { %4048 = vrot.lane.b32.xlu1 %v8070_v6, %s6853_s1  ;;  %v6396_v6 = vld [vmem:[%s8406_s5 + $0x68] sm:$0xff]  }
0x2a73   :  { %6226 = vmatpush3.bf16.msra.mxu1 %v6396_v6 }
0x2a74   :  { %6227 = vmatprep.subr.bf16.mxu1 %v6847_v0 }
0x2a76   :  { %4414 = vrot.lane.b32.xlu1 %v8180_v47, %s6855_s12  ;;  %v6397_v47 = vld [vmem:[%s8406_s5 + $0x70] sm:$0xff]  }
0x2a77   :  { %6228 = vmatpush3.bf16.msra.mxu1 %v6397_v47 }
0x2a78   :  { %6229 = vmatprep.subr.bf16.mxu1 %v6847_v0 }
0x2a79   :  { %4231 = vrot.lane.b32.xlu0 %v8106_v23, %s6854_s25  ;;  %v8287_v23 = vrot.slane %v8185_v60, %v2320_v34 }
0x2a7b   :  { %6230 = vmatpush3.bf16.msra.mxu1 %v6398_v50 }
0x2a7c   :  { %6275 = vmatprep.subr.bf16.mxu1 %v6847_v0 }
0x2aa8   :  { %v4718_v1 = vpop.f32.mrb[124].mxu0 }
0x2aa9   :  { %v4719_v38 = vadd.f32 %v4718_v1, %v8287_v23  ;;  %v6205_v56 = vpop.f32.mrb[125].mxu0 }
0x2aaa   :  { %v4721_v11 = vpop.f32.mrb[126].mxu0 }
0x2aab   :  { %v4745_v4 = vmul.f32 0.70710677, %v4719_v38  ;;  %v4722_v30 = vadd.f32 %v4721_v11, %v8287_v23  ;;  %v6206_v32 = vpop.f32.mrb[127].mxu0  ;;  %v4740_v62 = vmul.f32 0.5, %v4719_v38 }
0x2aad   :  { %6651 = verf.f32 %v4745_v4  ;;  %v4746_v22 = vmul.f32 0.70710677, %v4722_v30  ;;  %v4741_v35 = vmul.f32 0.5, %v4722_v30 }
0x2aaf   :  { %6653 = verf.f32 %v4746_v22 }
0x2ab7   :  { %v6652_v31 = vpop.eup %6651 }
0x2ab8   :  { %v4755_v43 = vadd.f32 1.0, %v6652_v31  ;;  %v8315_v31 = vrot.slane %v8185_v60, %v2566_v46 }
0x2ab9   :  { %v6654_v54 = vpop.eup %6653 }
0x2aba   :  { %v4756_v45 = vadd.f32 1.0, %v6654_v54  ;;  %v4760_v34 = vmul.f32 %v4755_v43, %v4740_v62 }
0x2abc   :  { %v4761_v21 = vmul.f32 %v4756_v45, %v4741_v35 }
0x2abe   :  { %v4782_v48 = vpack.c.bf16 %v4761_v21, %v4760_v34 }
0x2aea   :  { %v4550_v59 = vpop.xlane.xlu1 %4549 }
0x2aeb   :  { %v4559_v26 = vmul.f32 0.015625, %v4550_v59 }
0x2aec   :  { %v4553_v36 = vpop.xlane.xlu0 %4552 }
0x2aed   :  { %v4560_v39 = vmul.f32 0.015625, %v4553_v36  ;;  %v4589_v53 = vmul.f32 %v4559_v26, %v4559_v26  ;;  %v4599_v5 = vsub.f32 %v8234_v42, %v4559_v26 }
0x2aee   :  { %v4575_v18 = vpop.xlane.xlu1 %4574 }
0x2aef   :  { %v4584_v61 = vmul.f32 0.015625, %v4575_v18  ;;  %v4590_v51 = vmul.f32 %v4560_v39, %v4560_v39  ;;  %v4600_v24 = vsub.f32 %v8238_v7, %v4560_v39 }
0x2af0   :  { %v4578_v15 = vpop.xlane.xlu0 %4577 }
0x2af1   :  { %v4594_v52 = vsub.f32 %v4584_v61, %v4589_v53  ;;  %v4585_v14 = vmul.f32 0.015625, %v4578_v15 }
0x2af2   :  { %v4049_v20 = vpop.permute.xlu1 %4048 }
0x2af3   :  { %v4604_v57 = vadd.f32 1e-05, %v4594_v52  ;;  %v4595_v27 = vsub.f32 %v4585_v14, %v4590_v51  ;;  %4055 = vst.msk [vmem:[#allocation2 + $0x21] sm:$0x1] %vm965_vm12, %v4049_v20  ;;  %v6399_v52 = vld [vmem:[#allocation10] sm:$0xff]   ;;  %v6400_v14 = vld [vmem:[#allocation10 + $0x8] sm:$0xff]  }
0x2af4   :  { %v4232_v28 = vpop.permute.xlu0 %4231  ;;  %6244 = vmatpush3.bf16.msra.mxu0 %v6399_v52  ;;  %v6401_v20 = vld [vmem:[#allocation10 + $0x10] sm:$0xff]  }
0x2af5   :  { %6655 = vrsqrt.f32 %v4604_v57  ;;  %v4605_v58 = vadd.f32 1e-05, %v4595_v27  ;;  %4238 = vst.msk [vmem:[#allocation2 + $0x21] sm:$0x1] %vm1150_vm13, %v4232_v28  ;;  %6245 = vmatprep.subr.bf16.mxu0 %v6847_v0  ;;  %v6402_v57 = vld [vmem:[#allocation10 + $0x18] sm:$0xff]  }
0x2af6   :  { %v4415_v13 = vpop.permute.xlu1 %4414 }
0x2af7   :  { %6657 = vrsqrt.f32 %v4605_v58  ;;  %4421 = vst.msk [vmem:[#allocation2 + $0x21] sm:$0x1] %vm1335_vm14, %v4415_v13 }
0x2af8   :  { %6246 = vmatpush3.bf16.msra.mxu0 %v6400_v14 }
0x2af9   :  { %6247 = vmatprep.subr.bf16.mxu0 %v6847_v0 }
0x2afc   :  { %6248 = vmatpush3.bf16.msra.mxu0 %v6401_v20 }
0x2afd   :  { %6249 = vmatprep.subr.bf16.mxu0 %v6847_v0 }
0x2afe   :  { %v4426_v10 = vld [vmem:[#allocation2 + $0x20] sm:$0x3] }
0x2aff   :  { %v6656_v63 = vpop.eup %6655  ;;  %v4438_v49 = vpack.c.bf16 %v4426_v10, %v4426_v10 }
0x2b00   :  { %v4614_v16 = vmul.f32 %v6656_v63, %v4599_v5  ;;  %6250 = vmatpush3.bf16.msra.mxu0 %v6402_v57 }
0x2b01   :  { %v6658_v19 = vpop.eup %6657  ;;  %6192 = vmatmul.mubr.msk.bf16.gmra.mrb[132].mxu1 %vm165_vm1, %v4438_v49  ;;  %6255 = vmatprep.subr.bf16.mxu0 %v6847_v0 }
0x2b02   :  { %6231 = vmatprep.mubr.msk.bf16.mxu1 %vm6848_vm0, %v6847_v0  ;;  %v4615_v29 = vmul.f32 %v6658_v19, %v4600_v24  ;;  %v4623_v2 = vmul.f32 %v8215_v9, %v4614_v16 }
0x2b04   :  { %v4624_v33 = vmul.f32 %v8215_v9, %v4615_v29  ;;  %v4632_v6 = vadd.f32 %v8220_v55, %v4623_v2 }
0x2b06   :  { %v4633_v47 = vadd.f32 %v8220_v55, %v4624_v33 }
0x2b08   :  { %v4645_v50 = vpack.c.bf16 %v4633_v47, %v4632_v6 }
0x2b09   :  { %6232 = vmatmul.mubr.bf16.vlgmr.msra.gmra.mrb[136].mxu1 %v4782_v48 }
0x2b0a   :  { %6208 = vmatmul.mubr.msk.bf16.gmra.mrb[128].mxu0 %vm165_vm1, %v4645_v50  ;;  %6235 = vmatprep.mubr.msk.bf16.mxu1 %vm6848_vm0, %v6847_v0 }
0x2b0b   :  { %6211 = vmatprep.mubr.msk.bf16.mxu0 %vm6848_vm0, %v6847_v0 }
0x2bd4   :  { %v4522_v7 = vpop.f32.mrb[132].mxu1 }
0x2bd5   :  { %v4532_v1 = vadd.f32 %v4522_v7, %v7787_v44  ;;  %v6193_v38 = vpop.f32.mrb[133].mxu1 }
0x2bd6   :  { %v4525_v56 = vpop.f32.mrb[134].mxu1 }
0x2bd7   :  { %v4541_v11 = vadd.f32 %v8189_v37, %v4532_v1  ;;  %v6194_v4 = vpop.f32.mrb[135].mxu1  ;;  %v6405_v56 = vld [vmem:[%s8409_s8 + $0x10] sm:$0xff]  }
0x2bd8   :  { %v6407_v4 = vld [vmem:[%s8409_s8 + $0x20] sm:$0xff]  }
0x2bd9   :  { %v4554_v30 = vsel %vm244_vm2, %v4541_v11, 0.0  ;;  %v4566_v32 = vmul.f32 %v4541_v11, %v4541_v11 }
0x2bda   :  { %4555 = vadd.xlane.f32.xlu1 %v4554_v30  ;;  %v6408_v30 = vld [vmem:[%s8409_s8 + $0x28] sm:$0xff]  }
0x2bdb   :  { %v4579_v22 = vsel %vm244_vm2, %v4566_v32, 0.0  ;;  %v6409_v32 = vld [vmem:[%s8409_s8 + $0x30] sm:$0xff]  }
0x2bdc   :  { %4580 = vadd.xlane.f32.xlu0 %v4579_v22  ;;  %v4867_v43 = vpop.f32.mrb[136].mxu1  ;;  %v6410_v22 = vld [vmem:[%s8409_s8 + $0x38] sm:$0xff]  }
0x2bdd   :  { %v4886_v44 = vadd.f32 %v4867_v43, %v8193_v3  ;;  %v4726_v54 = vpop.f32.mrb[128].mxu0  ;;  %v6233_v62 = vpop.f32.mrb[137].mxu1 }
0x2bde   :  { %v4727_v37 = vadd.f32 %v4726_v54, %v8287_v23  ;;  %v6209_v35 = vpop.f32.mrb[129].mxu0  ;;  %v4870_v45 = vpop.f32.mrb[138].mxu1 }
0x2bdf   :  { %v4892_v34 = vadd.f32 %v8315_v31, %v4886_v44  ;;  %v4729_v21 = vpop.f32.mrb[130].mxu0  ;;  %v6234_v48 = vpop.f32.mrb[139].mxu1 }
0x2be0   :  { %v4747_v59 = vmul.f32 0.70710677, %v4727_v37  ;;  %v4730_v17 = vadd.f32 %v4729_v21, %v8287_v23  ;;  %v6210_v46 = vpop.f32.mrb[131].mxu0  ;;  %v4742_v39 = vmul.f32 0.5, %v4727_v37 }
0x2be1   :  { %4895 = vst.msk [vmem:[#allocation3] sm:$0x1] %vm4894_vm15, %v4892_v34 }
0x2be2   :  { %6659 = verf.f32 %v4747_v59  ;;  %v4748_v60 = vmul.f32 0.70710677, %v4730_v17  ;;  %v4743_v18 = vmul.f32 0.5, %v4730_v17  ;;  %v8371_v59 = vld [vmem:[#allocation13] sm:$0xff] }
0x2be3   :  { %v4912_v17 = vrot.slane %v8371_v59, %v7133_v25  ;;  %v5005_v25 = vrot.slane %v8371_v59, %v7138_v40  ;;  %v6413_v40 = vld [vmem:[#allocation12 + $0x10] sm:$0xff]  }
0x2be4   :  { %6661 = verf.f32 %v4748_v60 }
0x2bec   :  { %v6660_v3 = vpop.eup %6659 }
0x2bed   :  { %v4757_v26 = vadd.f32 1.0, %v6660_v3 }
0x2bee   :  { %v6662_v36 = vpop.eup %6661 }
0x2bef   :  { %v4758_v53 = vadd.f32 1.0, %v6662_v36  ;;  %v4762_v61 = vmul.f32 %v4757_v26, %v4742_v39 }
0x2bf1   :  { %v4763_v15 = vmul.f32 %v4758_v53, %v4743_v18 }
0x2bf3   :  { %v4783_v51 = vpack.c.bf16 %v4763_v15, %v4762_v61 }
0x2bf5   :  { %6236 = vmatmul.mubr.bf16.gmra.mrb[140].mxu1 %v4783_v51 }
0x2bf6   :  { %6239 = vmatprep.mubr.msk.bf16.mxu1 %vm6848_vm0, %v6847_v0 }
0x2c67   :  { %v4556_v27 = vpop.xlane.xlu1 %4555 }
0x2c68   :  { %v4561_v28 = vmul.f32 0.015625, %v4556_v27 }
0x2c69   :  { %v4581_v58 = vpop.xlane.xlu0 %4580 }
0x2c6a   :  { %v4591_v13 = vmul.f32 %v4561_v28, %v4561_v28  ;;  %v4586_v5 = vmul.f32 0.015625, %v4581_v58  ;;  %v4601_v49 = vsub.f32 %v4541_v11, %v4561_v28  ;;  %v6406_v11 = vld [vmem:[%s8409_s8 + $0x18] sm:$0xff]  }
0x2c6c   :  { %v4596_v10 = vsub.f32 %v4586_v5, %v4591_v13 }
0x2c6e   :  { %v4606_v63 = vadd.f32 1e-05, %v4596_v10 }
0x2c70   :  { %6663 = vrsqrt.f32 %v4606_v63 }
0x2c7a   :  { %v6664_v24 = vpop.eup %6663 }
0x2c7b   :  { %v4616_v16 = vmul.f32 %v6664_v24, %v4601_v49  ;;  %v6411_v49 = vld [vmem:[#allocation12] sm:$0xff]   ;;  %v6412_v24 = vld [vmem:[#allocation12 + $0x8] sm:$0xff]  }
0x2c7c   :  { %6276 = vmatpush3.bf16.msra.mxu1 %v6411_v49 }
0x2c7d   :  { %v4625_v19 = vmul.f32 %v8215_v9, %v4616_v16  ;;  %6277 = vmatprep.subr.bf16.mxu1 %v6847_v0  ;;  %v6414_v16 = vld [vmem:[#allocation12 + $0x18] sm:$0xff]  }
0x2c7f   :  { %v4634_v29 = vadd.f32 %v8220_v55, %v4625_v19  ;;  %v6403_v55 = vld [vmem:[%s8409_s8] sm:$0xff]  }
0x2c80   :  { %6278 = vmatpush3.bf16.msra.mxu1 %v6412_v24 }
0x2c81   :  { %v4646_v2 = vpack.c.bf16 %v4634_v29, %v4634_v29  ;;  %6279 = vmatprep.subr.bf16.mxu1 %v6847_v0 }
0x2c83   :  { %6212 = vmatmul.mubr.msk.bf16.gmra.mrb[132].mxu0 %vm165_vm1, %v4646_v2 }
0x2c84   :  { %6251 = vmatprep.mubr.msk.bf16.mxu0 %vm6848_vm0, %v6847_v0  ;;  %6280 = vmatpush3.bf16.msra.mxu1 %v6413_v40 }
0x2c85   :  { %6281 = vmatprep.subr.bf16.mxu1 %v6847_v0 }
0x2c88   :  { %6282 = vmatpush3.bf16.msra.mxu1 %v6414_v16 }
0x2cc8   :  { %v4874_v33 = vpop.f32.mrb[140].mxu1 }
0x2cc9   :  { %v4887_v6 = vadd.f32 %v4874_v33, %v8234_v42  ;;  %v6237_v47 = vpop.f32.mrb[141].mxu1  ;;  %v6404_v42 = vld [vmem:[%s8409_s8 + $0x8] sm:$0xff]   ;;  %s6856_s8 = smov [#allocation15]  }
0x2cca   :  { %v4877_v50 = vpop.f32.mrb[142].mxu1  ;;  %s5206_s22 = sshll.u32 %s6856_s8, 4  ;;  %s5207_s22 = int_to_ptr.vmem [resolvable:$true] %s5206_s22 }
0x2ccb   :  { %v4893_v7 = vadd.f32 %v8315_v31, %v4887_v6  ;;  %v6238_v1 = vpop.f32.mrb[143].mxu1  ;;  %s6805_s23 = scalar_lea.vmem %s5207_s22, 32  ;;  %p6810_p7 = scmp.lt.s32.totalorder %s5207_s22, %s5207_s22 }
0x2ccc   :  { %p6806_p6 = scmp.ne.s32.totalorder %s5207_s22, %s6805_s23  ;;  %p6811_p8 = scmp.lt.s32.totalorder %s6805_s23, %s6805_s23 }
0x2ccd   :  { %4897 = vst.msk [vmem:[#allocation3] sm:$0x2] %vm4896_vm3, %v4893_v7  ;;  %v5112_v7 = vrot.slane %v8371_v59, %v7536_v8 }
0x2cce   :  { %p6812_p9 = por %p6811_p8, %p6810_p7 }
0x2cd0   :  { %p6813_p10 = pnand %p6812_p9, %p6806_p6 }
0x2cd4   :  { %v4898_v38 = vld [vmem:[#allocation3] sm:$0x3] }
0x2cd5   :  { %v4908_v9 = vpack.c.bf16 %v4898_v38, %v4898_v38 }
0x2cd7   :  { %6252 = vmatmul.mubr.msk.bf16.vlgmr.msra.gmra.mrb[136].mxu0 %vm165_vm1, %v4908_v9  ;;  %v5117_v9 = vrot.slane %v8371_v59, %v7578_v41 }
0x2cd8   :  { %6271 = vmatprep.mubr.msk.bf16.mxu0 %vm6848_vm0, %v6847_v0  ;;  %6256 = vmatpush3.bf16.msra.mxu0 %v6403_v55 }
0x2cd9   :  { %6257 = vmatprep.subr.bf16.mxu0 %v6847_v0 }
0x2cdc   :  { %6258 = vmatpush3.bf16.msra.mxu0 %v6404_v42 }
0x2cdd   :  { %6259 = vmatprep.subr.bf16.mxu0 %v6847_v0 }
0x2ce0   :  { %6260 = vmatpush3.bf16.msra.mxu0 %v6405_v56 }
0x2ce1   :  { %6261 = vmatprep.subr.bf16.mxu0 %v6847_v0 }
0x2ce4   :  { %6262 = vmatpush3.bf16.msra.mxu0 %v6406_v11  ;;  %v5131_v11 = vrot.slane %v8371_v59, %v7586_v12 }
0x2ce5   :  { %6263 = vmatprep.subr.bf16.mxu0 %v6847_v0 }
0x2ce8   :  { %6264 = vmatpush3.bf16.msra.mxu0 %v6407_v4 }
0x2ce9   :  { %6265 = vmatprep.subr.bf16.mxu0 %v6847_v0 }
0x2cec   :  { %6266 = vmatpush3.bf16.msra.mxu0 %v6408_v30 }
0x2ced   :  { %6267 = vmatprep.subr.bf16.mxu0 %v6847_v0 }
0x2cf0   :  { %6268 = vmatpush3.bf16.msra.mxu0 %v6409_v32 }
0x2cf1   :  { %6269 = vmatprep.subr.bf16.mxu0 %v6847_v0 }
0x2cf4   :  { %6270 = vmatpush3.bf16.msra.mxu0 %v6410_v22 }
0x2d56   :  { %v4734_v31 = vpop.f32.mrb[132].mxu0 }
0x2d57   :  { %v4735_v43 = vadd.f32 %v4734_v31, %v8287_v23  ;;  %v6213_v44 = vpop.f32.mrb[133].mxu0 }
0x2d58   :  { %v4737_v54 = vpop.f32.mrb[134].mxu0 }
0x2d59   :  { %v4749_v62 = vmul.f32 0.70710677, %v4735_v43  ;;  %v6214_v37 = vpop.f32.mrb[135].mxu0  ;;  %v4744_v45 = vmul.f32 0.5, %v4735_v43 }
0x2d5b   :  { %6665 = verf.f32 %v4749_v62 }
0x2d65   :  { %v6666_v35 = vpop.eup %6665 }
0x2d66   :  { %v4759_v34 = vadd.f32 1.0, %v6666_v35 }
0x2d68   :  { %v4764_v21 = vmul.f32 %v4759_v34, %v4744_v45 }
0x2d6a   :  { %v4784_v48 = vpack.c.bf16 %v4764_v21, %v4764_v21 }
0x2d6c   :  { %6240 = vmatmul.mubr.bf16.gmra.mrb[144].mxu1 %v4784_v48 }
0x2d6d   :  { %6283 = vmatprep.mubr.msk.bf16.mxu1 %vm6848_vm0, %v6847_v0 }
0x2daa   :  { %v4974_v23 = vpop.f32.mrb[136].mxu0 }
0x2dab   :  { %v4975_v46 = vadd.f32 %v4974_v23, %v4912_v17  ;;  %v6253_v60 = vpop.f32.mrb[137].mxu0 }
0x2dac   :  { %v4977_v3 = vpop.f32.mrb[138].mxu0 }
0x2dad   :  { %v4981_v26 = vmul.f32 0.70710677, %v4975_v46  ;;  %v6254_v36 = vpop.f32.mrb[139].mxu0  ;;  %v4980_v18 = vmul.f32 0.5, %v4975_v46 }
0x2daf   :  { %6667 = verf.f32 %v4981_v26 }
0x2db9   :  { %v6668_v39 = vpop.eup %6667 }
0x2dba   :  { %v4983_v53 = vadd.f32 1.0, %v6668_v39 }
0x2dbc   :  { %v4984_v61 = vmul.f32 %v4983_v53, %v4980_v18 }
0x2dbe   :  { %v5001_v15 = vpack.c.bf16 %v4984_v61, %v4984_v61 }
0x2dc0   :  { %6272 = vmatmul.mubr.bf16.vlgmr.msra.gmra.mrb[140].mxu0 %v5001_v15 }
0x2e3f   :  { %v4881_v51 = vpop.f32.mrb[144].mxu1 }
0x2e40   :  { %v6241_v52 = vpop.f32.mrb[145].mxu1 }
0x2e41   :  { %v4883_v14 = vpop.f32.mrb[146].mxu1 }
0x2e42   :  { %v6242_v20 = vpop.f32.mrb[147].mxu1 }
0x2e93   :  { %v5088_v57 = vpop.f32.mrb[140].mxu0 }
0x2e94   :  { %v5089_v27 = vadd.f32 %v5088_v57, %v5005_v25  ;;  %v6273_v28 = vpop.f32.mrb[141].mxu0 }
0x2e95   :  { %v5091_v58 = vpop.f32.mrb[142].mxu0 }
0x2e96   :  { %v6274_v13 = vpop.f32.mrb[143].mxu0  ;;  %v5094_v5 = vsel %vm244_vm2, %v5089_v27, 0.0  ;;  %v5098_v10 = vmul.f32 %v5089_v27, %v5089_v27 }
0x2e97   :  { %5095 = vadd.xlane.f32.xlu0 %v5094_v5 }
0x2e98   :  { %v5099_v63 = vsel %vm244_vm2, %v5098_v10, 0.0 }
0x2e99   :  { %5100 = vadd.xlane.f32.xlu1 %v5099_v63 }
0x2f24   :  { %v5096_v19 = vpop.xlane.xlu0 %5095 }
0x2f25   :  { %v5097_v29 = vmul.f32 0.015625, %v5096_v19 }
0x2f26   :  { %v5101_v2 = vpop.xlane.xlu1 %5100 }
0x2f27   :  { %v5103_v33 = vmul.f32 %v5097_v29, %v5097_v29  ;;  %v5102_v6 = vmul.f32 0.015625, %v5101_v2  ;;  %v5105_v1 = vsub.f32 %v5089_v27, %v5097_v29 }
0x2f29   :  { %v5104_v47 = vsub.f32 %v5102_v6, %v5103_v33 }
0x2f2b   :  { %v5106_v50 = vadd.f32 1e-05, %v5104_v47 }
0x2f2d   :  { %6669 = vrsqrt.f32 %v5106_v50 }
0x2f37   :  { %v6670_v38 = vpop.eup %6669 }
0x2f38   :  { %v5108_v55 = vmul.f32 %v6670_v38, %v5105_v1 }
0x2f3a   :  { %v5113_v0 = vmul.f32 %v5112_v7, %v5108_v55 }
0x2f3c   :  { %v5118_v42 = vadd.f32 %v5117_v9, %v5113_v0 }
0x2f3e   :  { %v5127_v56 = vpack.c.bf16 %v5118_v42, %v5118_v42 }
0x2f40   :  { %6284 = vmatmul.mubr.msk.bf16.vlgmr.msra.gmra.mrb[148].mxu1 %vm165_vm1, %v5127_v56 }
0x3013   :  { %v5193_v4 = vpop.f32.mrb[148].mxu1 }
0x3014   :  { %v5194_v30 = vadd.f32 %v5193_v4, %v5131_v11  ;;  %v6285_v32 = vpop.f32.mrb[149].mxu1 }
0x3015   :  { %v5196_v8 = vpop.f32.mrb[150].mxu1 }
0x3016   :  { %5199 = vst [vmem:[#allocation15] sm:$0x3] %v5194_v30  ;;  %v6286_v22 = vpop.f32.mrb[151].mxu1 }
0x3017   :  { %6816 = shalt.err (!%p6813_p10)
}
0x3018   :  { %s6817_s27 = scalar_lea.hbm %s8412_s11, 32 }
0x3019   :  { %p6818_p11 = scmp.ne.s32.totalorder %s8412_s11, %s6817_s27  ;;  %p6821_p12 = scmp.lt.u32.totalorder %s6817_s27, %s8412_s11 }
0x301b   :  { %p6823_p13 = pnand %p6821_p12, %p6818_p11 }
0x301d   :  { %6826 = shalt.err (!%p6823_p13)
}
0x301e   :  { %5209 = dma.vmem_to_hbm [thread:$0]  %s5207_s22, 32, %s8412_s11, [#allocation6]  }
0x301f   :  { %6835 = dma.done.wait [#allocation6], 32  }
0x3020   :  { %6836 = vsyncadd [#allocation6], 4294967264 }
0x3021   :  { %5213 = vsyncpa [#allocation5], 1 }
0x3022   :  { %5214 = vsyncpa [#allocation8], 1 }
0x3023   :  { %5215 = vsyncpa [#allocation11], 1 }
0x3024   :  { %5216 = vsyncpa [#allocation14], 1 }
0x3025   :  { %5217 = vsyncpa [#allocation6], 1 }

</bundles_post_ra>
